<compile_context>
chip_gen: v7x
topology: tpu7x:2x2x1
jax: 0.10.0
libtpu: 0.0.40
codegen_flags: <defaults>
</compile_context>

<pallas_src>
import functools

import jax
import jax.numpy as jnp
from jax.experimental import pallas as pl
from jax.experimental.pallas import tpu as pltpu

# ----------------------------- model config ---------------------------------
ELEMS = ["H", "O"]
ATOMIC_NUMBERS = {"H": 0, "O": 1}   # symbol -> embedding index (as in HermNet)
H = 32            # hidden_channels (small synthetic size)
R = 16            # num_rbf
LAYERS = 2        # num_layers
RC = 5.0          # cutoff
ENV_P = 5         # polynomial envelope exponent
INTENSIVE = False # extensive -> scatter reduce='sum'

VMEM_SPEC = pl.BlockSpec(memory_space=pltpu.MemorySpace.VMEM)


# ------------------------------- fused kernel --------------------------------
def hvnet_kernel(pos_ref, jsrc_ref, idstc_ref, idstr_ref, an_ref, bat_ref,
                 embed_ref, off_ref,
                 xw1_ref, xb1_ref, wproj_ref, bproj_ref, wf_ref, bf_ref,
                 uw_ref, aw1x_ref, aw1v_ref, ab1_ref, avss_ref, bvss_ref,
                 ow1_ref, ob1_ref, ow2_ref, ob2_ref,
                 energy_ref,
                 *, n, e, hid, ntypes, nlayers, ngraphs,
                 cutoff, coeff, p, intensive):
    f32 = jnp.float32
    h3 = 3 * hid
    h7 = 7 * hid

    def mm(a, b):
        return jnp.dot(a, b, preferred_element_type=f32)

    def silu(v):
        return v * jax.nn.sigmoid(v)

    # ---- one-hot gather / scatter operators built in-kernel -----------------
    jsrc = jsrc_ref[...]                                    # (E, 1) int32
    idst_c = idstc_ref[...]                                 # (E, 1) int32
    idst_r = idstr_ref[...]                                 # (1, E) int32
    an = an_ref[...]                                        # (N, 1) int32
    bat = bat_ref[...]                                      # (1, N) int32

    iota_en = jax.lax.broadcasted_iota(jnp.int32, (e, n), 1)
    gsrc = (iota_en == jsrc).astype(f32)                    # (E, N) gather src rows
    gdst = (iota_en == idst_c).astype(f32)                  # (E, N) gather dst rows
    iota_ne = jax.lax.broadcasted_iota(jnp.int32, (n, e), 0)
    sdst = (iota_ne == idst_r).astype(f32)                  # (N, E) scatter-add to dst
    type_onehot = (jax.lax.broadcasted_iota(jnp.int32, (n, ntypes), 1)
                   == an).astype(f32)                       # (N, T)
    graph_onehot = (jax.lax.broadcasted_iota(jnp.int32, (ngraphs, n), 0)
                    == bat).astype(f32)                     # (G, N)

    # ---- with_edge: distance + unit vector (never leaves VMEM) --------------
    pos = pos_ref[...]                                      # (N, 3)
    dv = mm(gsrc, pos) - mm(gdst, pos)                      # (E, 3) = pos[j] - pos[i]
    dist = jnp.sqrt(jnp.sum(dv * dv, axis=-1, keepdims=True))
    dist = jnp.where(dist <= 1e-6, 1e-6, dist)              # torch.isclose(0, atol=1e-6)
    inv_d = 1.0 / dist

    # lane-broadcast unit vector planes packed as (E, 3H), hoisted (no concat)
    lane3 = jax.lax.broadcasted_iota(jnp.int32, (e, h3), 1)
    evec3 = jnp.zeros((e, h3), f32)
    for k in range(3):
        blk = ((lane3 >= k * hid).astype(f32) * (lane3 < (k + 1) * hid).astype(f32))
        evec3 = evec3 + blk * (dv[:, k:k + 1] * inv_d)

    # ---- radial basis: Gaussian RBF * polynomial envelope (Horner) ----------
    ds = dist * (1.0 / cutoff)
    pf = float(p)
    a_c = -(pf + 1.0) * (pf + 2.0) / 2.0
    b_c = pf * (pf + 2.0)
    c_c = -pf * (pf + 1.0) / 2.0
    env = 1.0 + (ds ** p) * (a_c + ds * (b_c + ds * c_c))
    env = jnp.where(ds < 1.0, env, 0.0)
    edge_embed = env * jnp.exp(coeff * (ds - off_ref[...]) ** 2)   # (E, R)

    # ---- hoisted per-type edge masks / gates (layer-independent) ------------
    edge_type = mm(gdst, type_onehot)                       # (E, T) dst-type one-hot
    lanew = jax.lax.broadcasted_iota(jnp.int32, (e, ntypes * h7), 1)
    emask = jnp.zeros((e, ntypes * h7), f32)                # (E, T*7H) per-type block mask
    nm = []                                                 # per-type node mask * has-edges
    for t in range(ntypes):
        blk = ((lanew >= t * h7).astype(f32) * (lanew < (t + 1) * h7).astype(f32))
        emask = emask + blk * edge_type[:, t:t + 1]
        cnt = jnp.sum(edge_type[:, t:t + 1], axis=(0, 1), keepdims=True)
        nm.append(type_onehot[:, t:t + 1] * (cnt > 0.0).astype(f32))

    # ---- embedding lookup + zero equivariant features ------------------------
    x = mm(type_onehot, embed_ref[...])                     # (N, H)
    vec = jnp.zeros((n, h3), f32)                           # (N, 3H) x/y/z planes packed

    # ---- HeteroVertexConv / PaiNN layers (unrolled, all in VMEM) -------------
    for l in range(nlayers):
        # type-independent gather of equivariant features (hoisted out of t-loop)
        gvec = mm(gsrc, vec)                                # (E, 3H)
        # packed message projections (both types at once, lane-dense)
        hm = silu(mm(x, xw1_ref[l]) + xb1_ref[l])           # (N, T*H)
        xproj = mm(hm, wproj_ref[l]) + bproj_ref[l]         # (N, T*7H) [j|e1 x3|e2 x3]/type
        fproj = (mm(edge_embed, wf_ref[l]) + bf_ref[l]) * emask   # (E, T*7H), em folded in
        filt = mm(gsrc, xproj) * fproj                      # (E, T*7H) gathered + filtered

        new_x = jnp.zeros_like(x)
        new_vec = jnp.zeros_like(vec)
        for t in range(ntypes):
            b = t * h7
            idx = l * ntypes + t

            # -- PaiNN message block (already edge-masked via emask) --
            dx = filt[:, b:b + hid]                                        # (E, H)
            dvec = (gvec * filt[:, b + 4 * hid:b + 7 * hid]
                    + evec3 * filt[:, b + hid:b + 4 * hid])                # (E, 3H)
            x_t = x + mm(sdst, dx)                                         # scatter-add
            vec_t = vec + mm(sdst, dvec)                                   # (N, 3H)

            # -- PaiNN update block (packed 192 / 160-lane matmuls) --
            v12 = mm(vec_t, uw_ref[idx])                                   # (N, 6H)
            v1 = v12[:, :h3]
            v2 = v12[:, h3:]
            prod = v1 * v2
            vec_dot = prod[:, :hid] + prod[:, hid:2 * hid] + prod[:, 2 * hid:h3]
            sq = v2 * v2
            vec_norm = jnp.sqrt(sq[:, :hid] + sq[:, hid:2 * hid]
                                + sq[:, 2 * hid:h3] + 1e-8)
            hu = silu(mm(x_t, aw1x_ref[idx]) + mm(vec_norm, aw1v_ref[idx])
                      + ab1_ref[idx])
            a5 = mm(hu, avss_ref[idx]) + bvss_ref[idx]                     # (N, 5H)
            a_vv3 = a5[:, :h3]
            a_sv = a5[:, h3:4 * hid]
            a_ss = a5[:, 4 * hid:5 * hid]

            # -- residual + node-type mask + empty-subgraph gate (fused) --
            new_x = new_x + (x_t + a_sv * vec_dot + a_ss) * nm[t]
            new_vec = new_vec + (vec_t + a_vv3 * v1) * nm[t]
        x = new_x
        vec = new_vec

    # ---- output energy head + per-graph reduction (in-kernel) ----------------
    h1 = mm(x, ow1_ref[...]) + ob1_ref[...]
    h1 = h1 * jax.nn.sigmoid(h1) * (1.0 / 0.6)               # ScaledSiLU
    per_atom = mm(h1, ow2_ref[...]) + ob2_ref[...]           # (N, 1)
    energy = mm(graph_onehot, per_atom)                      # (G, 1), reduce='sum'
    if intensive:
        counts = mm(graph_onehot, jnp.ones((n, 1), f32))
        energy = energy / counts
    energy_ref[...] = energy


# -------------------------------- wrapper -------------------------------------
def hvnet_forward(params, pos, edge_index, atomic_number, batch, num_graphs):
    n = pos.shape[0]
    e = edge_index.shape[1]
    ntypes = len(ELEMS)
    coeff = -0.5 / (1.0 / (R - 1)) ** 2

    jsrc = edge_index[0].reshape(e, 1).astype(jnp.int32)
    idst_c = edge_index[1].reshape(e, 1).astype(jnp.int32)
    idst_r = edge_index[1].reshape(1, e).astype(jnp.int32)
    an = atomic_number.reshape(n, 1).astype(jnp.int32)
    bat = batch.reshape(1, n).astype(jnp.int32)

    kernel = functools.partial(
        hvnet_kernel, n=n, e=e, hid=H, ntypes=ntypes, nlayers=LAYERS,
        ngraphs=num_graphs, cutoff=RC, coeff=coeff, p=ENV_P, intensive=INTENSIVE)

    args = (pos.astype(jnp.float32), jsrc, idst_c, idst_r, an, bat,
            params["embed"], params["rbf_offsets"],
            params["xw1"], params["xb1"], params["wproj"], params["bproj"],
            params["wf"], params["bf"],
            params["uw"], params["aw1x"], params["aw1v"], params["ab1"],
            params["avss"], params["bvss"],
            params["ow1"], params["ob1"], params["ow2"], params["ob2"])

    energy = pl.pallas_call(
        kernel,
        out_shape=jax.ShapeDtypeStruct((num_graphs, 1), jnp.float32),
        in_specs=[VMEM_SPEC] * len(args),
        out_specs=VMEM_SPEC,
        compiler_params=pltpu.CompilerParams(vmem_limit_bytes=32 * 1024 * 1024),
    )(*args)
    return energy[:, 0]


# --------------------------- deterministic params -----------------------------
def init_params(key, hidden=H, num_rbf=R, num_layers=LAYERS):
    keys = iter(jax.random.split(key, 2048))

    def w(shape, scale=0.1):
        return scale * jax.random.normal(next(keys), shape, jnp.float32)

    T = len(ELEMS)
    eye3 = jnp.eye(3, dtype=jnp.float32)

    xw1_s, xb1_s, wproj_s, bproj_s, wf_s, bf_s = [], [], [], [], [], []
    uw_s, aw1x_s, aw1v_s, ab1_s, avss_s, bvss_s = [], [], [], [], [], []

    for _l in range(num_layers):
        xw1_t, xb1_t, wproj_blk, bproj_t, wf_t, bf_t = [], [], [], [], [], []
        for _t in range(T):
            xw1, xb1 = w((hidden, hidden)), w((1, hidden))
            wj, we1, we2 = w((hidden, hidden)), w((hidden, hidden)), w((hidden, hidden))
            bj, be1, be2 = w((1, hidden)), w((1, hidden)), w((1, hidden))
            rj, re1, re2 = w((num_rbf, hidden)), w((num_rbf, hidden)), w((num_rbf, hidden))
            rbj, rbe1, rbe2 = w((1, hidden)), w((1, hidden)), w((1, hidden))
            uw1, uw2 = w((hidden, hidden)), w((hidden, hidden))
            aw1x, aw1v, ab1 = w((hidden, hidden)), w((hidden, hidden)), w((1, hidden))
            avv, asv, ass = w((hidden, hidden)), w((hidden, hidden)), w((hidden, hidden))
            bvv, bsv, bss = w((1, hidden)), w((1, hidden)), w((1, hidden))

            xw1_t.append(xw1)
            xb1_t.append(xb1)
            # per-type 7H column layout: [ j | e1,e1,e1 | e2,e2,e2 ]  (lane replication
            # done host-side so the kernel needs no tile/concat for the equivariant msg)
            wproj_blk.append(jnp.concatenate([wj, we1, we1, we1, we2, we2, we2], axis=1))
            bproj_t.append(jnp.concatenate([bj, be1, be1, be1, be2, be2, be2], axis=1))
            wf_t.append(jnp.concatenate([rj, re1, re1, re1, re2, re2, re2], axis=1))
            bf_t.append(jnp.concatenate([rbj, rbe1, rbe1, rbe1, rbe2, rbe2, rbe2], axis=1))
            # update block: [kron(I3, uw1) | kron(I3, uw2)]  -> (3H, 6H)
            uw_s.append(jnp.concatenate([jnp.kron(eye3, uw1), jnp.kron(eye3, uw2)], axis=1))
            aw1x_s.append(aw1x)
            aw1v_s.append(aw1v)
            ab1_s.append(ab1)
            avss_s.append(jnp.concatenate([avv, avv, avv, asv, ass], axis=1))
            bvss_s.append(jnp.concatenate([bvv, bvv, bvv, bsv, bss], axis=1))

        xw1_s.append(jnp.concatenate(xw1_t, axis=1))        # (H, T*H)
        xb1_s.append(jnp.concatenate(xb1_t, axis=1))        # (1, T*H)
        wp = jnp.zeros((T * hidden, T * 7 * hidden), jnp.float32)   # block-diag over types
        for t in range(T):
            wp = wp.at[t * hidden:(t + 1) * hidden,
                       t * 7 * hidden:(t + 1) * 7 * hidden].set(wproj_blk[t])
        wproj_s.append(wp)
        bproj_s.append(jnp.concatenate(bproj_t, axis=1))
        wf_s.append(jnp.concatenate(wf_t, axis=1))
        bf_s.append(jnp.concatenate(bf_t, axis=1))

    return {
        "embed": w((len(ATOMIC_NUMBERS), hidden), 1.0),
        "rbf_offsets": jnp.linspace(0.0, 1.0, num_rbf, dtype=jnp.float32).reshape(1, -1),
        "xw1": jnp.stack(xw1_s),       # (L, H, T*H)
        "xb1": jnp.stack(xb1_s),       # (L, 1, T*H)
        "wproj": jnp.stack(wproj_s),   # (L, T*H, T*7H)
        "bproj": jnp.stack(bproj_s),   # (L, 1, T*7H)
        "wf": jnp.stack(wf_s),         # (L, R, T*7H)
        "bf": jnp.stack(bf_s),         # (L, 1, T*7H)
        "uw": jnp.stack(uw_s),         # (L*T, 3H, 6H)
        "aw1x": jnp.stack(aw1x_s),     # (L*T, H, H)
        "aw1v": jnp.stack(aw1v_s),     # (L*T, H, H)
        "ab1": jnp.stack(ab1_s),       # (L*T, 1, H)
        "avss": jnp.stack(avss_s),     # (L*T, H, 5H)
        "bvss": jnp.stack(bvss_s),     # (L*T, 1, 5H)
        "ow1": w((hidden, hidden // 2)), "ob1": w((1, hidden // 2)),
        "ow2": w((hidden // 2, 1)), "ob2": w((1, 1)),
    }


# ----------------------------------- main --------------------------------------
if __name__ == "__main__":
    key = jax.random.PRNGKey(0)
    pkey, poskey = jax.random.split(key)
    params = init_params(pkey)

    num_atoms = 8
    pos = 2.0 * jax.random.normal(poskey, (num_atoms, 3), jnp.float32)
    atomic_number = jnp.array([0, 1, 0, 1, 0, 1, 0, 1], jnp.int32)
    batch = jnp.array([0, 0, 0, 0, 1, 1, 1, 1], jnp.int32)

    # Two graphs of 4 atoms; each atom receives edges from its 2 ring neighbours.
    src, dst = [], []
    for g in range(2):
        off = 4 * g
        for k in range(4):
            dst += [off + k, off + k]
            src += [off + (k + 1) % 4, off + (k + 2) % 4]
    edge_index = jnp.array([src, dst], jnp.int32)   # row0 = j (source), row1 = i (dest)

    energy = hvnet_forward(params, pos, edge_index, atomic_number, batch, num_graphs=2)
    jax.block_until_ready(energy)
    print("KERNEL_OK")
</pallas_src>

<mosaic_0001>
module attributes {stable_mosaic.version = 11 : i64} {
  func.func @hvnet_kernel(%arg0: memref<8x3xf32, #tpu.memory_space<vmem>>, %arg1: memref<16x1xi32, #tpu.memory_space<vmem>>, %arg2: memref<16x1xi32, #tpu.memory_space<vmem>>, %arg3: memref<1x16xi32, #tpu.memory_space<vmem>>, %arg4: memref<8x1xi32, #tpu.memory_space<vmem>>, %arg5: memref<1x8xi32, #tpu.memory_space<vmem>>, %arg6: memref<2x32xf32, #tpu.memory_space<vmem>>, %arg7: memref<1x16xf32, #tpu.memory_space<vmem>>, %arg8: memref<2x32x64xf32, #tpu.memory_space<vmem>>, %arg9: memref<2x1x64xf32, #tpu.memory_space<vmem>>, %arg10: memref<2x64x448xf32, #tpu.memory_space<vmem>>, %arg11: memref<2x1x448xf32, #tpu.memory_space<vmem>>, %arg12: memref<2x16x448xf32, #tpu.memory_space<vmem>>, %arg13: memref<2x1x448xf32, #tpu.memory_space<vmem>>, %arg14: memref<4x96x192xf32, #tpu.memory_space<vmem>>, %arg15: memref<4x32x32xf32, #tpu.memory_space<vmem>>, %arg16: memref<4x32x32xf32, #tpu.memory_space<vmem>>, %arg17: memref<4x1x32xf32, #tpu.memory_space<vmem>>, %arg18: memref<4x32x160xf32, #tpu.memory_space<vmem>>, %arg19: memref<4x1x160xf32, #tpu.memory_space<vmem>>, %arg20: memref<32x16xf32, #tpu.memory_space<vmem>>, %arg21: memref<1x16xf32, #tpu.memory_space<vmem>>, %arg22: memref<16x1xf32, #tpu.memory_space<vmem>>, %arg23: memref<1x1xf32, #tpu.memory_space<vmem>>, %arg24: memref<2x1xf32, #tpu.memory_space<vmem>>) attributes {dimension_semantics = [], scalar_prefetch = 0 : i64, scratch_operands = 0 : i64, tpu.core_type = #tpu.core_type<tc>} {
    %c0 = arith.constant 0 : index
    %c0_0 = arith.constant 0 : index
    %0 = vector.load %arg1[%c0, %c0_0] : memref<16x1xi32, #tpu.memory_space<vmem>>, vector<16x1xi32>
    %c0_1 = arith.constant 0 : index
    %c0_2 = arith.constant 0 : index
    %1 = vector.load %arg2[%c0_1, %c0_2] : memref<16x1xi32, #tpu.memory_space<vmem>>, vector<16x1xi32>
    %c0_3 = arith.constant 0 : index
    %c0_4 = arith.constant 0 : index
    %2 = vector.load %arg3[%c0_3, %c0_4] : memref<1x16xi32, #tpu.memory_space<vmem>>, vector<1x16xi32>
    %c0_5 = arith.constant 0 : index
    %c0_6 = arith.constant 0 : index
    %3 = vector.load %arg4[%c0_5, %c0_6] : memref<8x1xi32, #tpu.memory_space<vmem>>, vector<8x1xi32>
    %c0_7 = arith.constant 0 : index
    %c0_8 = arith.constant 0 : index
    %4 = vector.load %arg5[%c0_7, %c0_8] : memref<1x8xi32, #tpu.memory_space<vmem>>, vector<1x8xi32>
    %5 = tpu.iota {dimensions = array<i32: 1>} : vector<16x8xi32>
    %6 = vector.broadcast %0 : vector<16x1xi32> to vector<16x8xi32>
    %7 = arith.cmpi eq, %5, %6 : vector<16x8xi32>
    %8 = arith.extui %7 : vector<16x8xi1> to vector<16x8xi32>
    %9 = arith.sitofp %8 : vector<16x8xi32> to vector<16x8xf32>
    %10 = vector.broadcast %1 : vector<16x1xi32> to vector<16x8xi32>
    %11 = arith.cmpi eq, %5, %10 : vector<16x8xi32>
    %12 = arith.extui %11 : vector<16x8xi1> to vector<16x8xi32>
    %13 = arith.sitofp %12 : vector<16x8xi32> to vector<16x8xf32>
    %14 = tpu.iota {dimensions = array<i32: 0>} : vector<8x16xi32>
    %15 = vector.broadcast %2 : vector<1x16xi32> to vector<8x16xi32>
    %16 = arith.cmpi eq, %14, %15 : vector<8x16xi32>
    %17 = arith.extui %16 : vector<8x16xi1> to vector<8x16xi32>
    %18 = arith.sitofp %17 : vector<8x16xi32> to vector<8x16xf32>
    %19 = tpu.iota {dimensions = array<i32: 1>} : vector<8x2xi32>
    %20 = vector.broadcast %3 : vector<8x1xi32> to vector<8x2xi32>
    %21 = arith.cmpi eq, %19, %20 : vector<8x2xi32>
    %22 = arith.extui %21 : vector<8x2xi1> to vector<8x2xi32>
    %23 = arith.sitofp %22 : vector<8x2xi32> to vector<8x2xf32>
    %24 = tpu.iota {dimensions = array<i32: 0>} : vector<2x8xi32>
    %25 = vector.broadcast %4 : vector<1x8xi32> to vector<2x8xi32>
    %26 = arith.cmpi eq, %24, %25 : vector<2x8xi32>
    %27 = arith.extui %26 : vector<2x8xi1> to vector<2x8xi32>
    %28 = arith.sitofp %27 : vector<2x8xi32> to vector<2x8xf32>
    %c0_9 = arith.constant 0 : index
    %c0_10 = arith.constant 0 : index
    %29 = vector.load %arg0[%c0_9, %c0_10] : memref<8x3xf32, #tpu.memory_space<vmem>>, vector<8x3xf32>
    %cst = arith.constant dense<0.000000e+00> : vector<16x3xf32>
    %30 = tpu.matmul %9, %29, %cst {dimension_numbers = #tpu.dot_dimension_numbers<[1], [0], [0], [1], [0, 0, 1, 1], [], []>} : vector<16x8xf32>, vector<8x3xf32>, vector<16x3xf32> -> vector<16x3xf32>
    %cst_11 = arith.constant dense<0.000000e+00> : vector<16x3xf32>
    %31 = tpu.matmul %13, %29, %cst_11 {dimension_numbers = #tpu.dot_dimension_numbers<[1], [0], [0], [1], [0, 0, 1, 1], [], []>} : vector<16x8xf32>, vector<8x3xf32>, vector<16x3xf32> -> vector<16x3xf32>
    %32 = arith.subf %30, %31 : vector<16x3xf32>
    %33 = arith.mulf %32, %32 : vector<16x3xf32>
    %cst_12 = arith.constant dense<0.000000e+00> : vector<16xf32>
    %34 = vector.multi_reduction <add>, %33, %cst_12 [1] : vector<16x3xf32> to vector<16xf32>
    %35 = vector.shape_cast %34 : vector<16xf32> to vector<16x1xf32>
    %36 = math.sqrt %35 : vector<16x1xf32>
    %cst_13 = arith.constant 9.99999997E-7 : f32
    %37 = vector.broadcast %cst_13 : f32 to vector<16x1xf32>
    %38 = arith.cmpf ole, %36, %37 : vector<16x1xf32>
    %cst_14 = arith.constant 9.99999997E-7 : f32
    %39 = vector.broadcast %cst_14 : f32 to vector<16x1xf32>
    %40 = arith.select %38, %39, %36 : vector<16x1xi1>, vector<16x1xf32>
    %cst_15 = arith.constant 1.000000e+00 : f32
    %41 = vector.broadcast %cst_15 : f32 to vector<16x1xf32>
    %42 = arith.divf %41, %40 : vector<16x1xf32>
    %43 = tpu.iota {dimensions = array<i32: 1>} : vector<16x96xi32>
    %cst_16 = arith.constant 0.000000e+00 : f32
    %44 = vector.broadcast %cst_16 : f32 to vector<16x96xf32>
    %c0_i32 = arith.constant 0 : i32
    %45 = vector.broadcast %c0_i32 : i32 to vector<16x96xi32>
    %46 = arith.cmpi sge, %43, %45 : vector<16x96xi32>
    %47 = arith.extui %46 : vector<16x96xi1> to vector<16x96xi32>
    %48 = arith.sitofp %47 : vector<16x96xi32> to vector<16x96xf32>
    %c32_i32 = arith.constant 32 : i32
    %49 = vector.broadcast %c32_i32 : i32 to vector<16x96xi32>
    %50 = arith.cmpi slt, %43, %49 : vector<16x96xi32>
    %51 = arith.extui %50 : vector<16x96xi1> to vector<16x96xi32>
    %52 = arith.sitofp %51 : vector<16x96xi32> to vector<16x96xf32>
    %53 = arith.mulf %48, %52 : vector<16x96xf32>
    %54 = vector.extract_strided_slice %32 {offsets = [0, 0], sizes = [16, 1], strides = [1, 1]} : vector<16x3xf32> to vector<16x1xf32>
    %55 = arith.mulf %54, %42 : vector<16x1xf32>
    %56 = vector.broadcast %55 : vector<16x1xf32> to vector<16x96xf32>
    %57 = arith.mulf %53, %56 : vector<16x96xf32>
    %58 = arith.addf %44, %57 : vector<16x96xf32>
    %c32_i32_17 = arith.constant 32 : i32
    %59 = vector.broadcast %c32_i32_17 : i32 to vector<16x96xi32>
    %60 = arith.cmpi sge, %43, %59 : vector<16x96xi32>
    %61 = arith.extui %60 : vector<16x96xi1> to vector<16x96xi32>
    %62 = arith.sitofp %61 : vector<16x96xi32> to vector<16x96xf32>
    %c64_i32 = arith.constant 64 : i32
    %63 = vector.broadcast %c64_i32 : i32 to vector<16x96xi32>
    %64 = arith.cmpi slt, %43, %63 : vector<16x96xi32>
    %65 = arith.extui %64 : vector<16x96xi1> to vector<16x96xi32>
    %66 = arith.sitofp %65 : vector<16x96xi32> to vector<16x96xf32>
    %67 = arith.mulf %62, %66 : vector<16x96xf32>
    %68 = vector.extract_strided_slice %32 {offsets = [0, 1], sizes = [16, 1], strides = [1, 1]} : vector<16x3xf32> to vector<16x1xf32>
    %69 = arith.mulf %68, %42 : vector<16x1xf32>
    %70 = vector.broadcast %69 : vector<16x1xf32> to vector<16x96xf32>
    %71 = arith.mulf %67, %70 : vector<16x96xf32>
    %72 = arith.addf %58, %71 : vector<16x96xf32>
    %c64_i32_18 = arith.constant 64 : i32
    %73 = vector.broadcast %c64_i32_18 : i32 to vector<16x96xi32>
    %74 = arith.cmpi sge, %43, %73 : vector<16x96xi32>
    %75 = arith.extui %74 : vector<16x96xi1> to vector<16x96xi32>
    %76 = arith.sitofp %75 : vector<16x96xi32> to vector<16x96xf32>
    %c96_i32 = arith.constant 96 : i32
    %77 = vector.broadcast %c96_i32 : i32 to vector<16x96xi32>
    %78 = arith.cmpi slt, %43, %77 : vector<16x96xi32>
    %79 = arith.extui %78 : vector<16x96xi1> to vector<16x96xi32>
    %80 = arith.sitofp %79 : vector<16x96xi32> to vector<16x96xf32>
    %81 = arith.mulf %76, %80 : vector<16x96xf32>
    %82 = vector.extract_strided_slice %32 {offsets = [0, 2], sizes = [16, 1], strides = [1, 1]} : vector<16x3xf32> to vector<16x1xf32>
    %83 = arith.mulf %82, %42 : vector<16x1xf32>
    %84 = vector.broadcast %83 : vector<16x1xf32> to vector<16x96xf32>
    %85 = arith.mulf %81, %84 : vector<16x96xf32>
    %86 = arith.addf %72, %85 : vector<16x96xf32>
    %cst_19 = arith.constant 2.000000e-01 : f32
    %87 = vector.broadcast %cst_19 : f32 to vector<16x1xf32>
    %88 = arith.mulf %40, %87 : vector<16x1xf32>
    %89 = arith.mulf %88, %88 : vector<16x1xf32>
    %90 = arith.mulf %89, %89 : vector<16x1xf32>
    %91 = arith.mulf %88, %90 : vector<16x1xf32>
    %cst_20 = arith.constant -1.500000e+01 : f32
    %92 = vector.broadcast %cst_20 : f32 to vector<16x1xf32>
    %93 = arith.mulf %88, %92 : vector<16x1xf32>
    %cst_21 = arith.constant 3.500000e+01 : f32
    %94 = vector.broadcast %cst_21 : f32 to vector<16x1xf32>
    %95 = arith.addf %94, %93 : vector<16x1xf32>
    %96 = arith.mulf %88, %95 : vector<16x1xf32>
    %cst_22 = arith.constant -2.100000e+01 : f32
    %97 = vector.broadcast %cst_22 : f32 to vector<16x1xf32>
    %98 = arith.addf %97, %96 : vector<16x1xf32>
    %99 = arith.mulf %91, %98 : vector<16x1xf32>
    %cst_23 = arith.constant 1.000000e+00 : f32
    %100 = vector.broadcast %cst_23 : f32 to vector<16x1xf32>
    %101 = arith.addf %100, %99 : vector<16x1xf32>
    %cst_24 = arith.constant 1.000000e+00 : f32
    %102 = vector.broadcast %cst_24 : f32 to vector<16x1xf32>
    %103 = arith.cmpf olt, %88, %102 : vector<16x1xf32>
    %cst_25 = arith.constant 0.000000e+00 : f32
    %104 = vector.broadcast %cst_25 : f32 to vector<16x1xf32>
    %105 = arith.select %103, %101, %104 : vector<16x1xi1>, vector<16x1xf32>
    %c0_26 = arith.constant 0 : index
    %c0_27 = arith.constant 0 : index
    %106 = vector.load %arg7[%c0_26, %c0_27] : memref<1x16xf32, #tpu.memory_space<vmem>>, vector<1x16xf32>
    %107 = vector.broadcast %88 : vector<16x1xf32> to vector<16x16xf32>
    %108 = vector.broadcast %106 : vector<1x16xf32> to vector<16x16xf32>
    %109 = arith.subf %107, %108 : vector<16x16xf32>
    %110 = arith.mulf %109, %109 : vector<16x16xf32>
    %cst_28 = arith.constant -1.125000e+02 : f32
    %111 = vector.broadcast %cst_28 : f32 to vector<16x16xf32>
    %112 = arith.mulf %111, %110 : vector<16x16xf32>
    %113 = math.exp %112 : vector<16x16xf32>
    %114 = vector.broadcast %105 : vector<16x1xf32> to vector<16x16xf32>
    %115 = arith.mulf %114, %113 : vector<16x16xf32>
    %cst_29 = arith.constant dense<0.000000e+00> : vector<16x2xf32>
    %116 = tpu.matmul %13, %23, %cst_29 {dimension_numbers = #tpu.dot_dimension_numbers<[1], [0], [0], [1], [0, 0, 1, 1], [], []>} : vector<16x8xf32>, vector<8x2xf32>, vector<16x2xf32> -> vector<16x2xf32>
    %117 = tpu.iota {dimensions = array<i32: 1>} : vector<16x448xi32>
    %cst_30 = arith.constant 0.000000e+00 : f32
    %118 = vector.broadcast %cst_30 : f32 to vector<16x448xf32>
    %c0_i32_31 = arith.constant 0 : i32
    %119 = vector.broadcast %c0_i32_31 : i32 to vector<16x448xi32>
    %120 = arith.cmpi sge, %117, %119 : vector<16x448xi32>
    %121 = arith.extui %120 : vector<16x448xi1> to vector<16x448xi32>
    %122 = arith.sitofp %121 : vector<16x448xi32> to vector<16x448xf32>
    %c224_i32 = arith.constant 224 : i32
    %123 = vector.broadcast %c224_i32 : i32 to vector<16x448xi32>
    %124 = arith.cmpi slt, %117, %123 : vector<16x448xi32>
    %125 = arith.extui %124 : vector<16x448xi1> to vector<16x448xi32>
    %126 = arith.sitofp %125 : vector<16x448xi32> to vector<16x448xf32>
    %127 = arith.mulf %122, %126 : vector<16x448xf32>
    %128 = vector.extract_strided_slice %116 {offsets = [0, 0], sizes = [16, 1], strides = [1, 1]} : vector<16x2xf32> to vector<16x1xf32>
    %129 = vector.broadcast %128 : vector<16x1xf32> to vector<16x448xf32>
    %130 = arith.mulf %127, %129 : vector<16x448xf32>
    %131 = arith.addf %118, %130 : vector<16x448xf32>
    %132 = vector.extract_strided_slice %116 {offsets = [0, 0], sizes = [16, 1], strides = [1, 1]} : vector<16x2xf32> to vector<16x1xf32>
    %133 = vector.shape_cast %132 : vector<16x1xf32> to vector<1x16x1xf32>
    %cst_32 = arith.constant dense<0.000000e+00> : vector<1xf32>
    %134 = vector.multi_reduction <add>, %133, %cst_32 [1, 2] : vector<1x16x1xf32> to vector<1xf32>
    %135 = vector.shape_cast %134 : vector<1xf32> to vector<1x1x1xf32>
    %136 = vector.extract %135[0, 0, 0] : f32 from vector<1x1x1xf32>
    %137 = vector.broadcast %136 : f32 to vector<1x1xf32>
    %138 = vector.extract_strided_slice %23 {offsets = [0, 0], sizes = [8, 1], strides = [1, 1]} : vector<8x2xf32> to vector<8x1xf32>
    %cst_33 = arith.constant 0.000000e+00 : f32
    %139 = vector.broadcast %cst_33 : f32 to vector<1x1xf32>
    %140 = arith.cmpf ogt, %137, %139 : vector<1x1xf32>
    %141 = arith.extui %140 : vector<1x1xi1> to vector<1x1xi32>
    %142 = arith.sitofp %141 : vector<1x1xi32> to vector<1x1xf32>
    %143 = vector.broadcast %142 : vector<1x1xf32> to vector<8x1xf32>
    %144 = arith.mulf %138, %143 : vector<8x1xf32>
    %c224_i32_34 = arith.constant 224 : i32
    %145 = vector.broadcast %c224_i32_34 : i32 to vector<16x448xi32>
    %146 = arith.cmpi sge, %117, %145 : vector<16x448xi32>
    %147 = arith.extui %146 : vector<16x448xi1> to vector<16x448xi32>
    %148 = arith.sitofp %147 : vector<16x448xi32> to vector<16x448xf32>
    %c448_i32 = arith.constant 448 : i32
    %149 = vector.broadcast %c448_i32 : i32 to vector<16x448xi32>
    %150 = arith.cmpi slt, %117, %149 : vector<16x448xi32>
    %151 = arith.extui %150 : vector<16x448xi1> to vector<16x448xi32>
    %152 = arith.sitofp %151 : vector<16x448xi32> to vector<16x448xf32>
    %153 = arith.mulf %148, %152 : vector<16x448xf32>
    %154 = vector.extract_strided_slice %116 {offsets = [0, 1], sizes = [16, 1], strides = [1, 1]} : vector<16x2xf32> to vector<16x1xf32>
    %155 = vector.broadcast %154 : vector<16x1xf32> to vector<16x448xf32>
    %156 = arith.mulf %153, %155 : vector<16x448xf32>
    %157 = arith.addf %131, %156 : vector<16x448xf32>
    %158 = vector.extract_strided_slice %116 {offsets = [0, 1], sizes = [16, 1], strides = [1, 1]} : vector<16x2xf32> to vector<16x1xf32>
    %159 = vector.shape_cast %158 : vector<16x1xf32> to vector<1x16x1xf32>
    %cst_35 = arith.constant dense<0.000000e+00> : vector<1xf32>
    %160 = vector.multi_reduction <add>, %159, %cst_35 [1, 2] : vector<1x16x1xf32> to vector<1xf32>
    %161 = vector.shape_cast %160 : vector<1xf32> to vector<1x1x1xf32>
    %162 = vector.extract %161[0, 0, 0] : f32 from vector<1x1x1xf32>
    %163 = vector.broadcast %162 : f32 to vector<1x1xf32>
    %164 = vector.extract_strided_slice %23 {offsets = [0, 1], sizes = [8, 1], strides = [1, 1]} : vector<8x2xf32> to vector<8x1xf32>
    %cst_36 = arith.constant 0.000000e+00 : f32
    %165 = vector.broadcast %cst_36 : f32 to vector<1x1xf32>
    %166 = arith.cmpf ogt, %163, %165 : vector<1x1xf32>
    %167 = arith.extui %166 : vector<1x1xi1> to vector<1x1xi32>
    %168 = arith.sitofp %167 : vector<1x1xi32> to vector<1x1xf32>
    %169 = vector.broadcast %168 : vector<1x1xf32> to vector<8x1xf32>
    %170 = arith.mulf %164, %169 : vector<8x1xf32>
    %c0_37 = arith.constant 0 : index
    %c0_38 = arith.constant 0 : index
    %171 = vector.load %arg6[%c0_37, %c0_38] : memref<2x32xf32, #tpu.memory_space<vmem>>, vector<2x32xf32>
    %cst_39 = arith.constant dense<0.000000e+00> : vector<8x32xf32>
    %172 = tpu.matmul %23, %171, %cst_39 {dimension_numbers = #tpu.dot_dimension_numbers<[1], [0], [0], [1], [0, 0, 1, 1], [], []>} : vector<8x2xf32>, vector<2x32xf32>, vector<8x32xf32> -> vector<8x32xf32>
    %cst_40 = arith.constant 0.000000e+00 : f32
    %173 = vector.broadcast %cst_40 : f32 to vector<8x96xf32>
    %cst_41 = arith.constant dense<0.000000e+00> : vector<16x96xf32>
    %174 = tpu.matmul %9, %173, %cst_41 {dimension_numbers = #tpu.dot_dimension_numbers<[1], [0], [0], [1], [0, 0, 1, 1], [], []>} : vector<16x8xf32>, vector<8x96xf32>, vector<16x96xf32> -> vector<16x96xf32>
    %c0_42 = arith.constant 0 : index
    %c0_43 = arith.constant 0 : index
    %c0_44 = arith.constant 0 : index
    %175 = vector.load %arg8[%c0_42, %c0_43, %c0_44] : memref<2x32x64xf32, #tpu.memory_space<vmem>>, vector<1x32x64xf32>
    %176 = vector.shape_cast %175 : vector<1x32x64xf32> to vector<32x64xf32>
    %cst_45 = arith.constant dense<0.000000e+00> : vector<8x64xf32>
    %177 = tpu.matmul %172, %176, %cst_45 {dimension_numbers = #tpu.dot_dimension_numbers<[1], [0], [0], [1], [0, 0, 1, 1], [], []>} : vector<8x32xf32>, vector<32x64xf32>, vector<8x64xf32> -> vector<8x64xf32>
    %c0_46 = arith.constant 0 : index
    %c0_47 = arith.constant 0 : index
    %c0_48 = arith.constant 0 : index
    %178 = vector.load %arg9[%c0_46, %c0_47, %c0_48] : memref<2x1x64xf32, #tpu.memory_space<vmem>>, vector<1x1x64xf32>
    %179 = vector.shape_cast %178 : vector<1x1x64xf32> to vector<1x64xf32>
    %180 = vector.broadcast %179 : vector<1x64xf32> to vector<8x64xf32>
    %181 = arith.addf %177, %180 : vector<8x64xf32>
    %182 = arith.negf %181 : vector<8x64xf32>
    %183 = math.exp %182 : vector<8x64xf32>
    %cst_49 = arith.constant 1.000000e+00 : f32
    %184 = vector.broadcast %cst_49 : f32 to vector<8x64xf32>
    %185 = arith.addf %184, %183 : vector<8x64xf32>
    %186 = arith.divf %184, %185 : vector<8x64xf32>
    %187 = arith.mulf %181, %186 : vector<8x64xf32>
    %c0_50 = arith.constant 0 : index
    %c0_51 = arith.constant 0 : index
    %c0_52 = arith.constant 0 : index
    %188 = vector.load %arg10[%c0_50, %c0_51, %c0_52] : memref<2x64x448xf32, #tpu.memory_space<vmem>>, vector<1x64x448xf32>
    %189 = vector.shape_cast %188 : vector<1x64x448xf32> to vector<64x448xf32>
    %cst_53 = arith.constant dense<0.000000e+00> : vector<8x448xf32>
    %190 = tpu.matmul %187, %189, %cst_53 {dimension_numbers = #tpu.dot_dimension_numbers<[1], [0], [0], [1], [0, 0, 1, 1], [], []>} : vector<8x64xf32>, vector<64x448xf32>, vector<8x448xf32> -> vector<8x448xf32>
    %c0_54 = arith.constant 0 : index
    %c0_55 = arith.constant 0 : index
    %c0_56 = arith.constant 0 : index
    %191 = vector.load %arg11[%c0_54, %c0_55, %c0_56] : memref<2x1x448xf32, #tpu.memory_space<vmem>>, vector<1x1x448xf32>
    %192 = vector.shape_cast %191 : vector<1x1x448xf32> to vector<1x448xf32>
    %193 = vector.broadcast %192 : vector<1x448xf32> to vector<8x448xf32>
    %194 = arith.addf %190, %193 : vector<8x448xf32>
    %c0_57 = arith.constant 0 : index
    %c0_58 = arith.constant 0 : index
    %c0_59 = arith.constant 0 : index
    %195 = vector.load %arg12[%c0_57, %c0_58, %c0_59] : memref<2x16x448xf32, #tpu.memory_space<vmem>>, vector<1x16x448xf32>
    %196 = vector.shape_cast %195 : vector<1x16x448xf32> to vector<16x448xf32>
    %cst_60 = arith.constant dense<0.000000e+00> : vector<16x448xf32>
    %197 = tpu.matmul %115, %196, %cst_60 {dimension_numbers = #tpu.dot_dimension_numbers<[1], [0], [0], [1], [0, 0, 1, 1], [], []>} : vector<16x16xf32>, vector<16x448xf32>, vector<16x448xf32> -> vector<16x448xf32>
    %c0_61 = arith.constant 0 : index
    %c0_62 = arith.constant 0 : index
    %c0_63 = arith.constant 0 : index
    %198 = vector.load %arg13[%c0_61, %c0_62, %c0_63] : memref<2x1x448xf32, #tpu.memory_space<vmem>>, vector<1x1x448xf32>
    %199 = vector.shape_cast %198 : vector<1x1x448xf32> to vector<1x448xf32>
    %200 = vector.broadcast %199 : vector<1x448xf32> to vector<16x448xf32>
    %201 = arith.addf %197, %200 : vector<16x448xf32>
    %202 = arith.mulf %201, %157 : vector<16x448xf32>
    %cst_64 = arith.constant dense<0.000000e+00> : vector<16x448xf32>
    %203 = tpu.matmul %9, %194, %cst_64 {dimension_numbers = #tpu.dot_dimension_numbers<[1], [0], [0], [1], [0, 0, 1, 1], [], []>} : vector<16x8xf32>, vector<8x448xf32>, vector<16x448xf32> -> vector<16x448xf32>
    %204 = arith.mulf %203, %202 : vector<16x448xf32>
    %cst_65 = arith.constant 0.000000e+00 : f32
    %205 = vector.broadcast %cst_65 : f32 to vector<8x32xf32>
    %cst_66 = arith.constant 0.000000e+00 : f32
    %206 = vector.broadcast %cst_66 : f32 to vector<8x96xf32>
    %207 = vector.extract_strided_slice %204 {offsets = [0, 0], sizes = [16, 32], strides = [1, 1]} : vector<16x448xf32> to vector<16x32xf32>
    %208 = vector.extract_strided_slice %204 {offsets = [0, 128], sizes = [16, 96], strides = [1, 1]} : vector<16x448xf32> to vector<16x96xf32>
    %209 = arith.mulf %174, %208 : vector<16x96xf32>
    %210 = vector.extract_strided_slice %204 {offsets = [0, 32], sizes = [16, 96], strides = [1, 1]} : vector<16x448xf32> to vector<16x96xf32>
    %211 = arith.mulf %86, %210 : vector<16x96xf32>
    %212 = arith.addf %209, %211 : vector<16x96xf32>
    %cst_67 = arith.constant dense<0.000000e+00> : vector<8x32xf32>
    %213 = tpu.matmul %18, %207, %cst_67 {dimension_numbers = #tpu.dot_dimension_numbers<[1], [0], [0], [1], [0, 0, 1, 1], [], []>} : vector<8x16xf32>, vector<16x32xf32>, vector<8x32xf32> -> vector<8x32xf32>
    %214 = arith.addf %172, %213 : vector<8x32xf32>
    %cst_68 = arith.constant dense<0.000000e+00> : vector<8x96xf32>
    %215 = tpu.matmul %18, %212, %cst_68 {dimension_numbers = #tpu.dot_dimension_numbers<[1], [0], [0], [1], [0, 0, 1, 1], [], []>} : vector<8x16xf32>, vector<16x96xf32>, vector<8x96xf32> -> vector<8x96xf32>
    %216 = arith.addf %173, %215 : vector<8x96xf32>
    %c0_69 = arith.constant 0 : index
    %c0_70 = arith.constant 0 : index
    %c0_71 = arith.constant 0 : index
    %217 = vector.load %arg14[%c0_69, %c0_70, %c0_71] : memref<4x96x192xf32, #tpu.memory_space<vmem>>, vector<1x96x192xf32>
    %218 = vector.shape_cast %217 : vector<1x96x192xf32> to vector<96x192xf32>
    %cst_72 = arith.constant dense<0.000000e+00> : vector<8x192xf32>
    %219 = tpu.matmul %216, %218, %cst_72 {dimension_numbers = #tpu.dot_dimension_numbers<[1], [0], [0], [1], [0, 0, 1, 1], [], []>} : vector<8x96xf32>, vector<96x192xf32>, vector<8x192xf32> -> vector<8x192xf32>
    %220 = vector.extract_strided_slice %219 {offsets = [0, 0], sizes = [8, 96], strides = [1, 1]} : vector<8x192xf32> to vector<8x96xf32>
    %221 = vector.extract_strided_slice %219 {offsets = [0, 96], sizes = [8, 96], strides = [1, 1]} : vector<8x192xf32> to vector<8x96xf32>
    %222 = arith.mulf %220, %221 : vector<8x96xf32>
    %223 = vector.extract_strided_slice %222 {offsets = [0, 0], sizes = [8, 32], strides = [1, 1]} : vector<8x96xf32> to vector<8x32xf32>
    %224 = vector.extract_strided_slice %222 {offsets = [0, 32], sizes = [8, 32], strides = [1, 1]} : vector<8x96xf32> to vector<8x32xf32>
    %225 = arith.addf %223, %224 : vector<8x32xf32>
    %226 = vector.extract_strided_slice %222 {offsets = [0, 64], sizes = [8, 32], strides = [1, 1]} : vector<8x96xf32> to vector<8x32xf32>
    %227 = arith.addf %225, %226 : vector<8x32xf32>
    %228 = arith.mulf %221, %221 : vector<8x96xf32>
    %229 = vector.extract_strided_slice %228 {offsets = [0, 0], sizes = [8, 32], strides = [1, 1]} : vector<8x96xf32> to vector<8x32xf32>
    %230 = vector.extract_strided_slice %228 {offsets = [0, 32], sizes = [8, 32], strides = [1, 1]} : vector<8x96xf32> to vector<8x32xf32>
    %231 = arith.addf %229, %230 : vector<8x32xf32>
    %232 = vector.extract_strided_slice %228 {offsets = [0, 64], sizes = [8, 32], strides = [1, 1]} : vector<8x96xf32> to vector<8x32xf32>
    %233 = arith.addf %231, %232 : vector<8x32xf32>
    %cst_73 = arith.constant 9.99999993E-9 : f32
    %234 = vector.broadcast %cst_73 : f32 to vector<8x32xf32>
    %235 = arith.addf %233, %234 : vector<8x32xf32>
    %236 = math.sqrt %235 : vector<8x32xf32>
    %c0_74 = arith.constant 0 : index
    %c0_75 = arith.constant 0 : index
    %c0_76 = arith.constant 0 : index
    %237 = vector.load %arg15[%c0_74, %c0_75, %c0_76] : memref<4x32x32xf32, #tpu.memory_space<vmem>>, vector<1x32x32xf32>
    %238 = vector.shape_cast %237 : vector<1x32x32xf32> to vector<32x32xf32>
    %cst_77 = arith.constant dense<0.000000e+00> : vector<8x32xf32>
    %239 = tpu.matmul %214, %238, %cst_77 {dimension_numbers = #tpu.dot_dimension_numbers<[1], [0], [0], [1], [0, 0, 1, 1], [], []>} : vector<8x32xf32>, vector<32x32xf32>, vector<8x32xf32> -> vector<8x32xf32>
    %c0_78 = arith.constant 0 : index
    %c0_79 = arith.constant 0 : index
    %c0_80 = arith.constant 0 : index
    %240 = vector.load %arg16[%c0_78, %c0_79, %c0_80] : memref<4x32x32xf32, #tpu.memory_space<vmem>>, vector<1x32x32xf32>
    %241 = vector.shape_cast %240 : vector<1x32x32xf32> to vector<32x32xf32>
    %cst_81 = arith.constant dense<0.000000e+00> : vector<8x32xf32>
    %242 = tpu.matmul %236, %241, %cst_81 {dimension_numbers = #tpu.dot_dimension_numbers<[1], [0], [0], [1], [0, 0, 1, 1], [], []>} : vector<8x32xf32>, vector<32x32xf32>, vector<8x32xf32> -> vector<8x32xf32>
    %243 = arith.addf %239, %242 : vector<8x32xf32>
    %c0_82 = arith.constant 0 : index
    %c0_83 = arith.constant 0 : index
    %c0_84 = arith.constant 0 : index
    %244 = vector.load %arg17[%c0_82, %c0_83, %c0_84] : memref<4x1x32xf32, #tpu.memory_space<vmem>>, vector<1x1x32xf32>
    %245 = vector.shape_cast %244 : vector<1x1x32xf32> to vector<1x32xf32>
    %246 = vector.broadcast %245 : vector<1x32xf32> to vector<8x32xf32>
    %247 = arith.addf %243, %246 : vector<8x32xf32>
    %248 = arith.negf %247 : vector<8x32xf32>
    %249 = math.exp %248 : vector<8x32xf32>
    %cst_85 = arith.constant 1.000000e+00 : f32
    %250 = vector.broadcast %cst_85 : f32 to vector<8x32xf32>
    %251 = arith.addf %250, %249 : vector<8x32xf32>
    %252 = arith.divf %250, %251 : vector<8x32xf32>
    %253 = arith.mulf %247, %252 : vector<8x32xf32>
    %c0_86 = arith.constant 0 : index
    %c0_87 = arith.constant 0 : index
    %c0_88 = arith.constant 0 : index
    %254 = vector.load %arg18[%c0_86, %c0_87, %c0_88] : memref<4x32x160xf32, #tpu.memory_space<vmem>>, vector<1x32x160xf32>
    %255 = vector.shape_cast %254 : vector<1x32x160xf32> to vector<32x160xf32>
    %cst_89 = arith.constant dense<0.000000e+00> : vector<8x160xf32>
    %256 = tpu.matmul %253, %255, %cst_89 {dimension_numbers = #tpu.dot_dimension_numbers<[1], [0], [0], [1], [0, 0, 1, 1], [], []>} : vector<8x32xf32>, vector<32x160xf32>, vector<8x160xf32> -> vector<8x160xf32>
    %c0_90 = arith.constant 0 : index
    %c0_91 = arith.constant 0 : index
    %c0_92 = arith.constant 0 : index
    %257 = vector.load %arg19[%c0_90, %c0_91, %c0_92] : memref<4x1x160xf32, #tpu.memory_space<vmem>>, vector<1x1x160xf32>
    %258 = vector.shape_cast %257 : vector<1x1x160xf32> to vector<1x160xf32>
    %259 = vector.broadcast %258 : vector<1x160xf32> to vector<8x160xf32>
    %260 = arith.addf %256, %259 : vector<8x160xf32>
    %261 = vector.extract_strided_slice %260 {offsets = [0, 0], sizes = [8, 96], strides = [1, 1]} : vector<8x160xf32> to vector<8x96xf32>
    %262 = vector.extract_strided_slice %260 {offsets = [0, 96], sizes = [8, 32], strides = [1, 1]} : vector<8x160xf32> to vector<8x32xf32>
    %263 = vector.extract_strided_slice %260 {offsets = [0, 128], sizes = [8, 32], strides = [1, 1]} : vector<8x160xf32> to vector<8x32xf32>
    %264 = arith.mulf %262, %227 : vector<8x32xf32>
    %265 = arith.addf %214, %264 : vector<8x32xf32>
    %266 = arith.addf %265, %263 : vector<8x32xf32>
    %267 = vector.broadcast %144 : vector<8x1xf32> to vector<8x32xf32>
    %268 = arith.mulf %266, %267 : vector<8x32xf32>
    %269 = arith.addf %205, %268 : vector<8x32xf32>
    %270 = arith.mulf %261, %220 : vector<8x96xf32>
    %271 = arith.addf %216, %270 : vector<8x96xf32>
    %272 = vector.broadcast %144 : vector<8x1xf32> to vector<8x96xf32>
    %273 = arith.mulf %271, %272 : vector<8x96xf32>
    %274 = arith.addf %206, %273 : vector<8x96xf32>
    %275 = vector.extract_strided_slice %204 {offsets = [0, 224], sizes = [16, 32], strides = [1, 1]} : vector<16x448xf32> to vector<16x32xf32>
    %276 = vector.extract_strided_slice %204 {offsets = [0, 352], sizes = [16, 96], strides = [1, 1]} : vector<16x448xf32> to vector<16x96xf32>
    %277 = arith.mulf %174, %276 : vector<16x96xf32>
    %278 = vector.extract_strided_slice %204 {offsets = [0, 256], sizes = [16, 96], strides = [1, 1]} : vector<16x448xf32> to vector<16x96xf32>
    %279 = arith.mulf %86, %278 : vector<16x96xf32>
    %280 = arith.addf %277, %279 : vector<16x96xf32>
    %cst_93 = arith.constant dense<0.000000e+00> : vector<8x32xf32>
    %281 = tpu.matmul %18, %275, %cst_93 {dimension_numbers = #tpu.dot_dimension_numbers<[1], [0], [0], [1], [0, 0, 1, 1], [], []>} : vector<8x16xf32>, vector<16x32xf32>, vector<8x32xf32> -> vector<8x32xf32>
    %282 = arith.addf %172, %281 : vector<8x32xf32>
    %cst_94 = arith.constant dense<0.000000e+00> : vector<8x96xf32>
    %283 = tpu.matmul %18, %280, %cst_94 {dimension_numbers = #tpu.dot_dimension_numbers<[1], [0], [0], [1], [0, 0, 1, 1], [], []>} : vector<8x16xf32>, vector<16x96xf32>, vector<8x96xf32> -> vector<8x96xf32>
    %284 = arith.addf %173, %283 : vector<8x96xf32>
    %c1 = arith.constant 1 : index
    %c0_95 = arith.constant 0 : index
    %c0_96 = arith.constant 0 : index
    %285 = vector.load %arg14[%c1, %c0_95, %c0_96] : memref<4x96x192xf32, #tpu.memory_space<vmem>>, vector<1x96x192xf32>
    %286 = vector.shape_cast %285 : vector<1x96x192xf32> to vector<96x192xf32>
    %cst_97 = arith.constant dense<0.000000e+00> : vector<8x192xf32>
    %287 = tpu.matmul %284, %286, %cst_97 {dimension_numbers = #tpu.dot_dimension_numbers<[1], [0], [0], [1], [0, 0, 1, 1], [], []>} : vector<8x96xf32>, vector<96x192xf32>, vector<8x192xf32> -> vector<8x192xf32>
    %288 = vector.extract_strided_slice %287 {offsets = [0, 0], sizes = [8, 96], strides = [1, 1]} : vector<8x192xf32> to vector<8x96xf32>
    %289 = vector.extract_strided_slice %287 {offsets = [0, 96], sizes = [8, 96], strides = [1, 1]} : vector<8x192xf32> to vector<8x96xf32>
    %290 = arith.mulf %288, %289 : vector<8x96xf32>
    %291 = vector.extract_strided_slice %290 {offsets = [0, 0], sizes = [8, 32], strides = [1, 1]} : vector<8x96xf32> to vector<8x32xf32>
    %292 = vector.extract_strided_slice %290 {offsets = [0, 32], sizes = [8, 32], strides = [1, 1]} : vector<8x96xf32> to vector<8x32xf32>
    %293 = arith.addf %291, %292 : vector<8x32xf32>
    %294 = vector.extract_strided_slice %290 {offsets = [0, 64], sizes = [8, 32], strides = [1, 1]} : vector<8x96xf32> to vector<8x32xf32>
    %295 = arith.addf %293, %294 : vector<8x32xf32>
    %296 = arith.mulf %289, %289 : vector<8x96xf32>
    %297 = vector.extract_strided_slice %296 {offsets = [0, 0], sizes = [8, 32], strides = [1, 1]} : vector<8x96xf32> to vector<8x32xf32>
    %298 = vector.extract_strided_slice %296 {offsets = [0, 32], sizes = [8, 32], strides = [1, 1]} : vector<8x96xf32> to vector<8x32xf32>
    %299 = arith.addf %297, %298 : vector<8x32xf32>
    %300 = vector.extract_strided_slice %296 {offsets = [0, 64], sizes = [8, 32], strides = [1, 1]} : vector<8x96xf32> to vector<8x32xf32>
    %301 = arith.addf %299, %300 : vector<8x32xf32>
    %cst_98 = arith.constant 9.99999993E-9 : f32
    %302 = vector.broadcast %cst_98 : f32 to vector<8x32xf32>
    %303 = arith.addf %301, %302 : vector<8x32xf32>
    %304 = math.sqrt %303 : vector<8x32xf32>
    %c1_99 = arith.constant 1 : index
    %c0_100 = arith.constant 0 : index
    %c0_101 = arith.constant 0 : index
    %305 = vector.load %arg15[%c1_99, %c0_100, %c0_101] : memref<4x32x32xf32, #tpu.memory_space<vmem>>, vector<1x32x32xf32>
    %306 = vector.shape_cast %305 : vector<1x32x32xf32> to vector<32x32xf32>
    %cst_102 = arith.constant dense<0.000000e+00> : vector<8x32xf32>
    %307 = tpu.matmul %282, %306, %cst_102 {dimension_numbers = #tpu.dot_dimension_numbers<[1], [0], [0], [1], [0, 0, 1, 1], [], []>} : vector<8x32xf32>, vector<32x32xf32>, vector<8x32xf32> -> vector<8x32xf32>
    %c1_103 = arith.constant 1 : index
    %c0_104 = arith.constant 0 : index
    %c0_105 = arith.constant 0 : index
    %308 = vector.load %arg16[%c1_103, %c0_104, %c0_105] : memref<4x32x32xf32, #tpu.memory_space<vmem>>, vector<1x32x32xf32>
    %309 = vector.shape_cast %308 : vector<1x32x32xf32> to vector<32x32xf32>
    %cst_106 = arith.constant dense<0.000000e+00> : vector<8x32xf32>
    %310 = tpu.matmul %304, %309, %cst_106 {dimension_numbers = #tpu.dot_dimension_numbers<[1], [0], [0], [1], [0, 0, 1, 1], [], []>} : vector<8x32xf32>, vector<32x32xf32>, vector<8x32xf32> -> vector<8x32xf32>
    %311 = arith.addf %307, %310 : vector<8x32xf32>
    %c1_107 = arith.constant 1 : index
    %c0_108 = arith.constant 0 : index
    %c0_109 = arith.constant 0 : index
    %312 = vector.load %arg17[%c1_107, %c0_108, %c0_109] : memref<4x1x32xf32, #tpu.memory_space<vmem>>, vector<1x1x32xf32>
    %313 = vector.shape_cast %312 : vector<1x1x32xf32> to vector<1x32xf32>
    %314 = vector.broadcast %313 : vector<1x32xf32> to vector<8x32xf32>
    %315 = arith.addf %311, %314 : vector<8x32xf32>
    %316 = arith.negf %315 : vector<8x32xf32>
    %317 = math.exp %316 : vector<8x32xf32>
    %cst_110 = arith.constant 1.000000e+00 : f32
    %318 = vector.broadcast %cst_110 : f32 to vector<8x32xf32>
    %319 = arith.addf %318, %317 : vector<8x32xf32>
    %320 = arith.divf %318, %319 : vector<8x32xf32>
    %321 = arith.mulf %315, %320 : vector<8x32xf32>
    %c1_111 = arith.constant 1 : index
    %c0_112 = arith.constant 0 : index
    %c0_113 = arith.constant 0 : index
    %322 = vector.load %arg18[%c1_111, %c0_112, %c0_113] : memref<4x32x160xf32, #tpu.memory_space<vmem>>, vector<1x32x160xf32>
    %323 = vector.shape_cast %322 : vector<1x32x160xf32> to vector<32x160xf32>
    %cst_114 = arith.constant dense<0.000000e+00> : vector<8x160xf32>
    %324 = tpu.matmul %321, %323, %cst_114 {dimension_numbers = #tpu.dot_dimension_numbers<[1], [0], [0], [1], [0, 0, 1, 1], [], []>} : vector<8x32xf32>, vector<32x160xf32>, vector<8x160xf32> -> vector<8x160xf32>
    %c1_115 = arith.constant 1 : index
    %c0_116 = arith.constant 0 : index
    %c0_117 = arith.constant 0 : index
    %325 = vector.load %arg19[%c1_115, %c0_116, %c0_117] : memref<4x1x160xf32, #tpu.memory_space<vmem>>, vector<1x1x160xf32>
    %326 = vector.shape_cast %325 : vector<1x1x160xf32> to vector<1x160xf32>
    %327 = vector.broadcast %326 : vector<1x160xf32> to vector<8x160xf32>
    %328 = arith.addf %324, %327 : vector<8x160xf32>
    %329 = vector.extract_strided_slice %328 {offsets = [0, 0], sizes = [8, 96], strides = [1, 1]} : vector<8x160xf32> to vector<8x96xf32>
    %330 = vector.extract_strided_slice %328 {offsets = [0, 96], sizes = [8, 32], strides = [1, 1]} : vector<8x160xf32> to vector<8x32xf32>
    %331 = vector.extract_strided_slice %328 {offsets = [0, 128], sizes = [8, 32], strides = [1, 1]} : vector<8x160xf32> to vector<8x32xf32>
    %332 = arith.mulf %330, %295 : vector<8x32xf32>
    %333 = arith.addf %282, %332 : vector<8x32xf32>
    %334 = arith.addf %333, %331 : vector<8x32xf32>
    %335 = vector.broadcast %170 : vector<8x1xf32> to vector<8x32xf32>
    %336 = arith.mulf %334, %335 : vector<8x32xf32>
    %337 = arith.addf %269, %336 : vector<8x32xf32>
    %338 = arith.mulf %329, %288 : vector<8x96xf32>
    %339 = arith.addf %284, %338 : vector<8x96xf32>
    %340 = vector.broadcast %170 : vector<8x1xf32> to vector<8x96xf32>
    %341 = arith.mulf %339, %340 : vector<8x96xf32>
    %342 = arith.addf %274, %341 : vector<8x96xf32>
    %cst_118 = arith.constant dense<0.000000e+00> : vector<16x96xf32>
    %343 = tpu.matmul %9, %342, %cst_118 {dimension_numbers = #tpu.dot_dimension_numbers<[1], [0], [0], [1], [0, 0, 1, 1], [], []>} : vector<16x8xf32>, vector<8x96xf32>, vector<16x96xf32> -> vector<16x96xf32>
    %c1_119 = arith.constant 1 : index
    %c0_120 = arith.constant 0 : index
    %c0_121 = arith.constant 0 : index
    %344 = vector.load %arg8[%c1_119, %c0_120, %c0_121] : memref<2x32x64xf32, #tpu.memory_space<vmem>>, vector<1x32x64xf32>
    %345 = vector.shape_cast %344 : vector<1x32x64xf32> to vector<32x64xf32>
    %cst_122 = arith.constant dense<0.000000e+00> : vector<8x64xf32>
    %346 = tpu.matmul %337, %345, %cst_122 {dimension_numbers = #tpu.dot_dimension_numbers<[1], [0], [0], [1], [0, 0, 1, 1], [], []>} : vector<8x32xf32>, vector<32x64xf32>, vector<8x64xf32> -> vector<8x64xf32>
    %c1_123 = arith.constant 1 : index
    %c0_124 = arith.constant 0 : index
    %c0_125 = arith.constant 0 : index
    %347 = vector.load %arg9[%c1_123, %c0_124, %c0_125] : memref<2x1x64xf32, #tpu.memory_space<vmem>>, vector<1x1x64xf32>
    %348 = vector.shape_cast %347 : vector<1x1x64xf32> to vector<1x64xf32>
    %349 = vector.broadcast %348 : vector<1x64xf32> to vector<8x64xf32>
    %350 = arith.addf %346, %349 : vector<8x64xf32>
    %351 = arith.negf %350 : vector<8x64xf32>
    %352 = math.exp %351 : vector<8x64xf32>
    %cst_126 = arith.constant 1.000000e+00 : f32
    %353 = vector.broadcast %cst_126 : f32 to vector<8x64xf32>
    %354 = arith.addf %353, %352 : vector<8x64xf32>
    %355 = arith.divf %353, %354 : vector<8x64xf32>
    %356 = arith.mulf %350, %355 : vector<8x64xf32>
    %c1_127 = arith.constant 1 : index
    %c0_128 = arith.constant 0 : index
    %c0_129 = arith.constant 0 : index
    %357 = vector.load %arg10[%c1_127, %c0_128, %c0_129] : memref<2x64x448xf32, #tpu.memory_space<vmem>>, vector<1x64x448xf32>
    %358 = vector.shape_cast %357 : vector<1x64x448xf32> to vector<64x448xf32>
    %cst_130 = arith.constant dense<0.000000e+00> : vector<8x448xf32>
    %359 = tpu.matmul %356, %358, %cst_130 {dimension_numbers = #tpu.dot_dimension_numbers<[1], [0], [0], [1], [0, 0, 1, 1], [], []>} : vector<8x64xf32>, vector<64x448xf32>, vector<8x448xf32> -> vector<8x448xf32>
    %c1_131 = arith.constant 1 : index
    %c0_132 = arith.constant 0 : index
    %c0_133 = arith.constant 0 : index
    %360 = vector.load %arg11[%c1_131, %c0_132, %c0_133] : memref<2x1x448xf32, #tpu.memory_space<vmem>>, vector<1x1x448xf32>
    %361 = vector.shape_cast %360 : vector<1x1x448xf32> to vector<1x448xf32>
    %362 = vector.broadcast %361 : vector<1x448xf32> to vector<8x448xf32>
    %363 = arith.addf %359, %362 : vector<8x448xf32>
    %c1_134 = arith.constant 1 : index
    %c0_135 = arith.constant 0 : index
    %c0_136 = arith.constant 0 : index
    %364 = vector.load %arg12[%c1_134, %c0_135, %c0_136] : memref<2x16x448xf32, #tpu.memory_space<vmem>>, vector<1x16x448xf32>
    %365 = vector.shape_cast %364 : vector<1x16x448xf32> to vector<16x448xf32>
    %cst_137 = arith.constant dense<0.000000e+00> : vector<16x448xf32>
    %366 = tpu.matmul %115, %365, %cst_137 {dimension_numbers = #tpu.dot_dimension_numbers<[1], [0], [0], [1], [0, 0, 1, 1], [], []>} : vector<16x16xf32>, vector<16x448xf32>, vector<16x448xf32> -> vector<16x448xf32>
    %c1_138 = arith.constant 1 : index
    %c0_139 = arith.constant 0 : index
    %c0_140 = arith.constant 0 : index
    %367 = vector.load %arg13[%c1_138, %c0_139, %c0_140] : memref<2x1x448xf32, #tpu.memory_space<vmem>>, vector<1x1x448xf32>
    %368 = vector.shape_cast %367 : vector<1x1x448xf32> to vector<1x448xf32>
    %369 = vector.broadcast %368 : vector<1x448xf32> to vector<16x448xf32>
    %370 = arith.addf %366, %369 : vector<16x448xf32>
    %371 = arith.mulf %370, %157 : vector<16x448xf32>
    %cst_141 = arith.constant dense<0.000000e+00> : vector<16x448xf32>
    %372 = tpu.matmul %9, %363, %cst_141 {dimension_numbers = #tpu.dot_dimension_numbers<[1], [0], [0], [1], [0, 0, 1, 1], [], []>} : vector<16x8xf32>, vector<8x448xf32>, vector<16x448xf32> -> vector<16x448xf32>
    %373 = arith.mulf %372, %371 : vector<16x448xf32>
    %cst_142 = arith.constant 0.000000e+00 : f32
    %374 = vector.broadcast %cst_142 : f32 to vector<8x32xf32>
    %375 = vector.extract_strided_slice %373 {offsets = [0, 0], sizes = [16, 32], strides = [1, 1]} : vector<16x448xf32> to vector<16x32xf32>
    %376 = vector.extract_strided_slice %373 {offsets = [0, 128], sizes = [16, 96], strides = [1, 1]} : vector<16x448xf32> to vector<16x96xf32>
    %377 = arith.mulf %343, %376 : vector<16x96xf32>
    %378 = vector.extract_strided_slice %373 {offsets = [0, 32], sizes = [16, 96], strides = [1, 1]} : vector<16x448xf32> to vector<16x96xf32>
    %379 = arith.mulf %86, %378 : vector<16x96xf32>
    %380 = arith.addf %377, %379 : vector<16x96xf32>
    %cst_143 = arith.constant dense<0.000000e+00> : vector<8x32xf32>
    %381 = tpu.matmul %18, %375, %cst_143 {dimension_numbers = #tpu.dot_dimension_numbers<[1], [0], [0], [1], [0, 0, 1, 1], [], []>} : vector<8x16xf32>, vector<16x32xf32>, vector<8x32xf32> -> vector<8x32xf32>
    %382 = arith.addf %337, %381 : vector<8x32xf32>
    %cst_144 = arith.constant dense<0.000000e+00> : vector<8x96xf32>
    %383 = tpu.matmul %18, %380, %cst_144 {dimension_numbers = #tpu.dot_dimension_numbers<[1], [0], [0], [1], [0, 0, 1, 1], [], []>} : vector<8x16xf32>, vector<16x96xf32>, vector<8x96xf32> -> vector<8x96xf32>
    %384 = arith.addf %342, %383 : vector<8x96xf32>
    %c2 = arith.constant 2 : index
    %c0_145 = arith.constant 0 : index
    %c0_146 = arith.constant 0 : index
    %385 = vector.load %arg14[%c2, %c0_145, %c0_146] : memref<4x96x192xf32, #tpu.memory_space<vmem>>, vector<1x96x192xf32>
    %386 = vector.shape_cast %385 : vector<1x96x192xf32> to vector<96x192xf32>
    %cst_147 = arith.constant dense<0.000000e+00> : vector<8x192xf32>
    %387 = tpu.matmul %384, %386, %cst_147 {dimension_numbers = #tpu.dot_dimension_numbers<[1], [0], [0], [1], [0, 0, 1, 1], [], []>} : vector<8x96xf32>, vector<96x192xf32>, vector<8x192xf32> -> vector<8x192xf32>
    %388 = vector.extract_strided_slice %387 {offsets = [0, 0], sizes = [8, 96], strides = [1, 1]} : vector<8x192xf32> to vector<8x96xf32>
    %389 = vector.extract_strided_slice %387 {offsets = [0, 96], sizes = [8, 96], strides = [1, 1]} : vector<8x192xf32> to vector<8x96xf32>
    %390 = arith.mulf %388, %389 : vector<8x96xf32>
    %391 = vector.extract_strided_slice %390 {offsets = [0, 0], sizes = [8, 32], strides = [1, 1]} : vector<8x96xf32> to vector<8x32xf32>
    %392 = vector.extract_strided_slice %390 {offsets = [0, 32], sizes = [8, 32], strides = [1, 1]} : vector<8x96xf32> to vector<8x32xf32>
    %393 = arith.addf %391, %392 : vector<8x32xf32>
    %394 = vector.extract_strided_slice %390 {offsets = [0, 64], sizes = [8, 32], strides = [1, 1]} : vector<8x96xf32> to vector<8x32xf32>
    %395 = arith.addf %393, %394 : vector<8x32xf32>
    %396 = arith.mulf %389, %389 : vector<8x96xf32>
    %397 = vector.extract_strided_slice %396 {offsets = [0, 0], sizes = [8, 32], strides = [1, 1]} : vector<8x96xf32> to vector<8x32xf32>
    %398 = vector.extract_strided_slice %396 {offsets = [0, 32], sizes = [8, 32], strides = [1, 1]} : vector<8x96xf32> to vector<8x32xf32>
    %399 = arith.addf %397, %398 : vector<8x32xf32>
    %400 = vector.extract_strided_slice %396 {offsets = [0, 64], sizes = [8, 32], strides = [1, 1]} : vector<8x96xf32> to vector<8x32xf32>
    %401 = arith.addf %399, %400 : vector<8x32xf32>
    %cst_148 = arith.constant 9.99999993E-9 : f32
    %402 = vector.broadcast %cst_148 : f32 to vector<8x32xf32>
    %403 = arith.addf %401, %402 : vector<8x32xf32>
    %404 = math.sqrt %403 : vector<8x32xf32>
    %c2_149 = arith.constant 2 : index
    %c0_150 = arith.constant 0 : index
    %c0_151 = arith.constant 0 : index
    %405 = vector.load %arg15[%c2_149, %c0_150, %c0_151] : memref<4x32x32xf32, #tpu.memory_space<vmem>>, vector<1x32x32xf32>
    %406 = vector.shape_cast %405 : vector<1x32x32xf32> to vector<32x32xf32>
    %cst_152 = arith.constant dense<0.000000e+00> : vector<8x32xf32>
    %407 = tpu.matmul %382, %406, %cst_152 {dimension_numbers = #tpu.dot_dimension_numbers<[1], [0], [0], [1], [0, 0, 1, 1], [], []>} : vector<8x32xf32>, vector<32x32xf32>, vector<8x32xf32> -> vector<8x32xf32>
    %c2_153 = arith.constant 2 : index
    %c0_154 = arith.constant 0 : index
    %c0_155 = arith.constant 0 : index
    %408 = vector.load %arg16[%c2_153, %c0_154, %c0_155] : memref<4x32x32xf32, #tpu.memory_space<vmem>>, vector<1x32x32xf32>
    %409 = vector.shape_cast %408 : vector<1x32x32xf32> to vector<32x32xf32>
    %cst_156 = arith.constant dense<0.000000e+00> : vector<8x32xf32>
    %410 = tpu.matmul %404, %409, %cst_156 {dimension_numbers = #tpu.dot_dimension_numbers<[1], [0], [0], [1], [0, 0, 1, 1], [], []>} : vector<8x32xf32>, vector<32x32xf32>, vector<8x32xf32> -> vector<8x32xf32>
    %411 = arith.addf %407, %410 : vector<8x32xf32>
    %c2_157 = arith.constant 2 : index
    %c0_158 = arith.constant 0 : index
    %c0_159 = arith.constant 0 : index
    %412 = vector.load %arg17[%c2_157, %c0_158, %c0_159] : memref<4x1x32xf32, #tpu.memory_space<vmem>>, vector<1x1x32xf32>
    %413 = vector.shape_cast %412 : vector<1x1x32xf32> to vector<1x32xf32>
    %414 = vector.broadcast %413 : vector<1x32xf32> to vector<8x32xf32>
    %415 = arith.addf %411, %414 : vector<8x32xf32>
    %416 = arith.negf %415 : vector<8x32xf32>
    %417 = math.exp %416 : vector<8x32xf32>
    %cst_160 = arith.constant 1.000000e+00 : f32
    %418 = vector.broadcast %cst_160 : f32 to vector<8x32xf32>
    %419 = arith.addf %418, %417 : vector<8x32xf32>
    %420 = arith.divf %418, %419 : vector<8x32xf32>
    %421 = arith.mulf %415, %420 : vector<8x32xf32>
    %c2_161 = arith.constant 2 : index
    %c0_162 = arith.constant 0 : index
    %c0_163 = arith.constant 0 : index
    %422 = vector.load %arg18[%c2_161, %c0_162, %c0_163] : memref<4x32x160xf32, #tpu.memory_space<vmem>>, vector<1x32x160xf32>
    %423 = vector.shape_cast %422 : vector<1x32x160xf32> to vector<32x160xf32>
    %cst_164 = arith.constant dense<0.000000e+00> : vector<8x160xf32>
    %424 = tpu.matmul %421, %423, %cst_164 {dimension_numbers = #tpu.dot_dimension_numbers<[1], [0], [0], [1], [0, 0, 1, 1], [], []>} : vector<8x32xf32>, vector<32x160xf32>, vector<8x160xf32> -> vector<8x160xf32>
    %c2_165 = arith.constant 2 : index
    %c0_166 = arith.constant 0 : index
    %c0_167 = arith.constant 0 : index
    %425 = vector.load %arg19[%c2_165, %c0_166, %c0_167] : memref<4x1x160xf32, #tpu.memory_space<vmem>>, vector<1x1x160xf32>
    %426 = vector.shape_cast %425 : vector<1x1x160xf32> to vector<1x160xf32>
    %427 = vector.broadcast %426 : vector<1x160xf32> to vector<8x160xf32>
    %428 = arith.addf %424, %427 : vector<8x160xf32>
    %429 = vector.extract_strided_slice %428 {offsets = [0, 96], sizes = [8, 32], strides = [1, 1]} : vector<8x160xf32> to vector<8x32xf32>
    %430 = vector.extract_strided_slice %428 {offsets = [0, 128], sizes = [8, 32], strides = [1, 1]} : vector<8x160xf32> to vector<8x32xf32>
    %431 = arith.mulf %429, %395 : vector<8x32xf32>
    %432 = arith.addf %382, %431 : vector<8x32xf32>
    %433 = arith.addf %432, %430 : vector<8x32xf32>
    %434 = vector.broadcast %144 : vector<8x1xf32> to vector<8x32xf32>
    %435 = arith.mulf %433, %434 : vector<8x32xf32>
    %436 = arith.addf %374, %435 : vector<8x32xf32>
    %437 = vector.extract_strided_slice %373 {offsets = [0, 224], sizes = [16, 32], strides = [1, 1]} : vector<16x448xf32> to vector<16x32xf32>
    %438 = vector.extract_strided_slice %373 {offsets = [0, 352], sizes = [16, 96], strides = [1, 1]} : vector<16x448xf32> to vector<16x96xf32>
    %439 = arith.mulf %343, %438 : vector<16x96xf32>
    %440 = vector.extract_strided_slice %373 {offsets = [0, 256], sizes = [16, 96], strides = [1, 1]} : vector<16x448xf32> to vector<16x96xf32>
    %441 = arith.mulf %86, %440 : vector<16x96xf32>
    %442 = arith.addf %439, %441 : vector<16x96xf32>
    %cst_168 = arith.constant dense<0.000000e+00> : vector<8x32xf32>
    %443 = tpu.matmul %18, %437, %cst_168 {dimension_numbers = #tpu.dot_dimension_numbers<[1], [0], [0], [1], [0, 0, 1, 1], [], []>} : vector<8x16xf32>, vector<16x32xf32>, vector<8x32xf32> -> vector<8x32xf32>
    %444 = arith.addf %337, %443 : vector<8x32xf32>
    %cst_169 = arith.constant dense<0.000000e+00> : vector<8x96xf32>
    %445 = tpu.matmul %18, %442, %cst_169 {dimension_numbers = #tpu.dot_dimension_numbers<[1], [0], [0], [1], [0, 0, 1, 1], [], []>} : vector<8x16xf32>, vector<16x96xf32>, vector<8x96xf32> -> vector<8x96xf32>
    %446 = arith.addf %342, %445 : vector<8x96xf32>
    %c3 = arith.constant 3 : index
    %c0_170 = arith.constant 0 : index
    %c0_171 = arith.constant 0 : index
    %447 = vector.load %arg14[%c3, %c0_170, %c0_171] : memref<4x96x192xf32, #tpu.memory_space<vmem>>, vector<1x96x192xf32>
    %448 = vector.shape_cast %447 : vector<1x96x192xf32> to vector<96x192xf32>
    %cst_172 = arith.constant dense<0.000000e+00> : vector<8x192xf32>
    %449 = tpu.matmul %446, %448, %cst_172 {dimension_numbers = #tpu.dot_dimension_numbers<[1], [0], [0], [1], [0, 0, 1, 1], [], []>} : vector<8x96xf32>, vector<96x192xf32>, vector<8x192xf32> -> vector<8x192xf32>
    %450 = vector.extract_strided_slice %449 {offsets = [0, 0], sizes = [8, 96], strides = [1, 1]} : vector<8x192xf32> to vector<8x96xf32>
    %451 = vector.extract_strided_slice %449 {offsets = [0, 96], sizes = [8, 96], strides = [1, 1]} : vector<8x192xf32> to vector<8x96xf32>
    %452 = arith.mulf %450, %451 : vector<8x96xf32>
    %453 = vector.extract_strided_slice %452 {offsets = [0, 0], sizes = [8, 32], strides = [1, 1]} : vector<8x96xf32> to vector<8x32xf32>
    %454 = vector.extract_strided_slice %452 {offsets = [0, 32], sizes = [8, 32], strides = [1, 1]} : vector<8x96xf32> to vector<8x32xf32>
    %455 = arith.addf %453, %454 : vector<8x32xf32>
    %456 = vector.extract_strided_slice %452 {offsets = [0, 64], sizes = [8, 32], strides = [1, 1]} : vector<8x96xf32> to vector<8x32xf32>
    %457 = arith.addf %455, %456 : vector<8x32xf32>
    %458 = arith.mulf %451, %451 : vector<8x96xf32>
    %459 = vector.extract_strided_slice %458 {offsets = [0, 0], sizes = [8, 32], strides = [1, 1]} : vector<8x96xf32> to vector<8x32xf32>
    %460 = vector.extract_strided_slice %458 {offsets = [0, 32], sizes = [8, 32], strides = [1, 1]} : vector<8x96xf32> to vector<8x32xf32>
    %461 = arith.addf %459, %460 : vector<8x32xf32>
    %462 = vector.extract_strided_slice %458 {offsets = [0, 64], sizes = [8, 32], strides = [1, 1]} : vector<8x96xf32> to vector<8x32xf32>
    %463 = arith.addf %461, %462 : vector<8x32xf32>
    %cst_173 = arith.constant 9.99999993E-9 : f32
    %464 = vector.broadcast %cst_173 : f32 to vector<8x32xf32>
    %465 = arith.addf %463, %464 : vector<8x32xf32>
    %466 = math.sqrt %465 : vector<8x32xf32>
    %c3_174 = arith.constant 3 : index
    %c0_175 = arith.constant 0 : index
    %c0_176 = arith.constant 0 : index
    %467 = vector.load %arg15[%c3_174, %c0_175, %c0_176] : memref<4x32x32xf32, #tpu.memory_space<vmem>>, vector<1x32x32xf32>
    %468 = vector.shape_cast %467 : vector<1x32x32xf32> to vector<32x32xf32>
    %cst_177 = arith.constant dense<0.000000e+00> : vector<8x32xf32>
    %469 = tpu.matmul %444, %468, %cst_177 {dimension_numbers = #tpu.dot_dimension_numbers<[1], [0], [0], [1], [0, 0, 1, 1], [], []>} : vector<8x32xf32>, vector<32x32xf32>, vector<8x32xf32> -> vector<8x32xf32>
    %c3_178 = arith.constant 3 : index
    %c0_179 = arith.constant 0 : index
    %c0_180 = arith.constant 0 : index
    %470 = vector.load %arg16[%c3_178, %c0_179, %c0_180] : memref<4x32x32xf32, #tpu.memory_space<vmem>>, vector<1x32x32xf32>
    %471 = vector.shape_cast %470 : vector<1x32x32xf32> to vector<32x32xf32>
    %cst_181 = arith.constant dense<0.000000e+00> : vector<8x32xf32>
    %472 = tpu.matmul %466, %471, %cst_181 {dimension_numbers = #tpu.dot_dimension_numbers<[1], [0], [0], [1], [0, 0, 1, 1], [], []>} : vector<8x32xf32>, vector<32x32xf32>, vector<8x32xf32> -> vector<8x32xf32>
    %473 = arith.addf %469, %472 : vector<8x32xf32>
    %c3_182 = arith.constant 3 : index
    %c0_183 = arith.constant 0 : index
    %c0_184 = arith.constant 0 : index
    %474 = vector.load %arg17[%c3_182, %c0_183, %c0_184] : memref<4x1x32xf32, #tpu.memory_space<vmem>>, vector<1x1x32xf32>
    %475 = vector.shape_cast %474 : vector<1x1x32xf32> to vector<1x32xf32>
    %476 = vector.broadcast %475 : vector<1x32xf32> to vector<8x32xf32>
    %477 = arith.addf %473, %476 : vector<8x32xf32>
    %478 = arith.negf %477 : vector<8x32xf32>
    %479 = math.exp %478 : vector<8x32xf32>
    %cst_185 = arith.constant 1.000000e+00 : f32
    %480 = vector.broadcast %cst_185 : f32 to vector<8x32xf32>
    %481 = arith.addf %480, %479 : vector<8x32xf32>
    %482 = arith.divf %480, %481 : vector<8x32xf32>
    %483 = arith.mulf %477, %482 : vector<8x32xf32>
    %c3_186 = arith.constant 3 : index
    %c0_187 = arith.constant 0 : index
    %c0_188 = arith.constant 0 : index
    %484 = vector.load %arg18[%c3_186, %c0_187, %c0_188] : memref<4x32x160xf32, #tpu.memory_space<vmem>>, vector<1x32x160xf32>
    %485 = vector.shape_cast %484 : vector<1x32x160xf32> to vector<32x160xf32>
    %cst_189 = arith.constant dense<0.000000e+00> : vector<8x160xf32>
    %486 = tpu.matmul %483, %485, %cst_189 {dimension_numbers = #tpu.dot_dimension_numbers<[1], [0], [0], [1], [0, 0, 1, 1], [], []>} : vector<8x32xf32>, vector<32x160xf32>, vector<8x160xf32> -> vector<8x160xf32>
    %c3_190 = arith.constant 3 : index
    %c0_191 = arith.constant 0 : index
    %c0_192 = arith.constant 0 : index
    %487 = vector.load %arg19[%c3_190, %c0_191, %c0_192] : memref<4x1x160xf32, #tpu.memory_space<vmem>>, vector<1x1x160xf32>
    %488 = vector.shape_cast %487 : vector<1x1x160xf32> to vector<1x160xf32>
    %489 = vector.broadcast %488 : vector<1x160xf32> to vector<8x160xf32>
    %490 = arith.addf %486, %489 : vector<8x160xf32>
    %491 = vector.extract_strided_slice %490 {offsets = [0, 96], sizes = [8, 32], strides = [1, 1]} : vector<8x160xf32> to vector<8x32xf32>
    %492 = vector.extract_strided_slice %490 {offsets = [0, 128], sizes = [8, 32], strides = [1, 1]} : vector<8x160xf32> to vector<8x32xf32>
    %493 = arith.mulf %491, %457 : vector<8x32xf32>
    %494 = arith.addf %444, %493 : vector<8x32xf32>
    %495 = arith.addf %494, %492 : vector<8x32xf32>
    %496 = vector.broadcast %170 : vector<8x1xf32> to vector<8x32xf32>
    %497 = arith.mulf %495, %496 : vector<8x32xf32>
    %498 = arith.addf %436, %497 : vector<8x32xf32>
    %c0_193 = arith.constant 0 : index
    %c0_194 = arith.constant 0 : index
    %499 = vector.load %arg20[%c0_193, %c0_194] : memref<32x16xf32, #tpu.memory_space<vmem>>, vector<32x16xf32>
    %cst_195 = arith.constant dense<0.000000e+00> : vector<8x16xf32>
    %500 = tpu.matmul %498, %499, %cst_195 {dimension_numbers = #tpu.dot_dimension_numbers<[1], [0], [0], [1], [0, 0, 1, 1], [], []>} : vector<8x32xf32>, vector<32x16xf32>, vector<8x16xf32> -> vector<8x16xf32>
    %c0_196 = arith.constant 0 : index
    %c0_197 = arith.constant 0 : index
    %501 = vector.load %arg21[%c0_196, %c0_197] : memref<1x16xf32, #tpu.memory_space<vmem>>, vector<1x16xf32>
    %502 = vector.broadcast %501 : vector<1x16xf32> to vector<8x16xf32>
    %503 = arith.addf %500, %502 : vector<8x16xf32>
    %504 = arith.negf %503 : vector<8x16xf32>
    %505 = math.exp %504 : vector<8x16xf32>
    %cst_198 = arith.constant 1.000000e+00 : f32
    %506 = vector.broadcast %cst_198 : f32 to vector<8x16xf32>
    %507 = arith.addf %506, %505 : vector<8x16xf32>
    %508 = arith.divf %506, %507 : vector<8x16xf32>
    %509 = arith.mulf %503, %508 : vector<8x16xf32>
    %cst_199 = arith.constant 1.66666663 : f32
    %510 = vector.broadcast %cst_199 : f32 to vector<8x16xf32>
    %511 = arith.mulf %509, %510 : vector<8x16xf32>
    %c0_200 = arith.constant 0 : index
    %c0_201 = arith.constant 0 : index
    %512 = vector.load %arg22[%c0_200, %c0_201] : memref<16x1xf32, #tpu.memory_space<vmem>>, vector<16x1xf32>
    %cst_202 = arith.constant dense<0.000000e+00> : vector<8x1xf32>
    %513 = tpu.matmul %511, %512, %cst_202 {dimension_numbers = #tpu.dot_dimension_numbers<[1], [0], [0], [1], [0, 0, 1, 1], [], []>} : vector<8x16xf32>, vector<16x1xf32>, vector<8x1xf32> -> vector<8x1xf32>
    %c0_203 = arith.constant 0 : index
    %c0_204 = arith.constant 0 : index
    %514 = vector.load %arg23[%c0_203, %c0_204] : memref<1x1xf32, #tpu.memory_space<vmem>>, vector<1x1xf32>
    %515 = vector.broadcast %514 : vector<1x1xf32> to vector<8x1xf32>
    %516 = arith.addf %513, %515 : vector<8x1xf32>
    %cst_205 = arith.constant dense<0.000000e+00> : vector<2x1xf32>
    %517 = tpu.matmul %28, %516, %cst_205 {dimension_numbers = #tpu.dot_dimension_numbers<[1], [0], [0], [1], [0, 0, 1, 1], [], []>} : vector<2x8xf32>, vector<8x1xf32>, vector<2x1xf32> -> vector<2x1xf32>
    %c0_206 = arith.constant 0 : index
    %c0_207 = arith.constant 0 : index
    %518 = vector.load %arg24[%c0_206, %c0_207] : memref<2x1xf32, #tpu.memory_space<vmem>>, vector<2x1xf32>
    tpu.vector_store %arg24[%c0_206, %c0_207], %517 {strides = array<i32>} : memref<2x1xf32, #tpu.memory_space<vmem>>, vector<2x1xf32>,
    return
  }
}

</mosaic_0001>

<bundles_post_ra>
// kernel: tpu_custom_call.1
= control target key start
LH: loop header
LB: loop body
LE: loop exit
PB: predicated region body
PF: predicated region fallthrough
CT: control target
= control target key end

     0   :  { %s7063_s0 = inlined_call_operand.vmem [shape: f32[8,3], index: 0, kind: input, shape index: {}]   ;;  %s7064_s1 = inlined_call_operand.vmem [shape: s32[16,1], index: 1, kind: input, shape index: {}]   ;;  %s7065_s2 = inlined_call_operand.vmem [shape: s32[16,1], index: 2, kind: input, shape index: {}]   ;;  %s7066_s3 = inlined_call_operand.vmem [shape: s32[1,16], index: 3, kind: input, shape index: {}]   ;;  %s7067_s4 = inlined_call_operand.vmem [shape: s32[8,1], index: 4, kind: input, shape index: {}]   ;;  %s7068_s5 = inlined_call_operand.hbm [shape: s32[1,8], index: 5, kind: input, shape index: {}]   ;;  %s7069_s6 = inlined_call_operand.hbm [shape: f32[2,32], index: 6, kind: input, shape index: {}]   ;;  %s7070_s7 = inlined_call_operand.hbm [shape: f32[1,16], index: 7, kind: input, shape index: {}]   ;;  %s7071_s8 = inlined_call_operand.hbm [shape: f32[2,32,64], index: 8, kind: input, shape index: {}]   ;;  %s7072_s9 = inlined_call_operand.hbm [shape: f32[2,1,64], index: 9, kind: input, shape index: {}]   ;;  %s7073_s10 = inlined_call_operand.hbm [shape: f32[2,64,448], index: 10, kind: input, shape index: {}]   ;;  %s7074_s11 = inlined_call_operand.vmem [shape: f32[2,1,448], index: 11, kind: input, shape index: {}]   ;;  %s7075_s12 = inlined_call_operand.vmem [shape: f32[2,16,448], index: 12, kind: input, shape index: {}]   ;;  %s7076_s13 = inlined_call_operand.vmem [shape: f32[2,1,448], index: 13, kind: input, shape index: {}]   ;;  %s7077_s14 = inlined_call_operand.hbm [shape: f32[4,96,192], index: 14, kind: input, shape index: {}]   ;;  %s7078_s15 = inlined_call_operand.hbm [shape: f32[4,32,32], index: 15, kind: input, shape index: {}]   ;;  %s7079_s16 = inlined_call_operand.hbm [shape: f32[4,32,32], index: 16, kind: input, shape index: {}]   ;;  %s7080_s17 = inlined_call_operand.vmem [shape: f32[4,1,32], index: 17, kind: input, shape index: {}]   ;;  %s7081_s18 = inlined_call_operand.hbm [shape: f32[4,32,160], index: 18, kind: input, shape index: {}]   ;;  %s7082_s19 = inlined_call_operand.vmem [shape: f32[4,1,160], index: 19, kind: input, shape index: {}]   ;;  %s7083_s20 = inlined_call_operand.vmem [shape: f32[32,16], index: 20, kind: input, shape index: {}]   ;;  %s7084_s21 = inlined_call_operand.vmem [shape: f32[1,16], index: 21, kind: input, shape index: {}]   ;;  %s7085_s22 = inlined_call_operand.vmem [shape: f32[16,1], index: 22, kind: input, shape index: {}]   ;;  %s7086_s23 = inlined_call_operand.<no memory space> [shape: f32[1,1], index: 23, kind: input, shape index: {}]   ;;  %s7087_s24 = inlined_call_operand.vmem [shape: f32[2,1], index: 24, kind: output, shape index: {}]  }
   0x1   :  { %7102 = sst [smem:[#allocation25_spill]] %s7063_s0  ;;  %v29_v0 = vstv %s7086_s23 }
   0x2   :  { %7103 = sst [smem:[#allocation26_spill]] %s7064_s1  ;;  %30 = vst [vmem:[#allocation2] sm:$0x1] %v29_v0 }
   0x3   :  { %7104 = sst [smem:[#allocation27_spill]] %s7065_s2 }
   0x4   :  { %7105 = sst [smem:[#allocation28_spill]] %s7066_s3 }
   0x5   :  { %7106 = sst [smem:[#allocation29_spill]] %s7067_s4 }
   0x6   :  { %7107 = sst [smem:[#allocation30_spill]] %s7068_s5 }
   0x7   :  { %7108 = sst [smem:[#allocation31_spill]] %s7069_s6 }
   0x8   :  { %7109 = sst [smem:[#allocation32_spill]] %s7070_s7 }
   0x9   :  { %7110 = sst [smem:[#allocation33_spill]] %s7071_s8 }
   0xa   :  { %31 = vsyncpa [#allocation4], 0 }
   0xb   :  { %32 = vsyncpa [#allocation6], 0 }
   0xc   :  { %33 = vsyncpa [#allocation9], 0 }
   0xd   :  { %34 = vsyncpa [#allocation12], 0 }
   0xe   :  { %35 = vsyncpa [#allocation15], 0 }
   0xf   :  { %36 = vsyncpa [#allocation18], 0  ;;  %s5991_s27 = smov [#allocation5]   ;;  %s5992_s6 = smov [#allocation8]  }
  0x10   :  { %s63_s28 = sshll.u32 %s5991_s27, 4  ;;  %s82_s2 = sshll.u32 %s5992_s6, 4  ;;  %s64_s28 = int_to_ptr.vmem [resolvable:$true] %s63_s28  ;;  %s6146_s2 = int_to_ptr.vmem [resolvable:$true] %s82_s2 }
  0x11   :  { %s7111_s7 = sld [smem:[#allocation31_spill]] }
  0x17   :  { %s5759_s30 = scalar_lea.hbm %s7111_s7, 32 }
  0x18   :  { %p5760_p0 = scmp.ne.s32.totalorder %s7111_s7, %s5759_s30  ;;  %p5763_p1 = scmp.lt.u32.totalorder %s5759_s30, %s7111_s7 }
  0x1a   :  { %p5765_p2 = pnand %p5763_p1, %p5760_p0 }
  0x1c   :  { %5768 = shalt.err (!%p5765_p2)
}
  0x1d   :  { %s5769_s4 = scalar_lea.vmem %s64_s28, 32  ;;  %p5774_p4 = scmp.lt.s32.totalorder %s64_s28, %s64_s28 }
  0x1e   :  { %p5770_p3 = scmp.ne.s32.totalorder %s64_s28, %s5769_s4  ;;  %p5775_p5 = scmp.lt.s32.totalorder %s5769_s4, %s5769_s4 }
  0x20   :  { %p5776_p6 = por %p5775_p5, %p5774_p4 }
  0x22   :  { %p5777_p7 = pnand %p5776_p6, %p5770_p3 }
  0x24   :  { %5780 = shalt.err (!%p5777_p7)
}
  0x25   :  { %66 = dma.hbm_to_vmem [thread:$0]  %s7111_s7, 32, %s64_s28, [#allocation6]  }
  0x26   :  { %s7112_s6 = sld [smem:[#allocation33_spill]] }
  0x2c   :  { %s5781_s29 = scalar_lea.hbm %s7112_s6, 1024 }
  0x2d   :  { %p5782_p8 = scmp.ne.s32.totalorder %s7112_s6, %s5781_s29  ;;  %p5785_p9 = scmp.lt.u32.totalorder %s5781_s29, %s7112_s6 }
  0x2f   :  { %p5787_p10 = pnand %p5785_p9, %p5782_p8 }
  0x31   :  { %5790 = shalt.err (!%p5787_p10)
}
  0x32   :  { %s5791_s25 = scalar_lea.vmem %s6146_s2, 1024  ;;  %p5796_p12 = scmp.lt.s32.totalorder %s6146_s2, %s6146_s2 }
  0x33   :  { %p5792_p11 = scmp.ne.s32.totalorder %s6146_s2, %s5791_s25  ;;  %p5797_p13 = scmp.lt.s32.totalorder %s5791_s25, %s5791_s25 }
  0x35   :  { %p5798_p0 = por %p5797_p13, %p5796_p12 }
  0x37   :  { %p5799_p1 = pnand %p5798_p0, %p5792_p11 }
  0x39   :  { %5802 = shalt.err (!%p5799_p1)
}
  0x3a   :  { %s7094_s28 = smov 128   ;;  %s7096_s7 = smov 8  }
  0x3b   :  { %88 = dma.hbm_to_vmem [thread:$0]  %s7112_s6, 1024, %s6146_s2, [#allocation9], %s7094_s28, %s7094_s28, %s7096_s7  }
  0x3c   :  { %s5995_s1 = smov [#allocation11]   ;;  %s5803_s29 = scalar_lea.hbm %s7073_s10, 8192 }
  0x3d   :  { %s106_s5 = sshll.u32 %s5995_s1, 4  ;;  %p5804_p2 = scmp.ne.s32.totalorder %s7073_s10, %s5803_s29  ;;  %s107_s5 = int_to_ptr.vmem [resolvable:$true] %s106_s5 }
  0x3e   :  { %p5807_p3 = scmp.lt.u32.totalorder %s5803_s29, %s7073_s10 }
  0x40   :  { %p5809_p4 = pnand %p5807_p3, %p5804_p2 }
  0x42   :  { %5812 = shalt.err (!%p5809_p4)
}
  0x43   :  { %s5813_s25 = scalar_lea.vmem %s107_s5, 8192  ;;  %p5818_p6 = scmp.lt.s32.totalorder %s107_s5, %s107_s5 }
  0x44   :  { %p5814_p5 = scmp.ne.s32.totalorder %s107_s5, %s5813_s25  ;;  %p5819_p7 = scmp.lt.s32.totalorder %s5813_s25, %s5813_s25 }
  0x46   :  { %p5820_p8 = por %p5819_p7, %p5818_p6 }
  0x48   :  { %p5821_p9 = pnand %p5820_p8, %p5814_p5 }
  0x4a   :  { %5824 = shalt.err (!%p5821_p9)
}
  0x4b   :  { %s5996_s2 = smov 512   ;;  %s7098_s6 = smov 32  }
  0x4c   :  { %112 = dma.hbm_to_vmem [thread:$0]  %s7073_s10, 8192, %s107_s5, [#allocation12], %s5996_s2, %s5996_s2, %s7098_s6  }
  0x4d   :  { %s5998_s1 = smov [#allocation14]   ;;  %s5999_s27 = smov [#allocation3]  }
  0x4e   :  { %s136_s26 = sshll.u32 %s5998_s1, 4  ;;  %s53_s29 = sshll.u32 %s5999_s27, 4  ;;  %s137_s26 = int_to_ptr.vmem [resolvable:$true] %s136_s26  ;;  %s54_s29 = int_to_ptr.vmem [resolvable:$true] %s53_s29 }
  0x4f   :  { %s5825_s30 = scalar_lea.hbm %s7078_s15, 2048 }
  0x50   :  { %p5826_p10 = scmp.ne.s32.totalorder %s7078_s15, %s5825_s30  ;;  %p5829_p11 = scmp.lt.u32.totalorder %s5825_s30, %s7078_s15 }
  0x52   :  { %p5831_p12 = pnand %p5829_p11, %p5826_p10 }
  0x54   :  { %5834 = shalt.err (!%p5831_p12)
}
  0x55   :  { %s5835_s10 = scalar_lea.vmem %s137_s26, 2048  ;;  %p5840_p0 = scmp.lt.s32.totalorder %s137_s26, %s137_s26 }
  0x56   :  { %p5836_p13 = scmp.ne.s32.totalorder %s137_s26, %s5835_s10  ;;  %p5841_p1 = scmp.lt.s32.totalorder %s5835_s10, %s5835_s10 }
  0x58   :  { %p5842_p2 = por %p5841_p1, %p5840_p0 }
  0x5a   :  { %p5843_p3 = pnand %p5842_p2, %p5836_p13 }
  0x5c   :  { %5846 = shalt.err (!%p5843_p3)
}
  0x5d   :  { %s7113_s5 = smov 8   ;;  %s7114_s2 = smov 128  }
  0x5e   :  { %142 = dma.hbm_to_vmem [thread:$0]  %s7078_s15, 2048, %s137_s26, [#allocation15], %s7114_s2, %s7114_s2, %s7113_s5  }
  0x5f   :  { %s7115_s7 = sld [smem:[#allocation30_spill]] }
  0x65   :  { %s5847_s27 = scalar_lea.hbm %s7115_s7, 16 }
  0x66   :  { %p5848_p4 = scmp.ne.s32.totalorder %s7115_s7, %s5847_s27  ;;  %p5851_p5 = scmp.lt.u32.totalorder %s5847_s27, %s7115_s7 }
  0x68   :  { %p5853_p6 = pnand %p5851_p5, %p5848_p4 }
  0x6a   :  { %5856 = shalt.err (!%p5853_p6)
}
  0x6b   :  { %s5857_s25 = scalar_lea.vmem %s54_s29, 16  ;;  %s5861_s10 = scalar_lea.vmem %s54_s29, 32 }
  0x6c   :  { %p5858_p7 = scmp.ne.s32.totalorder %s54_s29, %s5857_s25  ;;  %p5862_p8 = scmp.lt.s32.totalorder %s54_s29, %s54_s29 }
  0x6d   :  { %p5863_p9 = scmp.lt.s32.totalorder %s5861_s10, %s5857_s25 }
  0x6f   :  { %p5864_p10 = por %p5863_p9, %p5862_p8 }
  0x71   :  { %p5865_p11 = pnand %p5864_p10, %p5858_p7 }
  0x73   :  { %5868 = shalt.err (!%p5865_p11)
}
  0x74   :  { %56 = dma.hbm_to_vmem [thread:$0]  %s7115_s7, 16, %s54_s29, [#allocation4]  }
  0x75   :  { %s6000_s8 = smov [#allocation7]   ;;  %s6001_s1 = smov [#allocation10]  }
  0x76   :  { %s73_s4 = sshll.u32 %s6000_s8, 4  ;;  %s94_s28 = sshll.u32 %s6001_s1, 4  ;;  %s74_s4 = int_to_ptr.vmem [resolvable:$true] %s73_s4  ;;  %s95_s28 = int_to_ptr.vmem [resolvable:$true] %s94_s28 }
  0x77   :  { %s7116_s3 = sld [smem:[#allocation32_spill]] }
  0x7d   :  { %s5869_s30 = scalar_lea.hbm %s7116_s3, 16 }
  0x7e   :  { %p5870_p12 = scmp.ne.s32.totalorder %s7116_s3, %s5869_s30  ;;  %p5873_p13 = scmp.lt.u32.totalorder %s5869_s30, %s7116_s3 }
  0x80   :  { %p5875_p0 = pnand %p5873_p13, %p5870_p12 }
  0x82   :  { %5878 = shalt.err (!%p5875_p0)
}
  0x83   :  { %s5879_s29 = scalar_lea.vmem %s74_s4, 16  ;;  %s5883_s7 = scalar_lea.vmem %s74_s4, 32 }
  0x84   :  { %p5880_p1 = scmp.ne.s32.totalorder %s74_s4, %s5879_s29  ;;  %p5884_p2 = scmp.lt.s32.totalorder %s74_s4, %s74_s4 }
  0x85   :  { %p5885_p3 = scmp.lt.s32.totalorder %s5883_s7, %s5879_s29 }
  0x87   :  { %p5886_p4 = por %p5885_p3, %p5884_p2 }
  0x89   :  { %p5887_p5 = pnand %p5886_p4, %p5880_p1 }
  0x8b   :  { %5890 = shalt.err (!%p5887_p5)
}
  0x8c   :  { %76 = dma.hbm_to_vmem [thread:$0]  %s7116_s3, 16, %s74_s4, [#allocation6]  }
  0x8d   :  { %s5891_s1 = scalar_lea.hbm %s7072_s9, 32 }
  0x8e   :  { %p5892_p6 = scmp.ne.s32.totalorder %s7072_s9, %s5891_s1  ;;  %p5895_p7 = scmp.lt.u32.totalorder %s5891_s1, %s7072_s9 }
  0x90   :  { %p5897_p8 = pnand %p5895_p7, %p5892_p6 }
  0x92   :  { %5900 = shalt.err (!%p5897_p8)
}
  0x93   :  { %s5901_s25 = scalar_lea.vmem %s95_s28, 32  ;;  %p5906_p10 = scmp.lt.s32.totalorder %s95_s28, %s95_s28 }
  0x94   :  { %p5902_p9 = scmp.ne.s32.totalorder %s95_s28, %s5901_s25  ;;  %p5907_p11 = scmp.lt.s32.totalorder %s5901_s25, %s5901_s25 }
  0x96   :  { %p5908_p12 = por %p5907_p11, %p5906_p10 }
  0x98   :  { %p5909_p13 = pnand %p5908_p12, %p5902_p9 }
  0x9a   :  { %5912 = shalt.err (!%p5909_p13)
}
  0x9b   :  { %s6002_s4 = smov 16   ;;  %s6003_s3 = smov 1  }
  0x9c   :  { %100 = dma.hbm_to_vmem [thread:$0]  %s7072_s9, 32, %s95_s28, [#allocation9], %s6002_s4, %s6002_s4, %s6003_s3  }
  0x9d   :  { %s6004_s7 = smov [#allocation13]   ;;  %s5913_s8 = scalar_lea.hbm %s7077_s14, 12288 }
  0x9e   :  { %s124_s15 = sshll.u32 %s6004_s7, 4  ;;  %p5914_p0 = scmp.ne.s32.totalorder %s7077_s14, %s5913_s8  ;;  %s125_s15 = int_to_ptr.vmem [resolvable:$true] %s124_s15 }
  0x9f   :  { %p5917_p1 = scmp.lt.u32.totalorder %s5913_s8, %s7077_s14 }
  0xa1   :  { %p5919_p2 = pnand %p5917_p1, %p5914_p0 }
  0xa3   :  { %5922 = shalt.err (!%p5919_p2)
}
  0xa4   :  { %s5923_s23 = scalar_lea.vmem %s125_s15, 12288  ;;  %p5928_p4 = scmp.lt.s32.totalorder %s125_s15, %s125_s15 }
  0xa5   :  { %p5924_p3 = scmp.ne.s32.totalorder %s125_s15, %s5923_s23  ;;  %p5929_p5 = scmp.lt.s32.totalorder %s5923_s23, %s5923_s23 }
  0xa7   :  { %p5930_p6 = por %p5929_p5, %p5928_p4 }
  0xa9   :  { %p5931_p7 = pnand %p5930_p6, %p5924_p3 }
  0xab   :  { %5934 = shalt.err (!%p5931_p7)
}
  0xac   :  { %s6005_s9 = smov 256   ;;  %s6006_s3 = smov [#allocation16]  }
  0xad   :  { %130 = dma.hbm_to_vmem [thread:$0]  %s7077_s14, 12288, %s125_s15, [#allocation12], %s6005_s9, %s6005_s9, %s6002_s4  }
  0xae   :  { %s148_s10 = sshll.u32 %s6006_s3, 4  ;;  %s6007_s29 = smov [#allocation17]   ;;  %s149_s10 = int_to_ptr.vmem [resolvable:$true] %s148_s10 }
  0xaf   :  { %s162_s7 = sshll.u32 %s6007_s29, 4  ;;  %s5935_s8 = scalar_lea.hbm %s7079_s16, 2048  ;;  %s163_s7 = int_to_ptr.vmem [resolvable:$true] %s162_s7 }
  0xb0   :  { %p5936_p8 = scmp.ne.s32.totalorder %s7079_s16, %s5935_s8  ;;  %p5939_p9 = scmp.lt.u32.totalorder %s5935_s8, %s7079_s16 }
  0xb2   :  { %p5941_p10 = pnand %p5939_p9, %p5936_p8 }
  0xb4   :  { %5944 = shalt.err (!%p5941_p10)
}
  0xb5   :  { %s5945_s14 = scalar_lea.vmem %s149_s10, 2048  ;;  %p5950_p12 = scmp.lt.s32.totalorder %s149_s10, %s149_s10 }
  0xb6   :  { %p5946_p11 = scmp.ne.s32.totalorder %s149_s10, %s5945_s14  ;;  %p5951_p13 = scmp.lt.s32.totalorder %s5945_s14, %s5945_s14 }
  0xb8   :  { %p5952_p0 = por %p5951_p13, %p5950_p12 }
  0xba   :  { %p5953_p1 = pnand %p5952_p0, %p5946_p11 }
  0xbc   :  { %5956 = shalt.err (!%p5953_p1)
}
  0xbd   :  { %154 = dma.hbm_to_vmem [thread:$0]  %s7079_s16, 2048, %s149_s10, [#allocation15], %s7114_s2, %s7114_s2, %s7113_s5  }
  0xbe   :  { %s5957_s3 = scalar_lea.hbm %s7081_s18, 4096 }
  0xbf   :  { %p5958_p2 = scmp.ne.s32.totalorder %s7081_s18, %s5957_s3  ;;  %p5961_p3 = scmp.lt.u32.totalorder %s5957_s3, %s7081_s18 }
  0xc1   :  { %p5963_p4 = pnand %p5961_p3, %p5958_p2 }
  0xc3   :  { %5966 = shalt.err (!%p5963_p4)
}
  0xc4   :  { %s5967_s1 = scalar_lea.vmem %s163_s7, 4096  ;;  %p5972_p6 = scmp.lt.s32.totalorder %s163_s7, %s163_s7 }
  0xc5   :  { %p5968_p5 = scmp.ne.s32.totalorder %s163_s7, %s5967_s1  ;;  %p5973_p7 = scmp.lt.s32.totalorder %s5967_s1, %s5967_s1 }
  0xc7   :  { %p5974_p8 = por %p5973_p7, %p5972_p6 }
  0xc9   :  { %p5975_p9 = pnand %p5974_p8, %p5968_p5 }
  0xcb   :  { %5978 = shalt.err (!%p5975_p9)
}
  0xcc   :  { %168 = dma.hbm_to_vmem [thread:$0]  %s7081_s18, 4096, %s163_s7, [#allocation18], %s6005_s9, %s6005_s9, %s6002_s4  }
  0xcd   :  { %5979 = dma.done.wait [#allocation4], 16  }
  0xce   :  { %5980 = vsyncadd [#allocation4], 4294967280 }
  0xcf   :  { %5981 = dma.done.wait [#allocation6], 48  }
  0xd0   :  { %5982 = vsyncadd [#allocation6], 4294967248 }
  0xd1   :  { %5983 = dma.done.wait [#allocation9], 1056  }
  0xd2   :  { %5984 = vsyncadd [#allocation9], 4294966240 }
  0xd3   :  { %5985 = dma.done.wait [#allocation12], 20480  }
  0xd4   :  { %5986 = vsyncadd [#allocation12], 4294946816 }
  0xd5   :  { %5987 = dma.done.wait [#allocation15], 4096  }
  0xd6   :  { %5988 = vsyncadd [#allocation15], 4294963200 }
  0xd7   :  { %5989 = dma.done.wait [#allocation18], 4096  }
  0xd8   :  { %5990 = vsyncadd [#allocation18], 4294963200  ;;  %v6008_v1 = vmov 0   ;;  %s7117_s18 = sld [smem:[#allocation27_spill]]  ;;  %s7118_s7 = sld [smem:[#allocation29_spill]]  ;;  %v7100_v8 = vmov 0.0   ;;  %v216_v9 = vlaneseq }
  0xd9   :  { %5689 = vset.pattern.permute.xlu0 %v6008_v1  ;;  %5690 = vset.pattern.permute.xlu1 %v6008_v1  ;;  %s7119_s15 = sld [smem:[#allocation26_spill]]  ;;  %s7120_s25 = sld [smem:[#allocation25_spill]]  ;;  %vm265_vm0 = vcmask 64512   ;;  %v6010_v14 = vmov 1.0   ;;  %v787_v17 = vld [vmem:[#allocation5] sm:$0x3] }
  0xda   :  { %v6313_v10 = vand.u32 127, %v216_v9  ;;  %vm792_vm5 = vcmask 1041408   ;;  %v941_v20 = vld [vmem:[#allocation8] sm:$0xff]  ;;  %v942_v21 = vld [vmem:[#allocation8 + $0x8] sm:$0xff]  ;;  %vm6011_vm6 = vmmov 0   ;;  %vm788_vm7 = vcmask 15360  }
  0xdb   :  { %v6012_v24 = vmov 0.0|0.0   ;;  %v5358_v25 = vpack.c.bf16 %v942_v21, %v941_v20  ;;  %v943_v27 = vld [vmem:[#allocation8 + $0x10] sm:$0xff]  ;;  %v944_v28 = vld [vmem:[#allocation8 + $0x18] sm:$0xff]  ;;  %v6013_v30 = vmov 1   ;;  %vm952_vm9 = vcmask 261120   ;;  %v1033_v56 = vld [vmem:[#allocation11] sm:$0xff] }
  0xdc   :  { %v5361_v29 = vpack.c.bf16 %v944_v28, %v943_v27  ;;  %vm432_vm10 = vcmask 23552   ;;  %vm694_vm11 = vcmask 7168   ;;  %v6014_v50 = vmov 2   ;;  %v1034_v51 = vld [vmem:[#allocation11 + $0x8] sm:$0xff]  ;;  %v1036_v53 = vld [vmem:[#allocation11 + $0x18] sm:$0xff]  ;;  %v1037_v57 = vld [vmem:[#allocation11 + $0x20] sm:$0xff] }
  0xdd   :  { %v1038_v52 = vld [vmem:[#allocation11 + $0x28] sm:$0xff]  ;;  %v1040_v55 = vld [vmem:[#allocation11 + $0x38] sm:$0xff]  ;;  %v5365_v59 = vpack.c.bf16 %v1037_v57, %v1033_v56  ;;  %v1035_v60 = vld [vmem:[#allocation11 + $0x10] sm:$0xff]  ;;  %s6015_s3 = smov 96   ;;  %s7121_s6 = sld [smem:[#allocation28_spill]] }
  0xde   :  { %v211_v2 = vld [vmem:[%s7117_s18] sm:$0xff]  ;;  %v212_v4 = vld [vmem:[%s7117_s18 + $0x8] sm:$0xff]  ;;  %v5363_v54 = vpack.c.bf16 %v1038_v52, %v1034_v51  ;;  %v5379_v58 = vpack.c.bf16 %v1040_v55, %v1036_v53  ;;  %v1042_v63 = vld [vmem:[#allocation11 + $0x48] sm:$0xff]  ;;  %s6016_s8 = smov 64   ;;  %s7123_s1 = smov 32  }
  0xdf   :  { %v214_v3 = vld [vmem:[%s7118_s7] sm:$0xff]  ;;  %231 = vperm.xlu0 %5689, %v211_v2   ;;  %v210_v7 = vld [vmem:[%s7119_s15 + $0x8] sm:$0xff]  ;;  %v1046_v0 = vld [vmem:[#allocation11 + $0x68] sm:$0xff]  ;;  %s6017_s18 = smov 127  }
  0xe0   :  { %252 = vperm.xlu1 %5690, %v214_v3   ;;  %v209_v5 = vld [vmem:[%s7119_s15] sm:$0xff]  ;;  %v5367_v3 = vpack.c.bf16 %v1046_v0, %v1042_v63  ;;  %v1049_v21 = vld [vmem:[#allocation11 + $0x80] sm:$0xff]  ;;  %v1236_v55 = vld [vmem:[%s7075_s12 + $0x18] sm:$0xff] }
  0xe1   :  { %v264_v6 = vld [vmem:[%s7120_s25] sm:$0xff]  ;;  %v1234_v53 = vld [vmem:[%s7075_s12 + $0x8] sm:$0xff]  ;;  %v1240_v57 = vld [vmem:[%s7075_s12 + $0x38] sm:$0xff] }
  0xe2   :  { %5143 = vmatprep.subr.mxu1 %v264_v6  ;;  %5138 = vmatprep.subr.mxu0 %v264_v6  ;;  %v1039_v61 = vld [vmem:[#allocation11 + $0x30] sm:$0xff]  ;;  %v1044_v2 = vld [vmem:[#allocation11 + $0x58] sm:$0xff] }
  0xe3   :  { %234 = vperm.xlu0 %5689, %v212_v4   ;;  %5144 = vmatpush3.msra.mxu1 %v264_v6  ;;  %v5381_v62 = vpack.c.bf16 %v1039_v61, %v1035_v60  ;;  %v1048_v4 = vld [vmem:[#allocation11 + $0x78] sm:$0xff]  ;;  %v1051_v28 = vld [vmem:[#allocation11 + $0x90] sm:$0xff]  ;;  %v642_v61 = vadd.s32 384, %v6313_v10 }
  0xe4   :  { %219 = vperm.xlu1 %5690, %v209_v5   ;;  %5139 = vmatpush3.msra.mxu0 %v264_v6  ;;  %v1041_v5 = vld [vmem:[#allocation11 + $0x40] sm:$0xff]  ;;  %v1056_v20 = vld [vmem:[#allocation11 + $0xb8] sm:$0xff]  ;;  %v1063_v51 = vld [vmem:[#allocation11 + $0xf0] sm:$0xff] }
  0xe5   :  { %5153 = vmatprep.subr.mxu1 %v7100_v8  ;;  %v1045_v6 = vld [vmem:[#allocation11 + $0x60] sm:$0xff]  ;;  %vm727_vm12 = vcmp.lt.s32.totalorder %v642_v61, 448 }
  0xe7   :  { %222 = vperm.xlu0 %5689, %v210_v7   ;;  %v5383_v7 = vpack.c.bf16 %v1048_v4, %v1044_v2  ;;  %v6412_v4 = vsel %vm727_vm12, 1.0, %v7100_v8 }
  0xe8   :  { %5692 = vset.pattern.permute.xlu1 %v6013_v30 }
  0xeb   :  { %5691 = vset.pattern.permute.xlu0 %v6013_v30 }
 0x15e   :  { %v232_v11 = vpop.permute.xlu0 %231 }
 0x15f   :  { %v253_v12 = vpop.permute.xlu1 %252  ;;  %vm236_vm1 = vcmp.eq.s32.totalorder %v6313_v10, %v232_v11  ;;  %v5369_v11 = vpack.c.bf16 %v1045_v6, %v1041_v5 }
 0x160   :  { %vm254_vm2 = vcmp.eq.s32.totalorder %v6313_v10, %v253_v12  ;;  %v4926_v13 = vsel %vm236_vm1, 1.0, %v7100_v8  ;;  %v1043_v12 = vld [vmem:[#allocation11 + $0x50] sm:$0xff] }
 0x161   :  { %5148 = vmatprep.subr.msk.mxu0 %vm254_vm2, %v6010_v14  ;;  %5145 = vmatprep.mubr.msk.f32.mxu1 %vm265_vm0, %v4926_v13  ;;  %v6333_v22 = vsel %vm254_vm2, 1.0, %v7100_v8 }
 0x162   :  { %v235_v15 = vpop.permute.xlu0 %234 }
 0x163   :  { %v220_v16 = vpop.permute.xlu1 %219  ;;  %vm237_vm3 = vcmp.eq.s32.totalorder %v6313_v10, %v235_v15  ;;  %v1050_v15 = vld [vmem:[#allocation11 + $0x88] sm:$0xff] }
 0x164   :  { %vm224_vm4 = vcmp.eq.s32.totalorder %v6313_v10, %v220_v16  ;;  %v4927_v18 = vsel %vm237_vm3, 1.0, %v7100_v8  ;;  %v1054_v16 = vld [vmem:[#allocation11 + $0xa8] sm:$0xff] }
 0x165   :  { %v6325_v19 = vsel %vm224_vm4, 1.0, %v7100_v8  ;;  %5146 = vmatmul.mubr.msk.f32.vlgmr.msra.gmra.mrb[0].mxu1 %vm265_vm0, %v4927_v18  ;;  %vm1087_vm4 = vcmask 523264  }
 0x166   :  { %5140 = vmatprep.mubr.msk.f32.mxu0 %vm265_vm0, %v6325_v19  ;;  %v223_v23 = vpop.permute.xlu0 %222  ;;  %5154 = vmatpush3.msk.msra.mxu1 %vm792_vm5, %v787_v17  ;;  %v1052_v17 = vld [vmem:[#allocation11 + $0x98] sm:$0xff] }
 0x167   :  { %5155 = vmatprep.mubr.msk.f32.mxu1 %vm6011_vm6, %v7100_v8  ;;  %vm225_vm8 = vcmp.eq.s32.totalorder %v6313_v10, %v223_v23  ;;  %5357 = vmatprep.subr.bf16.mxu1 %v6012_v24  ;;  %v1053_v23 = vld [vmem:[#allocation11 + $0xa0] sm:$0xff] }
 0x168   :  { %v6340_v26 = vsel %vm225_vm8, 1.0, %v7100_v8  ;;  %v5373_v27 = vpack.c.bf16 %v1053_v23, %v1049_v21 }
 0x169   :  { %5141 = vmatmul.mubr.msk.f32.vlgmr.msra.gmra.mrb[0].mxu0 %vm265_vm0, %v6340_v26  ;;  %5156 = vmatmul.mubr.msk.f32.vlgmr.msra.gmra.mrb[2].mxu1 %vm788_vm7, %v6333_v22  ;;  %vm1263_vm7 = vcmask 130048  }
 0x16a   :  { %5149 = vmatpush3.msk.msra.mxu0 %vm254_vm2, %v6010_v14  ;;  %5150 = vmatprep.mubr.msk.f32.mxu0 %vm265_vm0, %v4926_v13  ;;  %v1047_v13 = vld [vmem:[#allocation11 + $0x70] sm:$0xff] }
 0x16b   :  { %5158 = vmatprep.subr.mxu0 %v7100_v8  ;;  %5359 = vmatpush3.bf16.msra.mxu1 %v5358_v25  ;;  %v5385_v14 = vpack.c.bf16 %v1047_v13, %v1043_v12  ;;  %v5387_v25 = vpack.c.bf16 %v1056_v20, %v1052_v17 }
 0x16c   :  { %5360 = vmatprep.subr.bf16.mxu1 %v6012_v24  ;;  %5171 = vmatprep.mubr.msk.f32.mxu1 %vm6011_vm6, %v7100_v8 }
 0x16d   :  { %5151 = vmatmul.mubr.msk.f32.vlgmr.msra.gmra.mrb[2].mxu0 %vm265_vm0, %v4927_v18  ;;  %v5371_v18 = vpack.c.bf16 %v1054_v16, %v1050_v15 }
 0x16e   :  { %5160 = vmatprep.mubr.msk.f32.mxu0 %vm265_vm0, %v6325_v19  ;;  %5159 = vmatpush3.msra.mxu0 %v7100_v8 }
 0x16f   :  { %5362 = vmatpush3.bf16.msra.mxu1 %v5361_v29  ;;  %5364 = vmatprep.subr.bf16.mxu0 %v5363_v54  ;;  %v1055_v29 = vld [vmem:[#allocation11 + $0xb0] sm:$0xff]  ;;  %v1238_v54 = vld [vmem:[%s7075_s12 + $0x28] sm:$0xff] }
 0x170   :  { %5380 = vmatprep.subr.bf16.mxu1 %v5379_v58  ;;  %v5395_v56 = vpack.c.bf16 %v1238_v54, %v1234_v53  ;;  %v5399_v58 = vpack.c.bf16 %v1240_v57, %v1236_v55 }
 0x171   :  { %5161 = vmatmul.mubr.msk.f32.vlgmr.msra.gmra.mrb[4].mxu0 %vm265_vm0, %v6340_v26 }
 0x172   :  { %1155 = vmatprep.mubr.f32.mxu0 %v7100_v8  ;;  %5366 = vmatpush1.bf16.msra.mxu0 %v5365_v59 }
 0x173   :  { %5368 = vmatprep.subr.bf16.mxu0 %v5367_v3 }
 0x176   :  { %5370 = vmatpush1.bf16.msra.mxu0 %v5369_v11 }
 0x177   :  { %5372 = vmatprep.subr.bf16.mxu0 %v5371_v18 }
 0x17a   :  { %5374 = vmatpush1.bf16.msra.mxu0 %v5373_v27 }
 0x238   :  { %v5147_v31 = vpop.f32.mrb[0].mxu1 }
 0x239   :  { %v419_v32 = vpop.f32.mrb[1].mxu1 }
 0x23c   :  { %v5142_v33 = vpop.f32.mrb[0].mxu0  ;;  %v6361_v34 = vpop.f32.mrb[2].mxu1 }
 0x23d   :  { %v6363_v35 = vsub.f32 %v5142_v33, %v5147_v31  ;;  %v338_v36 = vpop.f32.mrb[1].mxu0  ;;  %v5157_v37 = vpop.f32.mrb[3].mxu1  ;;  %5172 = vmatmul.mubr.msk.f32.vlgmr.msra.gmra.mrb[4].mxu1 %vm952_vm9, %v6361_v34  ;;  %v5389_v31 = vpack.c.bf16 %v1055_v29, %v1051_v28  ;;  %v1062_v33 = vld [vmem:[#allocation11 + $0xe8] sm:$0xff] }
 0x23e   :  { %v6367_v38 = vsub.f32 %v338_v36, %v419_v32  ;;  %1226 = vmatprep.mubr.f32.mxu1 %v7100_v8  ;;  %5382 = vmatpush1.bf16.msra.mxu1 %v5381_v62  ;;  %v1058_v32 = vld [vmem:[#allocation11 + $0xc8] sm:$0xff]  ;;  %v1060_v36 = vld [vmem:[#allocation11 + $0xd8] sm:$0xff] }
 0x23f   :  { %v431_v39 = vmul.f32 %v6363_v35, %v6363_v35  ;;  %5384 = vmatprep.subr.bf16.mxu1 %v5383_v7  ;;  %v5375_v37 = vpack.c.bf16 %v1062_v33, %v1058_v32 }
 0x240   :  { %v6372_v40 = vpop.f32.mrb[2].mxu0  ;;  %v430_v41 = vmul.f32 %v6367_v38, %v6367_v38 }
 0x241   :  { %v6376_v42 = vpop.f32.mrb[3].mxu0  ;;  %v436_v43 = vsel %vm432_vm10, %v431_v39, 0.0  ;;  %v696_v44 = vsel %vm694_vm11, %v6372_v40, 0.0  ;;  %v1064_v39 = vld [vmem:[#allocation11 + $0xf8] sm:$0xff]  ;;  %5376 = vmatprep.subr.bf16.mxu0 %v5375_v37 }
 0x242   :  { %437 = vadd.xlane.f32.xlu0 %v436_v43  ;;  %v433_v45 = vsel %vm432_vm10, %v430_v41, 0.0  ;;  %v695_v46 = vsel %vm694_vm11, %v6376_v42, 0.0  ;;  %5386 = vmatpush1.bf16.msra.mxu1 %v5385_v14  ;;  %v1057_v41 = vld [vmem:[#allocation11 + $0xc0] sm:$0xff] }
 0x243   :  { %434 = vadd.xlane.f32.xlu1 %v433_v45  ;;  %v6382_v47 = vadd.f32 %v696_v44, %v695_v46  ;;  %5388 = vmatprep.subr.bf16.mxu1 %v5387_v25  ;;  %v1061_v43 = vld [vmem:[#allocation11 + $0xe0] sm:$0xff]  ;;  %v5391_v44 = vpack.c.bf16 %v1064_v39, %v1060_v36  ;;  %v1059_v46 = vld [vmem:[#allocation11 + $0xd0] sm:$0xff]  ;;  %v4942_v36 = vld [vmem:[#allocation7] ss:$0 sm:$0xff] }
 0x244   :  { %v6384_v48 = vpop.f32.mrb[4].mxu0  ;;  %v5377_v45 = vpack.c.bf16 %v1061_v43, %v1057_v41  ;;  %v5393_v52 = vpack.c.bf16 %v1063_v51, %v1059_v46 }
 0x245   :  { %v6386_v49 = vpop.f32.mrb[5].mxu0 }
 0x246   :  { %5390 = vmatpush1.bf16.msra.mxu1 %v5389_v31  ;;  %5378 = vmatpush1.bf16.msra.mxu0 %v5377_v45 }
 0x247   :  { %5392 = vmatprep.subr.bf16.mxu1 %v5391_v44  ;;  %5396 = vmatprep.subr.bf16.mxu0 %v5395_v56 }
 0x24a   :  { %5394 = vmatpush1.bf16.msra.mxu1 %v5393_v52 }
 0x24b   :  { %5400 = vmatprep.subr.bf16.mxu1 %v5399_v58 }
 0x254   :  { %745 = vperm.xlu1 %5692, %v6372_v40  }
 0x258   :  { %741 = vperm.xlu0 %5691, %v6376_v42   ;;  %5693 = vset.pattern.permute.xlu1 %v6008_v1 }
 0x259   :  { %670 = vperm.xlu1 %5693, %v6376_v42  }
 0x25c   :  { %5698 = vset.pattern.permute.xlu0 %v6014_v50 }
 0x25d   :  { %675 = vperm.xlu1 %5693, %v6372_v40  }
 0x2cf   :  { %v438_v59 = vpop.xlane.xlu0 %437 }
 0x2d0   :  { %5711 = vrsqrt.f32 %v438_v59  ;;  %v435_v60 = vpop.xlane.xlu1 %434  ;;  %vm448_vm13 = vcmp.eq.f32.partialorder %v438_v59, inf  ;;  %v451_v5 = vand.u32 2147483648, %v438_v59  ;;  %vm450_vm14 = vcmp.eq.f32.partialorder %v438_v59, 0.0 }
 0x2d1   :  { %5713 = vrsqrt.f32 %v435_v60  ;;  %vm441_vm15 = vcmp.eq.f32.partialorder %v435_v60, inf  ;;  %v444_v15 = vand.u32 2147483648, %v435_v60  ;;  %vm443_vm2 = vcmp.eq.f32.partialorder %v435_v60, 0.0 }
 0x2d4   :  { %v6407_v62 = vpop.permute.xlu1 %745 }
 0x2d5   :  { %v755_v16 = vmul.f32 %v6412_v4, %v6407_v62 }
 0x2d8   :  { %v6409_v63 = vpop.permute.xlu1 %670 }
 0x2da   :  { %v5712_v0 = vpop.eup %5711 }
 0x2db   :  { %v5714_v2 = vpop.eup %5713  ;;  %v447_v3 = vmul.f32 %v5712_v0, %v438_v59 }
 0x2dc   :  { %v440_v6 = vmul.f32 %v5714_v2, %v435_v60  ;;  %v6414_v7 = vpop.permute.xlu1 %675 }
 0x2dd   :  { %v449_v11 = vsel %vm448_vm13, %v438_v59, %v447_v3  ;;  %v6417_v12 = vmul.f32 0.0, %v6414_v7  ;;  %v1233_v3 = vld [vmem:[%s7075_s12] sm:$0xff] }
 0x2de   :  { %v452_v13 = vsel %vm450_vm14, %v451_v5, %v449_v11  ;;  %v442_v14 = vsel %vm441_vm15, %v435_v60, %v440_v6  ;;  %v1237_v11 = vld [vmem:[%s7075_s12 + $0x20] sm:$0xff]  ;;  %vm484_vm14 = vcmp.ge.s32.totalorder %v6313_v10, 32  ;;  %vm487_vm15 = vcmp.lt.s32.totalorder %v6313_v10, 64 }
 0x2df   :  { %vm454_vm1 = vcmp.le.f32.partialorder %v452_v13, 1e-06  ;;  %v445_v18 = vsel %vm443_vm2, %v444_v15, %v442_v14  ;;  %v6422_v20 = vadd.f32 %v755_v16, %v6417_v12  ;;  %v1239_v14 = vld [vmem:[%s7075_s12 + $0x30] sm:$0xff]  ;;  %vm506_vm2 = vcmp.lt.s32.totalorder %v6313_v10, 96 }
 0x2e0   :  { %v456_v17 = vsel %vm454_vm1, 1e-06, %v452_v13  ;;  %vm453_vm3 = vcmp.le.f32.partialorder %v445_v18, 1e-06  ;;  %v1235_v13 = vld [vmem:[%s7075_s12 + $0x10] sm:$0xff]  ;;  %vm503_vm1 = vcmp.ge.s32.totalorder %v6313_v10, 64 }
 0x2e1   :  { %5715 = vrcp.f32 %v456_v17  ;;  %v455_v21 = vsel %vm453_vm3, 1e-06, %v445_v18  ;;  %v523_v39 = vmul.f32 0.2, %v456_v17  ;;  %v5397_v17 = vpack.c.bf16 %v1237_v11, %v1233_v3 }
 0x2e2   :  { %5717 = vrcp.f32 %v455_v21  ;;  %v522_v29 = vmul.f32 0.2, %v455_v21  ;;  %v5401_v18 = vpack.c.bf16 %v1239_v14, %v1235_v13  ;;  %vm464_vm3 = vcmp.lt.s32.totalorder %v6313_v10, 32 }
 0x2e3   :  { %v554_v44 = vsub.f32 %v523_v39, %v4942_v36  ;;  %v525_v58 = vmul.f32 %v523_v39, %v523_v39  ;;  %vm543_vm8 = vcmp.lt.f32.partialorder %v523_v39, 1.0 }
 0x2e4   :  { %v530_v41 = vmul.f32 -15.0, %v522_v29  ;;  %v524_v51 = vmul.f32 %v522_v29, %v522_v29  ;;  %vm542_vm5 = vcmp.lt.f32.partialorder %v522_v29, 1.0 }
 0x2e5   :  { %v527_v2 = vmul.f32 %v525_v58, %v525_v58 }
 0x2e6   :  { %v532_v45 = vadd.f32 35.0, %v530_v41  ;;  %v526_v57 = vmul.f32 %v524_v51, %v524_v51 }
 0x2e7   :  { %v529_v15 = vmul.f32 %v527_v2, %v523_v39 }
 0x2e8   :  { %v534_v54 = vmul.f32 %v532_v45, %v522_v29  ;;  %v528_v0 = vmul.f32 %v526_v57, %v522_v29 }
 0x2ea   :  { %v536_v59 = vadd.f32 -21.0, %v534_v54 }
 0x2eb   :  { %v5716_v23 = vpop.eup %5715 }
 0x2ec   :  { %v469_v25 = vmul.f32 %v5716_v23, %v6363_v35  ;;  %v5718_v27 = vpop.eup %5717  ;;  %v4955_v35 = vld [vmem:[#allocation10] ss:$0 sm:$0xff]  ;;  %v538_v5 = vmul.f32 %v536_v59, %v528_v0 }
 0x2ed   :  { %v468_v28 = vmul.f32 %v5718_v27, %v6367_v38  ;;  %v553_v38 = vsub.f32 %v522_v29, %v4942_v36  ;;  %v6465_v36 = vshrl.u32 %v216_v9, 7 }
 0x2ee   :  { %515 = vperm.xlu0 %5698, %v469_v25   ;;  %477 = vperm.xlu1 %5693, %v469_v25   ;;  %v540_v21 = vadd.f32 1.0, %v538_v5 }
 0x2ef   :  { %v555_v43 = vmul.f32 %v553_v38, %v553_v38  ;;  %v1065_v38 = vld [vmem:[%s7074_s11] sm:$0xf]  ;;  %v6477_v41 = vsub.s32 0, %v6465_v36 }
 0x2f1   :  { %v557_v46 = vmul.f32 -112.5, %v555_v43  ;;  %v6480_v43 = vsub.s32 2, %v6465_v36  ;;  %v1070_v45 = vrot.slane %v1065_v38, %v6477_v41 }
 0x2f2   :  { %5694 = vset.pattern.permute.xlu1 %v6013_v30  ;;  %5705 = vset.pattern.permute.xlu0 %v6013_v30 }
 0x2f3   :  { %496 = vperm.xlu1 %5694, %v469_v25   ;;  %v559_v55 = vmul.f32 1.442695, %v557_v46  ;;  %v1078_v46 = vrot.slane %v1065_v38, %v6480_v43 }
 0x2f7   :  { %5695 = vset.pattern.permute.xlu1 %v6008_v1 }
 0x2f8   :  { %472 = vperm.xlu1 %5695, %v468_v28  }
 0x2fc   :  { %5696 = vset.pattern.permute.xlu1 %v6013_v30  ;;  %v531_v30 = vmul.f32 -15.0, %v523_v39 }
 0x2fd   :  { %492 = vperm.xlu1 %5696, %v468_v28  }
 0x301   :  { %5697 = vset.pattern.permute.xlu1 %v6014_v50  ;;  %v556_v50 = vmul.f32 %v554_v44, %v554_v44 }
 0x302   :  { %511 = vperm.xlu1 %5697, %v468_v28   ;;  %v544_v28 = vsel %vm542_vm5, %v540_v21, 0.0  ;;  %v640_v21 = vadd.s32 128, %v6313_v10  ;;  %vm1776_vm5 = vcmask 785408  }
 0x303   :  { %v558_v56 = vmul.f32 -112.5, %v556_v50 }
 0x304   :  { %vm653_vm10 = vcmp.lt.s32.totalorder %v640_v21, 224  ;;  %vm713_vm12 = vcmp.ge.s32.totalorder %v640_v21, 224 }
 0x305   :  { %v561_v61 = vmul.f32 1.442695, %v558_v56 }
 0x306   :  { %5704 = vset.pattern.permute.xlu1 %v6008_v1  ;;  %v533_v1 = vadd.f32 35.0, %v531_v30  ;;  %v1241_v30 = vld [vmem:[%s7076_s13] sm:$0xf] }
 0x308   :  { %v535_v60 = vmul.f32 %v533_v1, %v523_v39  ;;  %v6471_v39 = vsub.s32 3, %v6465_v36 }
 0x30a   :  { %v537_v6 = vadd.f32 -21.0, %v535_v60  ;;  %v1082_v9 = vrot.slane %v1065_v38, %v6471_v39  ;;  %v1258_v57 = vrot.slane %v1241_v30, %v6471_v39 }
 0x30c   :  { %v539_v23 = vmul.f32 %v537_v6, %v529_v15 }
 0x310   :  { %v1022_v31 = vpop.f32.mrb[4].mxu1 }
 0x311   :  { %v1023_v32 = vadd.f32 %v4955_v35, %v1022_v31  ;;  %v5173_v33 = vpop.f32.mrb[5].mxu1  ;;  %v541_v35 = vadd.f32 1.0, %v539_v23  ;;  %v742_v23 = vpop.permute.xlu0 %741 }
 0x313   :  { %v4957_v37 = vmul.f32 -1.442695, %v1023_v32  ;;  %v545_v29 = vsel %vm543_vm8, %v541_v35, 0.0  ;;  %v748_v35 = vmul.f32 0.0, %v742_v23 }
 0x315   :  { %5719 = vpow2.f32 %v4957_v37  ;;  %v6468_v37 = vsub.s32 1, %v6465_v36 }
 0x317   :  { %v1074_v44 = vrot.slane %v1065_v38, %v6468_v37  ;;  %v1250_v56 = vrot.slane %v1241_v30, %v6468_v37  ;;  %v751_v38 = vmul.f32 %v6412_v4, %v742_v23 }
 0x31f   :  { %v5720_v52 = vpop.eup %5719 }
 0x320   :  { %v1029_v53 = vadd.f32 1.0, %v5720_v52 }
 0x322   :  { %5721 = vrcp.f32 %v1029_v53  ;;  %v1254_v53 = vrot.slane %v1241_v30, %v6480_v43 }
 0x323   :  { %5723 = vpow2.f32 %v559_v55 }
 0x324   :  { %5725 = vpow2.f32 %v561_v61 }
 0x32c   :  { %v5722_v16 = vpop.eup %5721 }
 0x32d   :  { %v1032_v25 = vmul.f32 %v5722_v16, %v1023_v32  ;;  %v5724_v27 = vpop.eup %5723 }
 0x32e   :  { %v6448_v31 = vmul.f32 %v5724_v27, %v544_v28  ;;  %v5726_v33 = vpop.eup %5725  ;;  %v1246_v27 = vrot.slane %v1241_v30, %v6477_v41  ;;  %v4948_v28 = vsel %vm713_vm12, 1.0, %v7100_v8 }
 0x32f   :  { %4958 = vmatmul.mubr.msk.f32.vlgmr.msra.gmra.mrb[6].mxu0 %vm1087_vm4, %v1032_v25  ;;  %4959 = vmatmul.mubr.msk.f32.vlgmr.msra.gmra.mrb[6].mxu1 %vm1087_vm4, %v1032_v25  ;;  %v6456_v32 = vmul.f32 %v5726_v33, %v545_v29  ;;  %v4946_v25 = vsel %vm653_vm10, 1.0, %v7100_v8  ;;  %v680_v33 = vmul.f32 0.0, %v6409_v63  ;;  %v749_v29 = vmul.f32 %v4948_v28, %v742_v23 }
 0x330   :  { %5398 = vmatpush1.bf16.msra.mxu0 %v5397_v17  ;;  %5402 = vmatpush1.bf16.msra.mxu1 %v5401_v18 }
 0x331   :  { %1334 = vmatprep.mubr.f32.mxu0 %v7100_v8  ;;  %1411 = vmatprep.mubr.f32.mxu1 %v7100_v8  ;;  %v6521_v30 = vadd.f32 %v751_v38, %v680_v33 }
 0x333   :  { %4960 = vmatmul.mubr.msk.f32.vlgmr.msra.gmra.mrb[8].mxu0 %vm1263_vm7, %v6448_v31  ;;  %4962 = vmatmul.mubr.msk.f32.vlgmr.msra.gmra.mrb[8].mxu1 %vm1263_vm7, %v6448_v31 }
 0x334   :  { %1340 = vmatprep.mubr.f32.mxu0 %v7100_v8  ;;  %1417 = vmatprep.mubr.f32.mxu1 %v7100_v8 }
 0x337   :  { %4961 = vmatmul.mubr.msk.f32.gmra.mrb[10].mxu0 %vm1263_vm7, %v6456_v32  ;;  %4963 = vmatmul.mubr.msk.f32.gmra.mrb[10].mxu1 %vm1263_vm7, %v6456_v32 }
 0x338   :  { %1496 = vmatprep.mubr.f32.mxu0 %v7100_v8  ;;  %1573 = vmatprep.mubr.f32.mxu1 %v7100_v8 }
 0x36d   :  { %v6578_v38 = vpop.permute.xlu1 %477 }
 0x402   :  { %v1157_v50 = vpop.f32.mrb[6].mxu0  ;;  %v1228_v51 = vpop.f32.mrb[6].mxu1 }
 0x403   :  { %v1159_v52 = vpop.f32.mrb[7].mxu0  ;;  %v1230_v1 = vpop.f32.mrb[7].mxu1  ;;  %v1158_v58 = vadd.f32 %v1157_v50, %v1070_v45  ;;  %v1229_v59 = vadd.f32 %v1228_v51, %v1078_v46  ;;  %v6514_v45 = vadd.f32 %v748_v35, %v6409_v63  ;;  %v6516_v46 = vadd.f32 %v742_v23, %v680_v33 }
 0x404   :  { %v1160_v54 = vadd.f32 %v1159_v52, %v1074_v44  ;;  %v1231_v55 = vadd.f32 %v1230_v1, %v1082_v9  ;;  %v679_v44 = vmul.f32 %v4946_v25, %v6409_v63  ;;  %v683_v50 = vmul.f32 %v4946_v25, %v6414_v7 }
 0x405   :  { %v752_v52 = vmul.f32 0.0, %v6407_v62 }
 0x406   :  { %v1336_v60 = vpop.f32.mrb[8].mxu0  ;;  %v1413_v61 = vpop.f32.mrb[8].mxu1  ;;  %1432 = vmatprep.subr.mxu0 %v1160_v54  ;;  %1509 = vmatprep.subr.mxu1 %v1231_v55  ;;  %v6519_v51 = vadd.f32 %v749_v29, %v679_v44  ;;  %v753_v54 = vmul.f32 %v4948_v28, %v6407_v62 }
 0x407   :  { %v1414_v0 = vadd.f32 %v1413_v61, %v1254_v53  ;;  %v1338_v2 = vpop.f32.mrb[9].mxu0  ;;  %v1415_v3 = vpop.f32.mrb[9].mxu1  ;;  %1433 = vmatpush1.msra.mxu0 %v1158_v58  ;;  %1510 = vmatpush1.msra.mxu1 %v1229_v59  ;;  %v1337_v9 = vadd.f32 %v1336_v60, %v1246_v27  ;;  %v6530_v58 = vadd.f32 %v752_v52, %v6414_v7  ;;  %v1752_v52 = vld [vmem:[#allocation13] sm:$0xff] }
 0x408   :  { %v1339_v5 = vadd.f32 %v1338_v2, %v1250_v56  ;;  %v1416_v6 = vadd.f32 %v1415_v3, %v1258_v57  ;;  %4964 = vmatmul.mubr.msk.f32.vlgmr.msra.gmra.mrb[12].mxu0 %vm265_vm0, %v6325_v19  ;;  %4966 = vmatmul.mubr.msk.f32.vlgmr.msra.gmra.mrb[12].mxu1 %vm265_vm0, %v6325_v19  ;;  %v6536_v3 = vadd.f32 %v6407_v62, %v6417_v12  ;;  %v497_v44 = vpop.permute.xlu1 %496 }
 0x409   :  { %1502 = vmatprep.mubr.f32.mxu0 %v7100_v8  ;;  %1579 = vmatprep.mubr.f32.mxu1 %v7100_v8  ;;  %v1426_v4 = vmul.f32 %v1414_v0, %v6516_v46 }
 0x40a   :  { %v1342_v11 = vpop.f32.mrb[10].mxu0  ;;  %v1419_v13 = vpop.f32.mrb[10].mxu1  ;;  %5403 = vmatprep.subr.bf16.mxu0 %v6012_v24 }
 0x40b   :  { %v1420_v14 = vadd.f32 %v1419_v13, %v1254_v53  ;;  %v1344_v15 = vpop.f32.mrb[11].mxu0  ;;  %v1421_v16 = vpop.f32.mrb[11].mxu1  ;;  %v1343_v1 = vadd.f32 %v1342_v11, %v1246_v27  ;;  %v1424_v53 = vmul.f32 %v1337_v9, %v6514_v45  ;;  %v6542_v13 = vadd.f32 %v753_v54, %v683_v50  ;;  %v1753_v9 = vld [vmem:[#allocation13 + $0x8] sm:$0xff]  ;;  %v1755_v50 = vld [vmem:[#allocation13 + $0x18] sm:$0xff] }
 0x40c   :  { %v1345_v17 = vadd.f32 %v1344_v15, %v1250_v56  ;;  %v1422_v18 = vadd.f32 %v1421_v16, %v1258_v57  ;;  %4965 = vmatmul.mubr.msk.f32.gmra.mrb[14].mxu0 %vm265_vm0, %v6340_v26  ;;  %4967 = vmatmul.mubr.msk.f32.gmra.mrb[14].mxu1 %vm265_vm0, %v6340_v26  ;;  %v1425_v56 = vmul.f32 %v1339_v5, %v6519_v51  ;;  %v1759_v54 = vld [vmem:[#allocation13 + $0x38] sm:$0xff] }
 0x40d   :  { %5178 = vmatprep.mubr.msk.f32.mxu0 %vm6011_vm6, %v7100_v8  ;;  %1844 = vmatprep.mubr.f32.mxu1 %v7100_v8  ;;  %v1427_v57 = vmul.f32 %v1416_v6, %v6521_v30  ;;  %v1428_v7 = vmul.f32 %v1343_v1, %v6530_v58  ;;  %v1430_v5 = vmul.f32 %v1420_v14, %v6536_v3  ;;  %v4928_v6 = vld [vmem:[%s7121_s6] ss:$0 sm:$0xff] }
 0x40e   :  { %v1429_v16 = vmul.f32 %v1345_v17, %v6542_v13  ;;  %v1431_v21 = vmul.f32 %v1422_v18, %v6422_v20  ;;  %vm248_vm13 = vcmp.eq.s32.totalorder %v6465_v36, %v4928_v6  ;;  %v5409_v1 = vpack.c.bf16 %v1755_v50, %v1753_v9  ;;  %v1760_v6 = vld [vmem:[#allocation13 + $0x40] sm:$0xff]  ;;  %v1766_v50 = vld [vmem:[#allocation13 + $0x70] sm:$0xff] }
 0x40f   :  { %v6571_v18 = vsel %vm248_vm13, 1.0, %v7100_v8  ;;  %v1764_v9 = vld [vmem:[#allocation13 + $0x60] sm:$0xff] }
 0x410   :  { %5410 = vmatprep.subr.bf16.mxu1 %v5409_v1  ;;  %v1771_v1 = vld [vmem:[#allocation13 + $0x98] sm:$0xff] }
 0x4db   :  { %v1498_v55 = vpop.f32.mrb[12].mxu0  ;;  %v1575_v63 = vpop.f32.mrb[12].mxu1 }
 0x4dc   :  { %v1586_v59 = vmul.f32 %v1498_v55, %v1424_v53  ;;  %v6532_v60 = vmul.f32 %v1575_v63, %v1426_v4  ;;  %v1500_v61 = vpop.f32.mrb[13].mxu0  ;;  %v1577_v2 = vpop.f32.mrb[13].mxu1  ;;  %v1754_v53 = vld [vmem:[#allocation13 + $0x10] sm:$0xff]  ;;  %v1757_v4 = vld [vmem:[#allocation13 + $0x28] sm:$0xff] }
 0x4dd   :  { %v6538_v0 = vmul.f32 %v1500_v61, %v1425_v56  ;;  %v6540_v11 = vmul.f32 %v1577_v2, %v1427_v57  ;;  %v5411_v55 = vpack.c.bf16 %v1754_v53, %v1752_v52  ;;  %v5413_v63 = vpack.c.bf16 %v1759_v54, %v1757_v4  ;;  %v1756_v56 = vld [vmem:[#allocation13 + $0x20] sm:$0xff]  ;;  %v1758_v57 = vld [vmem:[#allocation13 + $0x30] sm:$0xff]  ;;  %v473_v61 = vpop.permute.xlu1 %472  ;;  %v1763_v2 = vld [vmem:[#allocation13 + $0x58] sm:$0xff] }
 0x4de   :  { %1598 = vrot.lane.b32.xlu1 %v1586_v59, %s6015_s3  ;;  %v1769_v52 = vld [vmem:[#allocation13 + $0x88] sm:$0xff]  ;;  %v5423_v4 = vpack.c.bf16 %v1766_v50, %v1764_v9  ;;  %v4940_v54 = vsel %vm503_vm1, 1.0, %v7100_v8  ;;  %v516_v50 = vpop.permute.xlu0 %515 }
 0x4df   :  { %v6552_v62 = vmul.f32 %v6538_v0, %v6386_v49  ;;  %v1504_v12 = vpop.f32.mrb[14].mxu0  ;;  %v1581_v15 = vpop.f32.mrb[14].mxu1  ;;  %5412 = vmatpush1.bf16.msra.mxu1 %v5411_v55  ;;  %v4941_v55 = vsel %vm506_vm2, 1.0, %v7100_v8 }
 0x4e0   :  { %v1590_v23 = vmul.f32 %v1504_v12, %v1428_v7  ;;  %v6556_v25 = vmul.f32 %v1581_v15, %v1430_v5  ;;  %v1506_v27 = vpop.f32.mrb[15].mxu0  ;;  %v1583_v28 = vpop.f32.mrb[15].mxu1  ;;  %v5415_v7 = vpack.c.bf16 %v1758_v57, %v1756_v56  ;;  %5414 = vmatprep.subr.bf16.mxu1 %v5413_v63  ;;  %v1762_v12 = vld [vmem:[#allocation13 + $0x50] sm:$0xff]  ;;  %v1765_v15 = vld [vmem:[#allocation13 + $0x68] sm:$0xff]  ;;  %v5425_v63 = vpack.c.bf16 %v1771_v1, %v1769_v52  ;;  %v1768_v56 = vld [vmem:[#allocation13 + $0x80] sm:$0xff] }
 0x4e1   :  { %v6558_v14 = vmul.f32 %v1506_v27, %v1429_v16  ;;  %v6560_v35 = vmul.f32 %v1583_v28, %v1431_v21  ;;  %v1767_v16 = vld [vmem:[#allocation13 + $0x78] sm:$0xff]  ;;  %v5419_v21 = vpack.c.bf16 %v1762_v12, %v1760_v6  ;;  %v4939_v27 = vsel %vm487_vm15, 1.0, %v7100_v8  ;;  %v493_v28 = vpop.permute.xlu1 %492  ;;  %v1770_v57 = vld [vmem:[#allocation13 + $0x90] sm:$0xff] }
 0x4e2   :  { %v5404_v33 = vpack.c.bf16 %v1590_v23, %v1586_v59  ;;  %1600 = vrot.lane.b32.xlu1 %v1590_v23, %s6015_s3  ;;  %v1761_v59 = vld [vmem:[#allocation13 + $0x48] sm:$0xff]  ;;  %v4938_v23 = vsel %vm484_vm14, 1.0, %v7100_v8  ;;  %v509_v6 = vmul.f32 %v4941_v55, %v4940_v54  ;;  %v5427_v10 = vpack.c.bf16 %v1770_v57, %v1768_v56 }
 0x4e3   :  { %v6566_v29 = vmul.f32 %v6384_v48, %v6558_v14  ;;  %v5417_v5 = vpack.c.bf16 %v1763_v2, %v1761_v59  ;;  %5416 = vmatpush1.bf16.msra.mxu1 %v5415_v7  ;;  %v490_v53 = vmul.f32 %v4939_v27, %v4938_v23  ;;  %v1773_v59 = vld [vmem:[#allocation13 + $0xa8] sm:$0xff]  ;;  %v1775_v2 = vld [vmem:[#allocation13 + $0xb8] sm:$0xff]  ;;  %v4937_v7 = vsel %vm464_vm3, 1.0, %v7100_v8  ;;  %v1774_v23 = vld [vmem:[#allocation13 + $0xb0] sm:$0xff] }
 0x4e4   :  { %5405 = vmatpush3.bf16.msra.mxu0 %v5404_v33  ;;  %v5421_v33 = vpack.c.bf16 %v1767_v16, %v1765_v15  ;;  %v5429_v16 = vpack.c.bf16 %v1775_v2, %v1773_v59  ;;  %v481_v27 = vmul.f32 %v4937_v7, %v6578_v38  ;;  %v519_v54 = vmul.f32 %v516_v50, %v509_v6 }
 0x4e5   :  { %5406 = vmatprep.subr.bf16.mxu0 %v6012_v24  ;;  %5418 = vmatprep.subr.bf16.mxu1 %v5417_v5  ;;  %v512_v5 = vpop.permute.xlu1 %511  ;;  %v500_v12 = vmul.f32 %v497_v44, %v490_v53  ;;  %v499_v15 = vmul.f32 %v493_v28, %v490_v53  ;;  %v7122_v56 = vmov 0.0   ;;  %vm4912_vm3 = vcmask 1024  }
 0x4e6   :  { %v518_v9 = vmul.f32 %v512_v5, %v509_v6  ;;  %v7124_v5 = vpack.i.bf16 %v6558_v14, %v6538_v0  ;;  %v1892_v6 = vld [vmem:[#allocation16] sm:$0xff] }
 0x4e7   :  { %5179 = vmatmul.mubr.msk.f32.vlgmr.msra.gmra.mrb[16].mxu0 %vm1263_vm7, %v6571_v18  ;;  %5420 = vmatpush1.bf16.msra.mxu1 %v5419_v21  ;;  %v1772_v21 = vld [vmem:[#allocation13 + $0xa0] sm:$0xff]  ;;  %v502_v52 = vadd.f32 %v500_v12, %v481_v27  ;;  %v1893_v12 = vld [vmem:[#allocation16 + $0x8] sm:$0xff] }
 0x4e8   :  { %5185 = vmatprep.mubr.msk.f32.mxu0 %vm6011_vm6, %v7100_v8  ;;  %5422 = vmatprep.subr.bf16.mxu1 %v5421_v33  ;;  %v480_v33 = vmul.f32 %v4937_v7, %v473_v61  ;;  %v5431_v17 = vpack.c.bf16 %v1774_v23, %v1772_v21 }
 0x4e9   :  { %v6593_v28 = vadd.f32 %v519_v54, %v502_v52 }
 0x4ea   :  { %v501_v1 = vadd.f32 %v499_v15, %v480_v33  ;;  %v1894_v15 = vld [vmem:[#allocation16 + $0x10] sm:$0xff] }
 0x4eb   :  { %5424 = vmatpush1.bf16.msra.mxu1 %v5423_v4 }
 0x4ec   :  { %5426 = vmatprep.subr.bf16.mxu1 %v5425_v63  ;;  %v6591_v44 = vadd.f32 %v518_v9, %v501_v1 }
 0x4ef   :  { %5428 = vmatpush1.bf16.msra.mxu1 %v5427_v10  ;;  %v5434_v10 = vpack.c.bf16 %v1893_v12, %v1892_v6  ;;  %v1891_v6 = vld [vmem:[#allocation14 + $0x18] sm:$0xff] }
 0x4f0   :  { %5430 = vmatprep.subr.bf16.mxu1 %v5429_v16  ;;  %v1895_v16 = vld [vmem:[#allocation16 + $0x18] sm:$0xff] }
 0x4f1   :  { %v5437_v21 = vpack.c.bf16 %v1895_v16, %v1894_v15 }
 0x4f3   :  { %5432 = vmatpush1.bf16.msra.mxu1 %v5431_v17 }
 0x4f4   :  { %5453 = vmatprep.subr.bf16.mxu1 %v6012_v24 }
 0x550   :  { %v1599_v8 = vpop.permute.xlu1 %1598 }
 0x551   :  { %v1604_v53 = vmul.f32 %v1599_v8, %v6591_v44 }
 0x553   :  { %v1606_v61 = vadd.f32 %v1604_v53, %v6552_v62 }
 0x554   :  { %v1601_v4 = vpop.permute.xlu1 %1600 }
 0x555   :  { %v1605_v38 = vmul.f32 %v1601_v4, %v6593_v28 }
 0x557   :  { %v1607_v55 = vadd.f32 %v1605_v38, %v6566_v29 }
 0x559   :  { %v5407_v63 = vpack.c.bf16 %v1607_v55, %v1606_v61 }
 0x55b   :  { %5408 = vmatpush3.bf16.msra.mxu0 %v5407_v63 }
 0x55c   :  { %5433 = vmatprep.subr.bf16.mxu0 %v6012_v24 }
 0x55e   :  { %5186 = vmatmul.mubr.msk.f32.vlgmr.msra.gmra.mrb[18].mxu0 %vm1263_vm7, %v6571_v18 }
 0x55f   :  { %5196 = vmatprep.mubr.msk.f32.mxu0 %vm6011_vm6, %v7122_v56  ;;  %5435 = vmatpush3.bf16.msra.mxu0 %v5434_v10 }
 0x560   :  { %5436 = vmatprep.subr.bf16.mxu0 %v6012_v24 }
 0x563   :  { %5438 = vmatpush3.bf16.msra.mxu0 %v5437_v21 }
 0x564   :  { %5439 = vmatprep.subr.bf16.mxu0 %v6012_v24 }
 0x5ba   :  { %v1677_v8 = vpop.f32.mrb[16].mxu0 }
 0x5bb   :  { %v6606_v17 = vadd.f32 %v1677_v8, %v6361_v34  ;;  %v5180_v57 = vpop.f32.mrb[17].mxu0 }
 0x5bc   :  { %v1888_v57 = vld [vmem:[#allocation14] sm:$0xff] }
 0x631   :  { %v6608_v59 = vpop.f32.mrb[18].mxu0 }
 0x632   :  { %v5187_v62 = vpop.f32.mrb[19].mxu0  ;;  %4970 = vmatmul.mubr.msk.f32.vlgmr.msra.gmra.mrb[16].mxu1 %vm1776_vm5, %v6608_v59 }
 0x633   :  { %5214 = vmatprep.mubr.msk.f32.mxu1 %vm6011_vm6, %v7122_v56  ;;  %v1889_v62 = vld [vmem:[#allocation14 + $0x8] sm:$0xff] }
 0x705   :  { %v6614_v29 = vpop.f32.mrb[16].mxu1 }
 0x706   :  { %v6616_v2 = vpop.f32.mrb[17].mxu1  ;;  %v1869_v23 = vmul.f32 %v6614_v29, %v6614_v29 }
 0x707   :  { %v1870_v7 = vmul.f32 %v6616_v2, %v6616_v2 }
 0x709   :  { %1876 = vrot.lane.b32.xlu1 %v1870_v7, %s6016_s8  ;;  %1872 = vrot.lane.b32.xlu0 %v1870_v7, %s6015_s3  ;;  %v5440_v7 = vpack.c.bf16 %v1889_v62, %v1888_v57  ;;  %v2348_v57 = vld [vmem:[#allocation13 + $0xc8] sm:$0xff] }
 0x70d   :  { %2179 = vrot.lane.b32.xlu1 %v6532_v60, %s7123_s1 }
 0x711   :  { %2183 = vrot.lane.b32.xlu1 %v6556_v25, %s7123_s1 }
 0x715   :  { %5700 = vrot.lane.b32.xlu1 %v7124_v5, %s7123_s1  ;;  %v1890_v5 = vld [vmem:[#allocation14 + $0x10] sm:$0xff] }
 0x716   :  { %v5443_v15 = vpack.c.bf16 %v1891_v6, %v1890_v5 }
 0x77b   :  { %v1877_v27 = vpop.permute.xlu1 %1876  ;;  %v1873_v33 = vpop.permute.xlu0 %1872 }
 0x77c   :  { %v1875_v9 = vadd.f32 %v1873_v33, %v1869_v23  ;;  %v2193_v23 = vmul.f32 %v6532_v60, %v6591_v44 }
 0x77e   :  { %v1879_v0 = vadd.f32 %v1877_v27, %v1875_v9  ;;  %v2194_v27 = vmul.f32 %v6556_v25, %v6593_v28 }
 0x77f   :  { %v2180_v14 = vpop.permute.xlu1 %2179 }
 0x780   :  { %v1880_v50 = vadd.f32 1e-08, %v1879_v0 }
 0x782   :  { %5727 = vrsqrt.f32 %v1880_v50  ;;  %vm1883_vm8 = vcmp.eq.f32.partialorder %v1880_v50, inf  ;;  %v1886_v55 = vand.u32 2147483648, %v1880_v50  ;;  %vm1885_vm10 = vcmp.eq.f32.partialorder %v1880_v50, 0.0 }
 0x783   :  { %v2184_v52 = vpop.permute.xlu1 %2183 }
 0x787   :  { %v5701_v1 = vpop.permute.xlu1 %5700 }
 0x788   :  { %v5703_v54 = vunpack.i.h.bf16 %v5701_v1  ;;  %v5702_v53 = vunpack.i.l.bf16 %v5701_v1  ;;  %v2059_v1 = vld [vmem:[#allocation17] sm:$0xff] }
 0x78a   :  { %v5454_v4 = vpack.c.bf16 %v5703_v54, %v5702_v53  ;;  %v2061_v54 = vld [vmem:[#allocation17 + $0x10] sm:$0xff] }
 0x78b   :  { %v5447_v53 = vpack.c.bf16 %v2061_v54, %v2059_v1  ;;  %v2353_v1 = vld [vmem:[#allocation13 + $0xf0] sm:$0xff]  ;;  %v2356_v54 = vld [vmem:[#allocation13 + $0x108] sm:$0xff] }
 0x78c   :  { %v5728_v38 = vpop.eup %5727  ;;  %5455 = vmatpush3.bf16.msra.mxu1 %v5454_v4  ;;  %v2064_v4 = vld [vmem:[#allocation17 + $0x28] sm:$0xff] }
 0x78d   :  { %v1882_v61 = vmul.f32 %v5728_v38, %v1880_v50  ;;  %5456 = vmatprep.subr.bf16.mxu1 %v6012_v24  ;;  %v2066_v38 = vld [vmem:[#allocation17 + $0x38] sm:$0xff] }
 0x78f   :  { %5215 = vmatmul.mubr.msk.f32.vlgmr.msra.gmra.mrb[18].mxu1 %vm1263_vm7, %v6571_v18  ;;  %v1884_v63 = vsel %vm1883_vm8, %v1880_v50, %v1882_v61  ;;  %v2062_v50 = vld [vmem:[#allocation17 + $0x18] sm:$0xff]  ;;  %v5449_v61 = vpack.c.bf16 %v2066_v38, %v2064_v4 }
 0x790   :  { %v1887_v8 = vsel %vm1885_vm10, %v1886_v55, %v1884_v63  ;;  %5221 = vmatprep.mubr.msk.f32.mxu1 %vm6011_vm6, %v7122_v56  ;;  %v2063_v55 = vld [vmem:[#allocation17 + $0x20] sm:$0xff]  ;;  %v2065_v63 = vld [vmem:[#allocation17 + $0x30] sm:$0xff] }
 0x791   :  { %1897 = vrot.lane.b32.xlu0 %v1887_v8, %s7123_s1  ;;  %v5451_v8 = vpack.c.bf16 %v2065_v63, %v2063_v55  ;;  %v2357_v55 = vld [vmem:[#allocation13 + $0x110] sm:$0xff]  ;;  %v2360_v63 = vld [vmem:[#allocation13 + $0x128] sm:$0xff] }
 0x795   :  { %2181 = vrot.lane.b32.xlu0 %v6540_v11, %s7123_s1 }
 0x799   :  { %2185 = vrot.lane.b32.xlu0 %v6560_v35, %s7123_s1 }
 0x803   :  { %v1898_v12 = vpop.permute.xlu0 %1897 }
 0x804   :  { %5197 = vmatmul.mubr.msk.f32.vlgmr.msra.gmra.mrb[20].mxu0 %vm952_vm9, %v1898_v12  ;;  %v4973_v12 = vld [vmem:[%s7080_s17] ss:$0 sm:$0xff] }
 0x805   :  { %5441 = vmatpush3.bf16.msra.mxu0 %v5440_v7  ;;  %5207 = vmatprep.mubr.msk.f32.mxu0 %vm6011_vm6, %v7122_v56 }
 0x806   :  { %5442 = vmatprep.subr.bf16.mxu0 %v6012_v24 }
 0x807   :  { %v2182_v10 = vpop.permute.xlu0 %2181 }
 0x808   :  { %v2187_v11 = vsel %vm952_vm9, %v2180_v14, %v2182_v10 }
 0x809   :  { %5444 = vmatpush3.bf16.msra.mxu0 %v5443_v15  ;;  %v2191_v35 = vmul.f32 %v2187_v11, %v6386_v49 }
 0x80b   :  { %v2186_v16 = vpop.permute.xlu0 %2185  ;;  %v2195_v9 = vadd.f32 %v2193_v23, %v2191_v35 }
 0x80c   :  { %5208 = vmatmul.mubr.msk.f32.vlgmr.msra.gmra.mrb[22].mxu0 %vm952_vm9, %v6606_v17  ;;  %v2188_v21 = vsel %vm952_vm9, %v2184_v52, %v2186_v16 }
 0x80d   :  { %v2192_v33 = vmul.f32 %v6384_v48, %v2188_v21  ;;  %2146 = vmatprep.mubr.f32.mxu0 %v7122_v56  ;;  %v2060_v48 = vld [vmem:[#allocation17 + $0x8] sm:$0xff] }
 0x80e   :  { %v5445_v52 = vpack.c.bf16 %v2062_v50, %v2060_v48 }
 0x80f   :  { %v2196_v0 = vadd.f32 %v2194_v27, %v2192_v33  ;;  %v2347_v33 = vld [vmem:[#allocation13 + $0xc0] sm:$0xff] }
 0x810   :  { %5446 = vmatprep.subr.bf16.mxu0 %v5445_v52  ;;  %v2351_v52 = vld [vmem:[#allocation13 + $0xe0] sm:$0xff] }
 0x811   :  { %v5457_v14 = vpack.c.bf16 %v2196_v0, %v2195_v9  ;;  %5448 = vmatpush1.bf16.msra.mxu0 %v5447_v53  ;;  %v2349_v9 = vld [vmem:[#allocation13 + $0xd0] sm:$0xff]  ;;  %v2352_v0 = vld [vmem:[#allocation13 + $0xe8] sm:$0xff]  ;;  %v2358_v53 = vld [vmem:[#allocation13 + $0x118] sm:$0xff]  ;;  %v5465_v4 = vpack.c.bf16 %v2353_v1, %v2351_v52 }
 0x812   :  { %5450 = vmatprep.subr.bf16.mxu0 %v5449_v61  ;;  %v5467_v38 = vpack.c.bf16 %v2358_v53, %v2356_v54  ;;  %v2355_v61 = vld [vmem:[#allocation13 + $0x100] sm:$0xff] }
 0x813   :  { %5458 = vmatpush3.bf16.msra.mxu1 %v5457_v14  ;;  %v2354_v14 = vld [vmem:[#allocation13 + $0xf8] sm:$0xff] }
 0x814   :  { %5483 = vmatprep.subr.bf16.mxu1 %v6012_v24  ;;  %v5463_v50 = vpack.c.bf16 %v2354_v14, %v2352_v0  ;;  %v6681_v14 = vld [vmem:[%s7082_s19] sm:$0x3] }
 0x815   :  { %5452 = vmatpush1.bf16.msra.mxu0 %v5451_v8  ;;  %v2362_v8 = vld [vmem:[#allocation13 + $0x138] sm:$0xff] }
 0x816   :  { %5222 = vmatmul.mubr.msk.f32.vlgmr.msra.gmra.mrb[20].mxu1 %vm1263_vm7, %v6571_v18 }
 0x817   :  { %5232 = vmatprep.mubr.msk.f32.mxu1 %vm6011_vm6, %v7122_v56 }
 0x862   :  { %v2271_v49 = vpop.f32.mrb[18].mxu1 }
 0x863   :  { %v6665_v60 = vadd.f32 %v2271_v49, %v6361_v34  ;;  %v5216_v25 = vpop.f32.mrb[19].mxu1  ;;  %v2350_v34 = vld [vmem:[#allocation13 + $0xd8] sm:$0xff] }
 0x864   :  { %v5459_v62 = vpack.c.bf16 %v2350_v34, %v2348_v57  ;;  %v5461_v25 = vpack.c.bf16 %v2349_v9, %v2347_v33  ;;  %v5469_v57 = vpack.c.bf16 %v2357_v55, %v2355_v61  ;;  %v5471_v34 = vpack.c.bf16 %v2362_v8, %v2360_v63  ;;  %v2367_v33 = vld [vmem:[#allocation13 + $0x160] sm:$0xff]  ;;  %v2369_v9 = vld [vmem:[#allocation13 + $0x170] sm:$0xff]  ;;  %v2491_v63 = vld [vmem:[#allocation16 + $0x38] sm:$0xff] }
 0x865   :  { %v5481_v0 = vpack.c.bf16 %v2369_v9, %v2367_v33  ;;  %v2490_v61 = vld [vmem:[#allocation16 + $0x30] sm:$0xff] }
 0x866   :  { %5460 = vmatprep.subr.bf16.mxu0 %v5459_v62  ;;  %v2359_v62 = vld [vmem:[#allocation13 + $0x120] sm:$0xff]  ;;  %v5487_v8 = vpack.c.bf16 %v2491_v63, %v2490_v61 }
 0x8d7   :  { %v1967_v7 = vpop.f32.mrb[20].mxu0 }
 0x8d8   :  { %v5198_v5 = vpop.f32.mrb[21].mxu0 }
 0x8d9   :  { %v2364_v5 = vld [vmem:[#allocation13 + $0x148] sm:$0xff] }
 0x8df   :  { %v2040_v6 = vpop.f32.mrb[22].mxu0 }
 0x8e0   :  { %v2041_v15 = vadd.f32 %v2040_v6, %v1967_v7  ;;  %v5209_v10 = vpop.f32.mrb[23].mxu0  ;;  %v2361_v7 = vld [vmem:[#allocation13 + $0x130] sm:$0xff]  ;;  %v2366_v6 = vld [vmem:[#allocation13 + $0x158] sm:$0xff] }
 0x8e1   :  { %v2363_v10 = vld [vmem:[#allocation13 + $0x140] sm:$0xff] }
 0x8e2   :  { %v2051_v11 = vadd.f32 %v4973_v12, %v2041_v15  ;;  %v5473_v12 = vpack.c.bf16 %v2361_v7, %v2359_v62  ;;  %v5475_v15 = vpack.c.bf16 %v2366_v6, %v2364_v5 }
 0x8e4   :  { %v4974_v35 = vmul.f32 -1.442695, %v2051_v11 }
 0x8e6   :  { %5729 = vpow2.f32 %v4974_v35  ;;  %v2368_v35 = vld [vmem:[#allocation13 + $0x168] sm:$0xff] }
 0x8e9   :  { %v6670_v16 = vpop.f32.mrb[20].mxu1 }
 0x8ea   :  { %v5223_v21 = vpop.f32.mrb[21].mxu1 }
 0x8eb   :  { %v2370_v21 = vld [vmem:[#allocation13 + $0x178] sm:$0xff] }
 0x8f0   :  { %v5730_v23 = vpop.eup %5729 }
 0x8f1   :  { %v2055_v27 = vadd.f32 1.0, %v5730_v23 }
 0x8f3   :  { %5731 = vrcp.f32 %v2055_v27  ;;  %v5479_v27 = vpack.c.bf16 %v2370_v21, %v2368_v35 }
 0x8fd   :  { %v5732_v49 = vpop.eup %5731 }
 0x8fe   :  { %v2058_v48 = vmul.f32 %v5732_v49, %v2051_v11  ;;  %v2365_v11 = vld [vmem:[#allocation13 + $0x150] sm:$0xff]  ;;  %v2072_v49 = vrot.slane %v6681_v14, %v6477_v41 }
 0x8ff   :  { %v5477_v23 = vpack.c.bf16 %v2365_v11, %v2363_v10 }
 0x900   :  { %4975 = vmatmul.mubr.msk.f32.vlgmr.msra.gmra.mrb[24].mxu0 %vm952_vm9, %v2058_v48 }
 0x901   :  { %5462 = vmatpush1.bf16.msra.mxu0 %v5461_v25  ;;  %2438 = vmatprep.mubr.f32.mxu0 %v7122_v56 }
 0x902   :  { %5464 = vmatprep.subr.bf16.mxu0 %v5463_v50 }
 0x905   :  { %5466 = vmatpush1.bf16.msra.mxu0 %v5465_v4 }
 0x906   :  { %5468 = vmatprep.subr.bf16.mxu0 %v5467_v38  ;;  %v2489_v38 = vld [vmem:[#allocation16 + $0x28] sm:$0xff] }
 0x909   :  { %5470 = vmatpush1.bf16.msra.mxu0 %v5469_v57 }
 0x90a   :  { %5472 = vmatprep.subr.bf16.mxu0 %v5471_v34 }
 0x90d   :  { %5474 = vmatpush1.bf16.msra.mxu0 %v5473_v12 }
 0x90e   :  { %5476 = vmatprep.subr.bf16.mxu0 %v5475_v15 }
 0x911   :  { %5478 = vmatpush1.bf16.msra.mxu0 %v5477_v23 }
 0x912   :  { %5480 = vmatprep.subr.bf16.mxu0 %v5479_v27 }
 0x915   :  { %5482 = vmatpush1.bf16.msra.mxu0 %v5481_v0 }
 0x918   :  { %4978 = vmatmul.mubr.msk.f32.vlgmr.msra.gmra.mrb[26].mxu0 %vm1776_vm5, %v6670_v16 }
 0x919   :  { %5248 = vmatprep.mubr.msk.f32.mxu0 %vm265_vm0, %v6325_v19 }
 0x9d3   :  { %v2148_v25 = vpop.f32.mrb[24].mxu0 }
 0x9d4   :  { %v6685_v48 = vadd.f32 %v2148_v25, %v2072_v49  ;;  %v6687_v50 = vpop.f32.mrb[25].mxu0 }
 0x9d6   :  { %v2171_v52 = vmul.f32 %v6685_v48, %v6614_v29 }
 0x9d8   :  { %v6692_v1 = vadd.f32 %v2171_v52, %v6608_v59  ;;  %v2488_v59 = vld [vmem:[#allocation16 + $0x20] sm:$0xff] }
 0x9d9   :  { %v5484_v55 = vpack.c.bf16 %v2489_v38, %v2488_v59  ;;  %v2483_v52 = vld [vmem:[#allocation14 + $0x20] sm:$0xff]  ;;  %v2486_v38 = vld [vmem:[#allocation14 + $0x38] sm:$0xff] }
 0x9db   :  { %5485 = vmatpush3.bf16.msra.mxu1 %v5484_v55 }
 0x9dc   :  { %5486 = vmatprep.subr.bf16.mxu1 %v6012_v24 }
 0x9df   :  { %5488 = vmatpush3.bf16.msra.mxu1 %v5487_v8 }
 0x9e0   :  { %5489 = vmatprep.subr.bf16.mxu1 %v6012_v24 }
 0x9eb   :  { %v6694_v54 = vpop.f32.mrb[26].mxu0 }
 0x9ec   :  { %v2442_v53 = vpop.f32.mrb[27].mxu0 }
 0x9ed   :  { %v2464_v4 = vmul.f32 %v2442_v53, %v2442_v53 }
 0x9ef   :  { %2470 = vrot.lane.b32.xlu1 %v2464_v4, %s6016_s8  ;;  %2466 = vrot.lane.b32.xlu0 %v2464_v4, %s6015_s3  ;;  %v2484_v4 = vld [vmem:[#allocation14 + $0x28] sm:$0xff] }
 0x9f0   :  { %v5490_v59 = vpack.c.bf16 %v2484_v4, %v2483_v52 }
 0x9f3   :  { %764 = vrot.lane.b32.xlu1 %v6376_v42, %s6017_s18  ;;  %v2463_v42 = vmul.f32 %v6694_v54, %v6694_v54 }
 0x9f7   :  { %1853 = vrot.lane.b32.xlu1 %v6614_v29, %s7123_s1 }
 0x9fb   :  { %2447 = vrot.lane.b32.xlu1 %v6694_v54, %s7123_s1 }
 0xa1f   :  { %698 = vadd.xlane.f32.xlu1 %v6382_v47 }
 0xa61   :  { %v2467_v57 = vpop.permute.xlu0 %2466  ;;  %v2471_v62 = vpop.permute.xlu1 %2470 }
 0xa62   :  { %v2469_v34 = vadd.f32 %v2467_v57, %v2463_v42 }
 0xa64   :  { %v2473_v7 = vadd.f32 %v2471_v62, %v2469_v34 }
 0xa65   :  { %v765_v11 = vpop.permute.xlu1 %764 }
 0xa66   :  { %v2474_v47 = vadd.f32 1e-08, %v2473_v7  ;;  %v770_v55 = vsel %vm694_vm11, %v765_v11, 0.0 }
 0xa68   :  { %5733 = vrsqrt.f32 %v2474_v47  ;;  %vm2477_vm12 = vcmp.eq.f32.partialorder %v2474_v47, inf  ;;  %v2480_v12 = vand.u32 2147483648, %v2474_v47  ;;  %vm2479_vm13 = vcmp.eq.f32.partialorder %v2474_v47, 0.0 }
 0xa69   :  { %v1854_v35 = vpop.permute.xlu1 %1853 }
 0xa6d   :  { %v2448_v21 = vpop.permute.xlu1 %2447 }
 0xa72   :  { %v5734_v5 = vpop.eup %5733 }
 0xa73   :  { %v2476_v6 = vmul.f32 %v5734_v5, %v2474_v47  ;;  %v2658_v5 = vld [vmem:[#allocation17 + $0x48] sm:$0xff] }
 0xa75   :  { %v2478_v15 = vsel %vm2477_vm12, %v2474_v47, %v2476_v6  ;;  %v2660_v6 = vld [vmem:[#allocation17 + $0x58] sm:$0xff] }
 0xa76   :  { %v2481_v10 = vsel %vm2479_vm13, %v2480_v12, %v2478_v15  ;;  %v5495_v12 = vpack.c.bf16 %v2660_v6, %v2658_v5  ;;  %v2657_v15 = vld [vmem:[#allocation17 + $0x40] sm:$0xff] }
 0xa77   :  { %2493 = vrot.lane.b32.xlu0 %v2481_v10, %s7123_s1  ;;  %v2659_v10 = vld [vmem:[#allocation17 + $0x50] sm:$0xff] }
 0xa78   :  { %v5497_v11 = vpack.c.bf16 %v2659_v10, %v2657_v15  ;;  %v4982_v15 = vld [vmem:[%s7080_s17 + $0x1] ss:$0 sm:$0xff] }
 0xa7b   :  { %766 = vrot.lane.b32.xlu0 %v6372_v40, %s6017_s18  ;;  %v2485_v40 = vld [vmem:[#allocation14 + $0x30] sm:$0xff] }
 0xa7f   :  { %1855 = vrot.lane.b32.xlu0 %v6616_v2, %s7123_s1  ;;  %v5493_v2 = vpack.c.bf16 %v2486_v38, %v2485_v40 }
 0xa83   :  { %2449 = vrot.lane.b32.xlu0 %v2442_v53, %s7123_s1 }
 0xaac   :  { %v699_v23 = vpop.xlane.xlu1 %698 }
 0xaad   :  { %v700_v27 = vrot.slane %v699_v23, 4 }
 0xaaf   :  { %v701_v33 = vadd.f32 %v700_v27, %v699_v23  ;;  %v2661_v27 = vld [vmem:[#allocation17 + $0x60] sm:$0xff] }
 0xab1   :  { %v702_v9 = vrot.slane %v701_v33, 2 }
 0xab3   :  { %v703_v0 = vadd.f32 %v702_v9, %v701_v33  ;;  %v2663_v33 = vld [vmem:[#allocation17 + $0x70] sm:$0xff] }
 0xab5   :  { %v704_v49 = vrot.slane %v703_v0, 1 }
 0xab7   :  { %v705_v25 = vadd.f32 %v704_v49, %v703_v0 }
 0xab9   :  { %5658 = vpush %v705_v25 }
 0xae9   :  { %v2494_v61 = vpop.permute.xlu0 %2493 }
 0xaea   :  { %5233 = vmatmul.mubr.msk.f32.vlgmr.msra.gmra.mrb[22].mxu1 %vm952_vm9, %v2494_v61  ;;  %s5659_s4 = spop %5658 }
 0xaeb   :  { %5491 = vmatpush3.bf16.msra.mxu1 %v5490_v59  ;;  %5243 = vmatprep.mubr.msk.f32.mxu1 %vm6011_vm6, %v7122_v56  ;;  %v707_v25 = vstv %s5659_s4 }
 0xaec   :  { %5492 = vmatprep.subr.bf16.mxu1 %v6012_v24 }
 0xaed   :  { %v767_v53 = vpop.permute.xlu0 %766 }
 0xaee   :  { %v771_v63 = vsel %vm694_vm11, %v767_v53, 0.0  ;;  %vm708_vm11 = vcmp.gt.f32.partialorder %v707_v25, 0.0 }
 0xaef   :  { %5494 = vmatpush3.bf16.msra.mxu1 %v5493_v2  ;;  %v772_v8 = vadd.f32 %v771_v63, %v770_v55  ;;  %v4947_v55 = vsel %vm708_vm11, 1.0, %v7122_v56 }
 0xaf0   :  { %5496 = vmatprep.subr.bf16.mxu1 %v5495_v12 }
 0xaf1   :  { %773 = vadd.xlane.f32.xlu0 %v772_v8  ;;  %v1856_v42 = vpop.permute.xlu0 %1855 }
 0xaf2   :  { %5244 = vmatmul.mubr.msk.f32.vlgmr.msra.gmra.mrb[24].mxu1 %vm952_vm9, %v6665_v60  ;;  %v1857_v7 = vsel %vm952_vm9, %v1854_v35, %v1856_v42  ;;  %v2664_v35 = vld [vmem:[#allocation17 + $0x78] sm:$0xff] }
 0xaf3   :  { %2745 = vmatprep.mubr.f32.mxu1 %v7122_v56  ;;  %v1859_v47 = vmul.f32 %v1857_v7, %v6614_v29  ;;  %5498 = vmatpush1.bf16.msra.mxu1 %v5497_v11  ;;  %v5501_v29 = vpack.c.bf16 %v2663_v33, %v2661_v27 }
 0xaf5   :  { %v2450_v57 = vpop.permute.xlu0 %2449 }
 0xaf6   :  { %v2451_v34 = vsel %vm952_vm9, %v2448_v21, %v2450_v57  ;;  %v2662_v21 = vld [vmem:[#allocation17 + $0x68] sm:$0xff]  ;;  %v711_v57 = vmul.f32 %v4947_v55, %v6333_v22 }
 0xaf7   :  { %v2453_v62 = vmul.f32 %v2451_v34, %v6694_v54  ;;  %v5499_v23 = vpack.c.bf16 %v2664_v35, %v2662_v21 }
 0xaf9   :  { %2455 = vrot.lane.b32.xlu1 %v2453_v62, %s6015_s3  ;;  %5500 = vmatprep.subr.bf16.mxu1 %v5499_v23 }
 0xafa   :  { %5502 = vmatpush1.bf16.msra.mxu1 %v5501_v29 }
 0xafb   :  { %5503 = vmatprep.subr.bf16.mxu1 %v6012_v24 }
 0xafd   :  { %1865 = vrot.lane.b32.xlu1 %v1859_v47, %s6016_s8 }
 0xb07   :  { %1861 = vrot.lane.b32.xlu0 %v1859_v47, %s6015_s3 }
 0xb0b   :  { %2459 = vrot.lane.b32.xlu0 %v2453_v62, %s6016_s8 }
 0xb6b   :  { %v2456_v9 = vpop.permute.xlu1 %2455 }
 0xb6c   :  { %v2458_v61 = vadd.f32 %v2456_v9, %v2453_v62 }
 0xb6f   :  { %v1866_v38 = vpop.permute.xlu1 %1865 }
 0xb7e   :  { %v774_v0 = vpop.xlane.xlu0 %773 }
 0xb7f   :  { %v775_v49 = vrot.slane %v774_v0, 4 }
 0xb81   :  { %v776_v52 = vadd.f32 %v775_v49, %v774_v0  ;;  %v2850_v0 = vld [vmem:[#allocation8 + $0x20] sm:$0xff]  ;;  %v2851_v49 = vld [vmem:[#allocation8 + $0x28] sm:$0xff] }
 0xb82   :  { %v1862_v4 = vpop.permute.xlu0 %1861  ;;  %v5504_v25 = vpack.c.bf16 %v2851_v49, %v2850_v0 }
 0xb83   :  { %v777_v59 = vrot.slane %v776_v52, 2  ;;  %v1864_v40 = vadd.f32 %v1862_v4, %v1859_v47  ;;  %v2852_v4 = vld [vmem:[#allocation8 + $0x30] sm:$0xff] }
 0xb85   :  { %v1868_v2 = vadd.f32 %v1866_v38, %v1864_v40  ;;  %v778_v53 = vadd.f32 %v777_v59, %v776_v52  ;;  %v4984_v52 = vld [vmem:[%s7082_s19 + $0x2] sm:$0x3] }
 0xb86   :  { %v2460_v63 = vpop.permute.xlu0 %2459  ;;  %v2853_v59 = vld [vmem:[#allocation8 + $0x38] sm:$0xff]  ;;  %v2671_v38 = vrot.slane %v4984_v52, %v6477_v41 }
 0xb87   :  { %v2462_v8 = vadd.f32 %v2460_v63, %v2458_v61  ;;  %2154 = vrot.lane.b32.xlu1 %v1868_v2, %s6015_s3  ;;  %v779_v42 = vrot.slane %v778_v53, 1  ;;  %v5507_v40 = vpack.c.bf16 %v2853_v59, %v2852_v4  ;;  %v2952_v59 = vld [vmem:[#allocation11 + $0x148] sm:$0xff] }
 0xb89   :  { %2753 = vrot.lane.b32.xlu0 %v2462_v8, %s6015_s3  ;;  %v780_v34 = vadd.f32 %v779_v42, %v778_v53 }
 0xb8b   :  { %5660 = vpush %v780_v34  ;;  %2166 = vperm.xlu1 %5704, %v711_v57  }
 0xbbc   :  { %s5661_s9 = spop %5660 }
 0xbbd   :  { %v782_v7 = vstv %s5661_s9  ;;  %v2563_v47 = vpop.f32.mrb[22].mxu1 }
 0xbbe   :  { %vm783_vm14 = vcmp.gt.f32.partialorder %v782_v7, 0.0  ;;  %v5234_v62 = vpop.f32.mrb[23].mxu1 }
 0xbbf   :  { %v4950_v5 = vsel %vm783_vm14, 1.0, %v7122_v56 }
 0xbc0   :  { %v786_v6 = vmul.f32 %v4950_v5, %v6333_v22 }
 0xbc2   :  { %2765 = vperm.xlu0 %5705, %v786_v6  }
 0xbc5   :  { %v2636_v12 = vpop.f32.mrb[24].mxu1 }
 0xbc6   :  { %v2637_v10 = vadd.f32 %v2636_v12, %v2563_v47  ;;  %v5245_v11 = vpop.f32.mrb[25].mxu1 }
 0xbc8   :  { %v2648_v21 = vadd.f32 %v4982_v15, %v2637_v10 }
 0xbca   :  { %v4983_v35 = vmul.f32 -1.442695, %v2648_v21 }
 0xbcc   :  { %5735 = vpow2.f32 %v4983_v35 }
 0xbd6   :  { %v5736_v23 = vpop.eup %5735 }
 0xbd7   :  { %v2652_v27 = vadd.f32 1.0, %v5736_v23 }
 0xbd9   :  { %5737 = vrcp.f32 %v2652_v27 }
 0xbe3   :  { %v5738_v33 = vpop.eup %5737 }
 0xbe4   :  { %v2655_v29 = vmul.f32 %v5738_v33, %v2648_v21 }
 0xbe6   :  { %4985 = vmatmul.mubr.msk.f32.vlgmr.msra.gmra.mrb[26].mxu1 %vm952_vm9, %v2655_v29  ;;  %v2950_v29 = vld [vmem:[#allocation11 + $0x138] sm:$0xff] }
 0xbe7   :  { %5259 = vmatprep.mubr.msk.f32.mxu1 %vm6011_vm6, %v7122_v56  ;;  %5505 = vmatpush3.bf16.msra.mxu1 %v5504_v25  ;;  %v2945_v25 = vld [vmem:[#allocation11 + $0x110] sm:$0xff] }
 0xbe8   :  { %5506 = vmatprep.subr.bf16.mxu1 %v6012_v24 }
 0xbeb   :  { %5508 = vmatpush3.bf16.msra.mxu1 %v5507_v40  ;;  %v2956_v40 = vld [vmem:[#allocation11 + $0x168] sm:$0xff] }
 0xbf9   :  { %v2155_v22 = vpop.permute.xlu1 %2154 }
 0xbfa   :  { %v2157_v9 = vmul.f32 %v2155_v22, %v6685_v48  ;;  %v2947_v22 = vld [vmem:[#allocation11 + $0x120] sm:$0xff] }
 0xbfb   :  { %v2754_v53 = vpop.permute.xlu0 %2753 }
 0xbfc   :  { %2159 = vrot.lane.b32.xlu1 %v2157_v9, %s7123_s1 }
 0xc0a   :  { %v6753_v8 = vpop.permute.xlu1 %2166 }
 0xc0b   :  { %v2173_v34 = vmul.f32 %v6692_v1, %v6753_v8  ;;  %v2675_v1 = vrot.slane %v4984_v52, %v6468_v37  ;;  %v2949_v52 = vld [vmem:[#allocation11 + $0x130] sm:$0xff] }
 0xc0c   :  { %v5527_v4 = vpack.c.bf16 %v2949_v52, %v2945_v25  ;;  %v2969_v25 = vld [vmem:[#allocation11 + $0x1d0] sm:$0xff] }
 0xc0d   :  { %v2973_v52 = vld [vmem:[#allocation11 + $0x1f0] sm:$0xff] }
 0xc41   :  { %v6757_v57 = vpop.permute.xlu0 %2765 }
 0xcb9   :  { %v2747_v61 = vpop.f32.mrb[26].mxu1 }
 0xcba   :  { %v2748_v48 = vadd.f32 %v2747_v61, %v2671_v38  ;;  %v2749_v2 = vpop.f32.mrb[27].mxu1  ;;  %v2954_v38 = vld [vmem:[#allocation11 + $0x158] sm:$0xff]  ;;  %v5513_v61 = vpack.c.bf16 %v2956_v40, %v2952_v59 }
 0xcbb   :  { %v2750_v15 = vadd.f32 %v2749_v2, %v2675_v1  ;;  %v2951_v2 = vld [vmem:[#allocation11 + $0x140] sm:$0xff] }
 0xcbc   :  { %v2770_v55 = vmul.f32 %v2748_v48, %v6694_v54  ;;  %v2756_v63 = vmul.f32 %v2754_v53, %v2748_v48  ;;  %v2076_v54 = vrot.slane %v6681_v14, %v6468_v37  ;;  %v2948_v14 = vld [vmem:[#allocation11 + $0x128] sm:$0xff]  ;;  %v2958_v48 = vld [vmem:[#allocation11 + $0x178] sm:$0xff]  ;;  %v2955_v53 = vld [vmem:[#allocation11 + $0x160] sm:$0xff] }
 0xcbd   :  { %v4995_v59 = vld [vmem:[%s7075_s12 + $0x48] sm:$0xff] }
 0xcbe   :  { %v2771_v42 = vadd.f32 %v2770_v55, %v6670_v16  ;;  %2758 = vrot.lane.b32.xlu1 %v2756_v63, %s7123_s1  ;;  %v2160_v16 = vpop.permute.xlu1 %2159  ;;  %v2151_v5 = vadd.f32 %v6687_v50, %v2076_v54  ;;  %v2946_v50 = vld [vmem:[#allocation11 + $0x118] sm:$0xff]  ;;  %v5529_v55 = vpack.c.bf16 %v2958_v48, %v2954_v38  ;;  %v5515_v63 = vpack.c.bf16 %v2955_v53, %v2951_v2  ;;  %v2964_v54 = vld [vmem:[#allocation11 + $0x1a8] sm:$0xff] }
 0xcbf   :  { %v2162_v62 = vadd.f32 %v2160_v16, %v6606_v17  ;;  %v2944_v17 = vld [vmem:[#allocation11 + $0x108] sm:$0xff]  ;;  %v5525_v0 = vpack.c.bf16 %v2950_v29, %v2946_v50  ;;  %v2970_v50 = vld [vmem:[#allocation11 + $0x1d8] sm:$0xff] }
 0xcc0   :  { %v2772_v7 = vmul.f32 %v2771_v42, %v6757_v57  ;;  %v5509_v33 = vpack.c.bf16 %v2948_v14, %v2944_v17  ;;  %v2953_v42 = vld [vmem:[#allocation11 + $0x150] sm:$0xff]  ;;  %v2960_v16 = vld [vmem:[#allocation11 + $0x188] sm:$0xff]  ;;  %v2974_v29 = vld [vmem:[#allocation11 + $0x1f8] sm:$0xff] }
 0xcc1   :  { %v2163_v12 = vadd.f32 %v2162_v62, %v2151_v5  ;;  %5526 = vmatprep.subr.bf16.mxu1 %v5525_v0  ;;  %v2962_v62 = vld [vmem:[#allocation11 + $0x198] sm:$0xff]  ;;  %v5517_v1 = vpack.c.bf16 %v2964_v54, %v2960_v16  ;;  %v2968_v17 = vld [vmem:[#allocation11 + $0x1c8] sm:$0xff]  ;;  %v5537_v0 = vpack.c.bf16 %v2974_v29, %v2970_v50 }
 0xcc2   :  { %v6762_v47 = vadd.f32 %v2772_v7, %v2173_v34  ;;  %v2957_v34 = vld [vmem:[#allocation11 + $0x170] sm:$0xff]  ;;  %v2966_v5 = vld [vmem:[#allocation11 + $0x1b8] sm:$0xff]  ;;  %v2972_v14 = vld [vmem:[#allocation11 + $0x1e8] sm:$0xff] }
 0xcc3   :  { %v2169_v21 = vmul.f32 %v6753_v8, %v2163_v12  ;;  %v5531_v7 = vpack.c.bf16 %v2957_v34, %v2953_v42  ;;  %v2963_v12 = vld [vmem:[#allocation11 + $0x1a0] sm:$0xff]  ;;  %v4997_v38 = vld [vmem:[%s7075_s12 + $0x58] sm:$0xff]  ;;  %v4988_v53 = vld [vmem:[#allocation10 + $0x1] ss:$0 sm:$0xff] }
 0xcc4   :  { %5246 = vmatprep.subr.mxu0 %v6762_v47  ;;  %v4999_v40 = vld [vmem:[%s7075_s12 + $0x68] sm:$0xff]  ;;  %v5001_v48 = vld [vmem:[%s7075_s12 + $0x78] sm:$0xff]  ;;  %v4994_v54 = vld [vmem:[%s7075_s12 + $0x40] sm:$0xff] }
 0xcc5   :  { %5247 = vmatpush3.msra.mxu0 %v6762_v47  ;;  %v5545_v2 = vpack.c.bf16 %v5001_v48, %v4997_v38 }
 0xcc6   :  { %5249 = vmatmul.mubr.msk.f32.vlgmr.msra.gmra.mrb[28].mxu0 %vm265_vm0, %v6340_v26  ;;  %5510 = vmatprep.subr.bf16.mxu0 %v5509_v33  ;;  %v5521_v33 = vpack.c.bf16 %v2972_v14, %v2968_v17 }
 0xcc7   :  { %3065 = vmatprep.mubr.f32.mxu0 %v7122_v56 }
 0xd30   :  { %v2759_v6 = vpop.permute.xlu1 %2758 }
 0xd31   :  { %v2761_v10 = vadd.f32 %v2759_v6, %v6665_v60  ;;  %v2943_v60 = vld [vmem:[#allocation11 + $0x100] sm:$0xff] }
 0xd32   :  { %v5511_v49 = vpack.c.bf16 %v2947_v22, %v2943_v60  ;;  %v2959_v6 = vld [vmem:[#allocation11 + $0x180] sm:$0xff] }
 0xd33   :  { %v2762_v11 = vadd.f32 %v2761_v10, %v2750_v15  ;;  %v5533_v15 = vpack.c.bf16 %v2966_v5, %v2962_v62  ;;  %v5519_v10 = vpack.c.bf16 %v2963_v12, %v2959_v6  ;;  %v2967_v60 = vld [vmem:[#allocation11 + $0x1c0] sm:$0xff]  ;;  %v4998_v62 = vld [vmem:[%s7075_s12 + $0x60] sm:$0xff] }
 0xd34   :  { %5512 = vmatpush1.bf16.msra.mxu0 %v5511_v49  ;;  %v2971_v22 = vld [vmem:[#allocation11 + $0x1e0] sm:$0xff]  ;;  %v5543_v12 = vpack.c.bf16 %v4998_v62, %v4994_v54 }
 0xd35   :  { %v2768_v35 = vmul.f32 %v6757_v57, %v2762_v11  ;;  %5514 = vmatprep.subr.bf16.mxu0 %v5513_v61  ;;  %v2961_v11 = vld [vmem:[#allocation11 + $0x190] sm:$0xff]  ;;  %v5523_v49 = vpack.c.bf16 %v2971_v22, %v2967_v60  ;;  %v5541_v61 = vpack.c.bf16 %v4999_v40, %v4995_v59  ;;  %v5000_v5 = vld [vmem:[%s7075_s12 + $0x70] sm:$0xff] }
 0xd37   :  { %v6777_v23 = vadd.f32 %v2768_v35, %v2169_v21  ;;  %v2965_v21 = vld [vmem:[#allocation11 + $0x1b0] sm:$0xff] }
 0xd38   :  { %5516 = vmatpush1.bf16.msra.mxu0 %v5515_v63  ;;  %v5535_v35 = vpack.c.bf16 %v2965_v21, %v2961_v11  ;;  %v4991_v11 = vld [vmem:[%s7074_s11 + $0x4] sm:$0xf] }
 0xd39   :  { %5260 = vmatmul.mubr.msk.f32.vlgmr.msra.gmra.mrb[28].mxu1 %vm952_vm9, %v6777_v23  ;;  %5518 = vmatprep.subr.bf16.mxu0 %v5517_v1  ;;  %v4996_v1 = vld [vmem:[%s7075_s12 + $0x50] sm:$0xff]  ;;  %v2993_v21 = vrot.slane %v4991_v11, %v6471_v39  ;;  %v2981_v17 = vrot.slane %v4991_v11, %v6477_v41 }
 0xd3a   :  { %3136 = vmatprep.mubr.f32.mxu1 %v7122_v56  ;;  %5528 = vmatpush1.bf16.msra.mxu1 %v5527_v4  ;;  %v5539_v4 = vpack.c.bf16 %v2973_v52, %v2969_v25 }
 0xd3b   :  { %5530 = vmatprep.subr.bf16.mxu1 %v5529_v55 }
 0xd3c   :  { %5520 = vmatpush1.bf16.msra.mxu0 %v5519_v10 }
 0xd3d   :  { %5522 = vmatprep.subr.bf16.mxu0 %v5521_v33 }
 0xd3e   :  { %5532 = vmatpush1.bf16.msra.mxu1 %v5531_v7 }
 0xd3f   :  { %5534 = vmatprep.subr.bf16.mxu1 %v5533_v15  ;;  %v5547_v15 = vpack.c.bf16 %v5000_v5, %v4996_v1 }
 0xd40   :  { %5524 = vmatpush1.bf16.msra.mxu0 %v5523_v49 }
 0xd41   :  { %5542 = vmatprep.subr.bf16.mxu0 %v5541_v61 }
 0xd42   :  { %5536 = vmatpush1.bf16.msra.mxu1 %v5535_v35  ;;  %v5002_v35 = vld [vmem:[%s7076_s13 + $0x4] sm:$0xf] }
 0xd43   :  { %5538 = vmatprep.subr.bf16.mxu1 %v5537_v0  ;;  %v3166_v60 = vrot.slane %v5002_v35, %v6480_v43  ;;  %v3162_v49 = vrot.slane %v5002_v35, %v6468_v37  ;;  %v3170_v25 = vrot.slane %v5002_v35, %v6471_v39 }
 0xd46   :  { %5540 = vmatpush1.bf16.msra.mxu1 %v5539_v4 }
 0xd47   :  { %5546 = vmatprep.subr.bf16.mxu1 %v5545_v2 }
 0xd99   :  { %v6782_v27 = vpop.f32.mrb[28].mxu0 }
 0xd9a   :  { %v6784_v9 = vpop.f32.mrb[29].mxu0 }
 0xe0c   :  { %v2931_v55 = vpop.f32.mrb[28].mxu1 }
 0xe0d   :  { %v2932_v63 = vadd.f32 %v4988_v53, %v2931_v55  ;;  %v5261_v42 = vpop.f32.mrb[29].mxu1 }
 0xe0f   :  { %v4990_v34 = vmul.f32 -1.442695, %v2932_v63 }
 0xe11   :  { %5739 = vpow2.f32 %v4990_v34 }
 0xe1b   :  { %v5740_v7 = vpop.eup %5739 }
 0xe1c   :  { %v2938_v16 = vadd.f32 1.0, %v5740_v7 }
 0xe1e   :  { %5741 = vrcp.f32 %v2938_v16 }
 0xe28   :  { %v5742_v6 = vpop.eup %5741 }
 0xe29   :  { %v2941_v10 = vmul.f32 %v5742_v6, %v2932_v63 }
 0xe2b   :  { %4992 = vmatmul.mubr.msk.f32.vlgmr.msra.gmra.mrb[30].mxu0 %vm1087_vm4, %v2941_v10  ;;  %4993 = vmatmul.mubr.msk.f32.vlgmr.msra.gmra.mrb[30].mxu1 %vm1087_vm4, %v2941_v10 }
 0xe2c   :  { %5544 = vmatpush1.bf16.msra.mxu0 %v5543_v12  ;;  %5548 = vmatpush1.bf16.msra.mxu1 %v5547_v15 }
 0xe2d   :  { %3239 = vmatprep.mubr.f32.mxu0 %v7122_v56  ;;  %3316 = vmatprep.mubr.f32.mxu1 %v7122_v56 }
 0xe2f   :  { %5003 = vmatmul.mubr.msk.f32.vlgmr.msra.gmra.mrb[32].mxu0 %vm1263_vm7, %v6448_v31  ;;  %5005 = vmatmul.mubr.msk.f32.vlgmr.msra.gmra.mrb[32].mxu1 %vm1263_vm7, %v6448_v31  ;;  %v2985_v31 = vrot.slane %v4991_v11, %v6468_v37 }
 0xe30   :  { %3245 = vmatprep.mubr.f32.mxu0 %v7122_v56  ;;  %3322 = vmatprep.mubr.f32.mxu1 %v7122_v56 }
 0xe33   :  { %5004 = vmatmul.mubr.msk.f32.gmra.mrb[34].mxu0 %vm1263_vm7, %v6456_v32  ;;  %5006 = vmatmul.mubr.msk.f32.gmra.mrb[34].mxu1 %vm1263_vm7, %v6456_v32  ;;  %v2989_v32 = vrot.slane %v4991_v11, %v6480_v43 }
 0xe34   :  { %3401 = vmatprep.mubr.f32.mxu0 %v7122_v56  ;;  %3478 = vmatprep.mubr.f32.mxu1 %v7122_v56 }
 0xefe   :  { %v3067_v14 = vpop.f32.mrb[30].mxu0  ;;  %v3138_v50 = vpop.f32.mrb[30].mxu1 }
 0xeff   :  { %v3069_v33 = vpop.f32.mrb[31].mxu0  ;;  %v3140_v29 = vpop.f32.mrb[31].mxu1  ;;  %v3068_v52 = vadd.f32 %v3067_v14, %v2981_v17  ;;  %v3139_v4 = vadd.f32 %v3138_v50, %v2989_v32 }
 0xf00   :  { %v3070_v22 = vadd.f32 %v3069_v33, %v2985_v31  ;;  %v3141_v0 = vadd.f32 %v3140_v29, %v2993_v21 }
 0xf02   :  { %v3241_v59 = vpop.f32.mrb[32].mxu0  ;;  %v3318_v40 = vpop.f32.mrb[32].mxu1  ;;  %3337 = vmatprep.subr.mxu0 %v3070_v22  ;;  %3414 = vmatprep.subr.mxu1 %v3141_v0 }
 0xf03   :  { %v3319_v38 = vadd.f32 %v3318_v40, %v3166_v60  ;;  %v3243_v61 = vpop.f32.mrb[33].mxu0  ;;  %v3320_v48 = vpop.f32.mrb[33].mxu1  ;;  %3338 = vmatpush1.msra.mxu0 %v3068_v52  ;;  %3415 = vmatpush1.msra.mxu1 %v3139_v4  ;;  %v3658_v4 = vld [vmem:[#allocation13 + $0x190] sm:$0xff]  ;;  %v3663_v40 = vld [vmem:[#allocation13 + $0x1b8] sm:$0xff] }
 0xf04   :  { %v3244_v2 = vadd.f32 %v3243_v61, %v3162_v49  ;;  %v3321_v53 = vadd.f32 %v3320_v48, %v3170_v25  ;;  %5007 = vmatmul.mubr.msk.f32.vlgmr.msra.gmra.mrb[36].mxu0 %vm265_vm0, %v6325_v19  ;;  %5009 = vmatmul.mubr.msk.f32.vlgmr.msra.gmra.mrb[36].mxu1 %vm265_vm0, %v6325_v19  ;;  %v3158_v19 = vrot.slane %v5002_v35, %v6477_v41  ;;  %v3660_v48 = vld [vmem:[#allocation13 + $0x1a0] sm:$0xff] }
 0xf05   :  { %3407 = vmatprep.mubr.f32.mxu0 %v7122_v56  ;;  %3484 = vmatprep.mubr.f32.mxu1 %v7122_v56  ;;  %v3331_v1 = vmul.f32 %v3319_v38, %v6516_v46 }
 0xf06   :  { %v3247_v39 = vpop.f32.mrb[34].mxu0  ;;  %v3324_v43 = vpop.f32.mrb[34].mxu1  ;;  %5549 = vmatprep.subr.bf16.mxu0 %v6012_v24  ;;  %v3242_v16 = vadd.f32 %v3241_v59, %v3158_v19  ;;  %v3330_v12 = vmul.f32 %v3244_v2, %v6519_v51  ;;  %v3332_v15 = vmul.f32 %v3321_v53, %v6521_v30  ;;  %v3661_v59 = vld [vmem:[#allocation13 + $0x1a8] sm:$0xff]  ;;  %v3662_v2 = vld [vmem:[#allocation13 + $0x1b0] sm:$0xff] }
 0xf07   :  { %v3325_v55 = vadd.f32 %v3324_v43, %v3166_v60  ;;  %v3249_v63 = vpop.f32.mrb[35].mxu0  ;;  %v3326_v42 = vpop.f32.mrb[35].mxu1  ;;  %v3248_v54 = vadd.f32 %v3247_v39, %v3158_v19  ;;  %v5559_v61 = vpack.c.bf16 %v3663_v40, %v3661_v59  ;;  %v3665_v53 = vld [vmem:[#allocation13 + $0x1c8] sm:$0xff]  ;;  %v3667_v39 = vld [vmem:[#allocation13 + $0x1d8] sm:$0xff]  ;;  %v5561_v43 = vpack.c.bf16 %v3662_v2, %v3660_v48  ;;  %v3799_v2 = vld [vmem:[#allocation16 + $0x50] sm:$0xff] }
 0xf08   :  { %v3250_v34 = vadd.f32 %v3249_v63, %v3162_v49  ;;  %v3327_v7 = vadd.f32 %v3326_v42, %v3170_v25  ;;  %5008 = vmatmul.mubr.msk.f32.gmra.mrb[38].mxu0 %vm265_vm0, %v6340_v26  ;;  %5010 = vmatmul.mubr.msk.f32.gmra.mrb[38].mxu1 %vm265_vm0, %v6340_v26  ;;  %v3329_v62 = vmul.f32 %v3242_v16, %v6514_v45  ;;  %v3659_v49 = vld [vmem:[#allocation13 + $0x198] sm:$0xff]  ;;  %v3656_v25 = vld [vmem:[#allocation13 + $0x180] sm:$0xff]  ;;  %v3666_v42 = vld [vmem:[#allocation13 + $0x1d0] sm:$0xff] }
 0xf09   :  { %5266 = vmatprep.mubr.msk.f32.mxu0 %vm6011_vm6, %v7122_v56  ;;  %3747 = vmatprep.mubr.f32.mxu1 %v7122_v56  ;;  %v3333_v45 = vmul.f32 %v3248_v54, %v6530_v58  ;;  %v3335_v46 = vmul.f32 %v3325_v55, %v6536_v3  ;;  %v5557_v38 = vpack.c.bf16 %v3658_v4, %v3656_v25  ;;  %v3664_v63 = vld [vmem:[#allocation13 + $0x1c0] sm:$0xff]  ;;  %v3798_v48 = vld [vmem:[#allocation16 + $0x48] sm:$0xff] }
 0xf0a   :  { %v3334_v32 = vmul.f32 %v3250_v34, %v6542_v13  ;;  %v3336_v14 = vmul.f32 %v3327_v7, %v6422_v20  ;;  %v3657_v20 = vld [vmem:[#allocation13 + $0x188] sm:$0xff]  ;;  %v5563_v55 = vpack.c.bf16 %v3667_v39, %v3665_v53  ;;  %v3671_v7 = vld [vmem:[#allocation13 + $0x1f8] sm:$0xff]  ;;  %v5565_v19 = vpack.c.bf16 %v3666_v42, %v3664_v63  ;;  %v3668_v54 = vld [vmem:[#allocation13 + $0x1e0] sm:$0xff] }
 0xf0b   :  { %v5555_v52 = vpack.c.bf16 %v3659_v49, %v3657_v20  ;;  %v3669_v34 = vld [vmem:[#allocation13 + $0x1e8] sm:$0xff]  ;;  %v3678_v20 = vld [vmem:[#allocation13 + $0x230] sm:$0xff]  ;;  %v3800_v39 = vld [vmem:[#allocation16 + $0x58] sm:$0xff] }
 0xf0c   :  { %v5567_v16 = vpack.c.bf16 %v3671_v7, %v3669_v34 }
 0xf0d   :  { %5556 = vmatprep.subr.bf16.mxu1 %v5555_v52 }
 0xf0e   :  { %5558 = vmatpush1.bf16.msra.mxu1 %v5557_v38 }
 0xf0f   :  { %5560 = vmatprep.subr.bf16.mxu1 %v5559_v61  ;;  %v3797_v61 = vld [vmem:[#allocation16 + $0x40] sm:$0xff] }
 0xf10   :  { %v5580_v53 = vpack.c.bf16 %v3798_v48, %v3797_v61  ;;  %v3970_v48 = vld [vmem:[#allocation17 + $0xa0] sm:$0xff] }
 0xf12   :  { %5562 = vmatpush1.bf16.msra.mxu1 %v5561_v43  ;;  %v5583_v43 = vpack.c.bf16 %v3800_v39, %v3799_v2  ;;  %v3972_v2 = vld [vmem:[#allocation17 + $0xb0] sm:$0xff]  ;;  %v4250_v39 = vld [vmem:[#allocation13 + $0x258] sm:$0xff] }
 0xf13   :  { %5564 = vmatprep.subr.bf16.mxu1 %v5563_v55 }
 0xf16   :  { %5566 = vmatpush1.bf16.msra.mxu1 %v5565_v19 }
 0xf17   :  { %5568 = vmatprep.subr.bf16.mxu1 %v5567_v16 }
 0xfd7   :  { %v3403_v5 = vpop.f32.mrb[36].mxu0  ;;  %v3480_v6 = vpop.f32.mrb[36].mxu1 }
 0xfd8   :  { %v3491_v26 = vmul.f32 %v3403_v5, %v3329_v62  ;;  %v6858_v10 = vmul.f32 %v3480_v6, %v3331_v1  ;;  %v3405_v11 = vpop.f32.mrb[37].mxu0  ;;  %v3482_v31 = vpop.f32.mrb[37].mxu1  ;;  %v3670_v62 = vld [vmem:[#allocation13 + $0x1f0] sm:$0xff]  ;;  %v3673_v1 = vld [vmem:[#allocation13 + $0x208] sm:$0xff]  ;;  %v3675_v5 = vld [vmem:[#allocation13 + $0x218] sm:$0xff] }
 0xfd9   :  { %v6860_v21 = vmul.f32 %v3405_v11, %v3330_v12  ;;  %v6862_v35 = vmul.f32 %v3482_v31, %v3332_v15  ;;  %v5569_v6 = vpack.c.bf16 %v3670_v62, %v3668_v54  ;;  %v5571_v12 = vpack.c.bf16 %v3675_v5, %v3673_v1  ;;  %v3672_v15 = vld [vmem:[#allocation13 + $0x200] sm:$0xff]  ;;  %v3677_v11 = vld [vmem:[#allocation13 + $0x228] sm:$0xff]  ;;  %v3679_v31 = vld [vmem:[#allocation13 + $0x238] sm:$0xff] }
 0xfda   :  { %3503 = vrot.lane.b32.xlu0 %v3491_v26, %s6015_s3 }
 0xfdb   :  { %v6869_v51 = vmul.f32 %v6860_v21, %v6784_v9  ;;  %v3409_v30 = vpop.f32.mrb[38].mxu0  ;;  %v3486_v17 = vpop.f32.mrb[38].mxu1  ;;  %5570 = vmatpush1.bf16.msra.mxu1 %v5569_v6 }
 0xfdc   :  { %v3495_v50 = vmul.f32 %v3409_v30, %v3333_v45  ;;  %v6873_v33 = vmul.f32 %v3486_v17, %v3335_v46  ;;  %v3411_v29 = vpop.f32.mrb[39].mxu0  ;;  %v3488_v60 = vpop.f32.mrb[39].mxu1  ;;  %5572 = vmatprep.subr.bf16.mxu1 %v5571_v12  ;;  %v5575_v46 = vpack.c.bf16 %v3679_v31, %v3677_v11  ;;  %v3793_v11 = vld [vmem:[#allocation14 + $0x48] sm:$0xff] }
 0xfdd   :  { %v6875_v22 = vmul.f32 %v3411_v29, %v3334_v32  ;;  %v6877_v58 = vmul.f32 %v3488_v60, %v3336_v14 }
 0xfde   :  { %v5550_v3 = vpack.c.bf16 %v3495_v50, %v3491_v26  ;;  %3505 = vrot.lane.b32.xlu1 %v3495_v50, %s6015_s3  ;;  %v3674_v26 = vld [vmem:[#allocation13 + $0x210] sm:$0xff] }
 0xfdf   :  { %v3500_v0 = vmul.f32 %v6782_v27, %v6875_v22  ;;  %v5706_v13 = vpack.i.bf16 %v6875_v22, %v6860_v21  ;;  %v5573_v45 = vpack.c.bf16 %v3674_v26, %v3672_v15  ;;  %v3792_v26 = vld [vmem:[#allocation14 + $0x40] sm:$0xff] }
 0xfe0   :  { %5551 = vmatpush3.bf16.msra.mxu0 %v5550_v3  ;;  %v3676_v3 = vld [vmem:[#allocation13 + $0x220] sm:$0xff]  ;;  %v5586_v31 = vpack.c.bf16 %v3793_v11, %v3792_v26 }
 0xfe1   :  { %5552 = vmatprep.subr.bf16.mxu0 %v6012_v24  ;;  %5574 = vmatpush1.bf16.msra.mxu1 %v5573_v45  ;;  %v5577_v49 = vpack.c.bf16 %v3678_v20, %v3676_v3  ;;  %v3794_v45 = vld [vmem:[#allocation14 + $0x50] sm:$0xff]  ;;  %v4093_v3 = vmul.f32 %v6873_v33, %v6593_v28 }
 0xfe2   :  { %5576 = vmatprep.subr.bf16.mxu1 %v5575_v46  ;;  %v3795_v46 = vld [vmem:[#allocation14 + $0x58] sm:$0xff] }
 0xfe3   :  { %5267 = vmatmul.mubr.msk.f32.vlgmr.msra.gmra.mrb[40].mxu0 %vm1263_vm7, %v6571_v18 }
 0xfe4   :  { %5273 = vmatprep.mubr.msk.f32.mxu0 %vm6011_vm6, %v7122_v56 }
 0xfe5   :  { %5578 = vmatpush1.bf16.msra.mxu1 %v5577_v49 }
 0xfe6   :  { %5599 = vmatprep.subr.bf16.mxu1 %v6012_v24 }
0x104c   :  { %v3504_v30 = vpop.permute.xlu0 %3503 }
0x104d   :  { %v3509_v17 = vmul.f32 %v3504_v30, %v6591_v44 }
0x104f   :  { %v3511_v50 = vadd.f32 %v3509_v17, %v6869_v51  ;;  %v5589_v17 = vpack.c.bf16 %v3795_v46, %v3794_v45  ;;  %v4251_v45 = vld [vmem:[#allocation13 + $0x260] sm:$0xff]  ;;  %v4253_v46 = vld [vmem:[#allocation13 + $0x270] sm:$0xff] }
0x1050   :  { %v3506_v32 = vpop.permute.xlu1 %3505 }
0x1051   :  { %v3510_v14 = vmul.f32 %v3506_v32, %v6593_v28  ;;  %v3967_v28 = vld [vmem:[#allocation17 + $0x88] sm:$0xff] }
0x1053   :  { %v3512_v29 = vadd.f32 %v3510_v14, %v3500_v0 }
0x1055   :  { %v5553_v60 = vpack.c.bf16 %v3512_v29, %v3511_v50 }
0x1057   :  { %5554 = vmatpush3.bf16.msra.mxu0 %v5553_v60  ;;  %v4092_v60 = vmul.f32 %v6858_v10, %v6591_v44 }
0x1058   :  { %5579 = vmatprep.subr.bf16.mxu0 %v6012_v24 }
0x105a   :  { %5274 = vmatmul.mubr.msk.f32.vlgmr.msra.gmra.mrb[42].mxu0 %vm1263_vm7, %v6571_v18 }
0x105b   :  { %5284 = vmatprep.mubr.msk.f32.mxu0 %vm6011_vm6, %v7122_v56  ;;  %5581 = vmatpush3.bf16.msra.mxu0 %v5580_v53  ;;  %v4248_v53 = vld [vmem:[#allocation13 + $0x248] sm:$0xff] }
0x105c   :  { %5582 = vmatprep.subr.bf16.mxu0 %v6012_v24 }
0x105f   :  { %5584 = vmatpush3.bf16.msra.mxu0 %v5583_v43  ;;  %v5605_v43 = vpack.c.bf16 %v4250_v39, %v4248_v53 }
0x1060   :  { %5585 = vmatprep.subr.bf16.mxu0 %v6012_v24 }
0x10b6   :  { %v6898_v25 = vpop.f32.mrb[40].mxu0 }
0x10b7   :  { %v5268_v51 = vpop.f32.mrb[41].mxu0 }
0x112d   :  { %v3650_v0 = vpop.f32.mrb[42].mxu0 }
0x112e   :  { %v3654_v52 = vadd.f32 %v3650_v0, %v6762_v47  ;;  %v5275_v4 = vpop.f32.mrb[43].mxu0  ;;  %v3968_v0 = vld [vmem:[#allocation17 + $0x90] sm:$0xff] }
0x112f   :  { %v3971_v4 = vld [vmem:[#allocation17 + $0xa8] sm:$0xff] }
0x1130   :  { %5013 = vmatmul.mubr.msk.f32.vlgmr.msra.gmra.mrb[40].mxu1 %vm1776_vm5, %v3654_v52 }
0x1131   :  { %5302 = vmatprep.mubr.msk.f32.mxu1 %vm6011_vm6, %v7122_v56 }
0x1203   :  { %v6904_v59 = vpop.f32.mrb[40].mxu1 }
0x1204   :  { %v6906_v40 = vpop.f32.mrb[41].mxu1  ;;  %v3772_v55 = vmul.f32 %v6904_v59, %v6904_v59 }
0x1205   :  { %v3773_v38 = vmul.f32 %v6906_v40, %v6906_v40 }
0x1207   :  { %3779 = vrot.lane.b32.xlu1 %v3773_v38, %s6016_s8  ;;  %3775 = vrot.lane.b32.xlu0 %v3773_v38, %s6015_s3  ;;  %v3973_v38 = vld [vmem:[#allocation17 + $0xb8] sm:$0xff] }
0x1208   :  { %v5595_v61 = vpack.c.bf16 %v3973_v38, %v3971_v4 }
0x120b   :  { %4078 = vrot.lane.b32.xlu1 %v6858_v10, %s7123_s1  ;;  %v3969_v10 = vld [vmem:[#allocation17 + $0x98] sm:$0xff] }
0x120f   :  { %4082 = vrot.lane.b32.xlu1 %v6873_v33, %s7123_s1  ;;  %v3966_v33 = vld [vmem:[#allocation17 + $0x80] sm:$0xff] }
0x1210   :  { %v5593_v52 = vpack.c.bf16 %v3968_v0, %v3966_v33  ;;  %v4265_v33 = vld [vmem:[#allocation13 + $0x2d0] sm:$0xff]  ;;  %v4268_v0 = vld [vmem:[#allocation13 + $0x2e8] sm:$0xff] }
0x1213   :  { %5707 = vrot.lane.b32.xlu1 %v5706_v13, %s7123_s1 }
0x1279   :  { %v3780_v63 = vpop.permute.xlu1 %3779  ;;  %v3776_v42 = vpop.permute.xlu0 %3775 }
0x127a   :  { %v3778_v34 = vadd.f32 %v3776_v42, %v3772_v55 }
0x127c   :  { %v3782_v21 = vadd.f32 %v3780_v63, %v3778_v34  ;;  %v5017_v34 = vld [vmem:[%s7080_s17 + $0x2] ss:$0 sm:$0xff] }
0x127d   :  { %v4079_v22 = vpop.permute.xlu1 %4078 }
0x127e   :  { %v3783_v13 = vadd.f32 1e-08, %v3782_v21 }
0x1280   :  { %5743 = vrsqrt.f32 %v3783_v13  ;;  %vm3786_vm4 = vcmp.eq.f32.partialorder %v3783_v13, inf  ;;  %v3789_v6 = vand.u32 2147483648, %v3783_v13  ;;  %vm3788_vm15 = vcmp.eq.f32.partialorder %v3783_v13, 0.0 }
0x1281   :  { %v4083_v7 = vpop.permute.xlu1 %4082 }
0x1285   :  { %v5708_v19 = vpop.permute.xlu1 %5707 }
0x1286   :  { %v5710_v16 = vunpack.i.h.bf16 %v5708_v19  ;;  %v5709_v54 = vunpack.i.l.bf16 %v5708_v19 }
0x1288   :  { %v5600_v62 = vpack.c.bf16 %v5710_v16, %v5709_v54 }
0x128a   :  { %v5744_v1 = vpop.eup %5743  ;;  %5601 = vmatpush3.bf16.msra.mxu1 %v5600_v62 }
0x128b   :  { %v3785_v5 = vmul.f32 %v5744_v1, %v3783_v13  ;;  %5602 = vmatprep.subr.bf16.mxu1 %v6012_v24  ;;  %v4247_v1 = vld [vmem:[#allocation13 + $0x240] sm:$0xff] }
0x128d   :  { %5303 = vmatmul.mubr.msk.f32.vlgmr.msra.gmra.mrb[42].mxu1 %vm1263_vm7, %v6571_v18  ;;  %v3787_v12 = vsel %vm3786_vm4, %v3783_v13, %v3785_v5  ;;  %v4249_v5 = vld [vmem:[#allocation13 + $0x250] sm:$0xff] }
0x128e   :  { %v3790_v15 = vsel %vm3788_vm15, %v3789_v6, %v3787_v12  ;;  %5309 = vmatprep.mubr.msk.f32.mxu1 %vm6011_vm6, %v7122_v56  ;;  %v4252_v6 = vld [vmem:[#allocation13 + $0x268] sm:$0xff]  ;;  %v4254_v12 = vld [vmem:[#allocation13 + $0x278] sm:$0xff]  ;;  %v5607_v26 = vpack.c.bf16 %v4249_v5, %v4247_v1 }
0x128f   :  { %3802 = vrot.lane.b32.xlu0 %v3790_v15, %s7123_s1 }
0x1293   :  { %4080 = vrot.lane.b32.xlu0 %v6862_v35, %s7123_s1 }
0x1297   :  { %4084 = vrot.lane.b32.xlu0 %v6877_v58, %s7123_s1  ;;  %v6941_v58 = vadd.f32 %v6898_v25, %v6777_v23 }
0x1301   :  { %v3803_v30 = vpop.permute.xlu0 %3802 }
0x1302   :  { %5285 = vmatmul.mubr.msk.f32.vlgmr.msra.gmra.mrb[44].mxu0 %vm952_vm9, %v3803_v30  ;;  %v4256_v30 = vld [vmem:[#allocation13 + $0x288] sm:$0xff] }
0x1303   :  { %5587 = vmatpush3.bf16.msra.mxu0 %v5586_v31  ;;  %5295 = vmatprep.mubr.msk.f32.mxu0 %vm6011_vm6, %v7122_v56  ;;  %v5609_v31 = vpack.c.bf16 %v4254_v12, %v4252_v6 }
0x1304   :  { %5588 = vmatprep.subr.bf16.mxu0 %v6012_v24 }
0x1305   :  { %v4081_v32 = vpop.permute.xlu0 %4080 }
0x1306   :  { %v4086_v35 = vsel %vm952_vm9, %v4079_v22, %v4081_v32  ;;  %v5611_v32 = vpack.c.bf16 %v4253_v46, %v4251_v45  ;;  %v4385_v46 = vld [vmem:[#allocation14 + $0x70] sm:$0xff] }
0x1307   :  { %5590 = vmatpush3.bf16.msra.mxu0 %v5589_v17  ;;  %v4090_v14 = vmul.f32 %v4086_v35, %v6784_v9  ;;  %v4258_v17 = vld [vmem:[#allocation13 + $0x298] sm:$0xff] }
0x1308   :  { %v5613_v35 = vpack.c.bf16 %v4258_v17, %v4256_v30  ;;  %v4386_v30 = vld [vmem:[#allocation14 + $0x78] sm:$0xff] }
0x1309   :  { %v4085_v50 = vpop.permute.xlu0 %4084  ;;  %v4094_v49 = vadd.f32 %v4092_v60, %v4090_v14  ;;  %v4255_v14 = vld [vmem:[#allocation13 + $0x280] sm:$0xff]  ;;  %v4262_v60 = vld [vmem:[#allocation13 + $0x2b8] sm:$0xff] }
0x130a   :  { %5296 = vmatmul.mubr.msk.f32.vlgmr.msra.gmra.mrb[46].mxu0 %vm952_vm9, %v6941_v58  ;;  %v4087_v29 = vsel %vm952_vm9, %v4083_v7, %v4085_v50  ;;  %v4257_v50 = vld [vmem:[#allocation13 + $0x290] sm:$0xff] }
0x130b   :  { %v4091_v20 = vmul.f32 %v6782_v27, %v4087_v29  ;;  %4054 = vmatprep.mubr.f32.mxu0 %v7122_v56  ;;  %v5591_v27 = vpack.c.bf16 %v3969_v10, %v3967_v28  ;;  %v4260_v29 = vld [vmem:[#allocation13 + $0x2a8] sm:$0xff] }
0x130d   :  { %v4095_v25 = vadd.f32 %v4093_v3, %v4091_v20  ;;  %5592 = vmatprep.subr.bf16.mxu0 %v5591_v27  ;;  %v5615_v3 = vpack.c.bf16 %v4257_v50, %v4255_v14  ;;  %v5617_v20 = vpack.c.bf16 %v4262_v60, %v4260_v29  ;;  %v4263_v27 = vld [vmem:[#allocation13 + $0x2c0] sm:$0xff] }
0x130e   :  { %5594 = vmatpush1.bf16.msra.mxu0 %v5593_v52  ;;  %v4270_v52 = vld [vmem:[#allocation13 + $0x2f8] sm:$0xff]  ;;  %v5623_v4 = vpack.c.bf16 %v4265_v33, %v4263_v27  ;;  %v4561_v33 = vld [vmem:[#allocation17 + $0xe0] sm:$0xff] }
0x130f   :  { %v5603_v51 = vpack.c.bf16 %v4095_v25, %v4094_v49  ;;  %5596 = vmatprep.subr.bf16.mxu0 %v5595_v61  ;;  %v4259_v49 = vld [vmem:[#allocation13 + $0x2a0] sm:$0xff]  ;;  %v4261_v25 = vld [vmem:[#allocation13 + $0x2b0] sm:$0xff]  ;;  %v5625_v38 = vpack.c.bf16 %v4270_v52, %v4268_v0 }
0x1310   :  { %v5619_v28 = vpack.c.bf16 %v4261_v25, %v4259_v49  ;;  %v4267_v61 = vld [vmem:[#allocation13 + $0x2e0] sm:$0xff]  ;;  %v4563_v0 = vld [vmem:[#allocation17 + $0xf0] sm:$0xff] }
0x1311   :  { %5604 = vmatpush3.bf16.msra.mxu1 %v5603_v51  ;;  %v4264_v51 = vld [vmem:[#allocation13 + $0x2c8] sm:$0xff]  ;;  %v4557_v25 = vld [vmem:[#allocation17 + $0xc0] sm:$0xff]  ;;  %v5647_v52 = vpack.c.bf16 %v4563_v0, %v4561_v33 }
0x1312   :  { %5629 = vmatprep.subr.bf16.mxu1 %v6012_v24 }
0x1314   :  { %5310 = vmatmul.mubr.msk.f32.vlgmr.msra.gmra.mrb[44].mxu1 %vm1263_vm7, %v6571_v18  ;;  %v5597_v18 = vpack.c.bf16 %v3972_v2, %v3970_v48  ;;  %v4269_v48 = vld [vmem:[#allocation13 + $0x2f0] sm:$0xff] }
0x1315   :  { %5320 = vmatprep.mubr.msk.f32.mxu1 %vm6011_vm6, %v7122_v56  ;;  %v5627_v2 = vpack.c.bf16 %v4269_v48, %v4267_v61 }
0x1316   :  { %5598 = vmatpush1.bf16.msra.mxu0 %v5597_v18 }
0x1317   :  { %5606 = vmatprep.subr.bf16.mxu0 %v5605_v43 }
0x1360   :  { %v6958_v44 = vpop.f32.mrb[42].mxu1 }
0x1361   :  { %v5304_v9 = vpop.f32.mrb[43].mxu1  ;;  %v6993_v29 = vadd.f32 %v6958_v44, %v6777_v23  ;;  %v4558_v23 = vld [vmem:[#allocation17 + $0xc8] sm:$0xff] }
0x1362   :  { %v4266_v9 = vld [vmem:[#allocation13 + $0x2d8] sm:$0xff] }
0x1363   :  { %v5621_v10 = vpack.c.bf16 %v4266_v9, %v4264_v51  ;;  %v4559_v51 = vld [vmem:[#allocation17 + $0xd0] sm:$0xff] }
0x1364   :  { %v5643_v9 = vpack.c.bf16 %v4559_v51, %v4557_v25 }
0x13d5   :  { %v3872_v55 = vpop.f32.mrb[44].mxu0 }
0x13d6   :  { %v5286_v63 = vpop.f32.mrb[45].mxu0 }
0x13dd   :  { %v3945_v42 = vpop.f32.mrb[46].mxu0 }
0x13de   :  { %v3946_v21 = vadd.f32 %v3945_v42, %v3872_v55  ;;  %v5297_v22 = vpop.f32.mrb[47].mxu0  ;;  %v4389_v42 = vld [vmem:[#allocation16 + $0x68] sm:$0xff] }
0x13df   :  { %v4391_v22 = vld [vmem:[#allocation16 + $0x78] sm:$0xff] }
0x13e0   :  { %v3957_v13 = vadd.f32 %v5017_v34, %v3946_v21  ;;  %v4390_v34 = vld [vmem:[#allocation16 + $0x70] sm:$0xff] }
0x13e2   :  { %v5018_v7 = vmul.f32 -1.442695, %v3957_v13 }
0x13e4   :  { %5745 = vpow2.f32 %v5018_v7 }
0x13e7   :  { %v4241_v19 = vpop.f32.mrb[44].mxu1 }
0x13e8   :  { %v5311_v16 = vpop.f32.mrb[45].mxu1  ;;  %v4245_v18 = vadd.f32 %v4241_v19, %v6762_v47  ;;  %v4388_v47 = vld [vmem:[#allocation16 + $0x60] sm:$0xff] }
0x13e9   :  { %v5630_v21 = vpack.c.bf16 %v4389_v42, %v4388_v47 }
0x13eb   :  { %5631 = vmatpush3.bf16.msra.mxu1 %v5630_v21 }
0x13ec   :  { %5632 = vmatprep.subr.bf16.mxu1 %v6012_v24 }
0x13ee   :  { %v5746_v54 = vpop.eup %5745 }
0x13ef   :  { %v3961_v62 = vadd.f32 1.0, %v5746_v54 }
0x13f1   :  { %5747 = vrcp.f32 %v3961_v62 }
0x13fb   :  { %v5748_v15 = vpop.eup %5747 }
0x13fc   :  { %v3964_v11 = vmul.f32 %v5748_v15, %v3957_v13  ;;  %v5633_v13 = vpack.c.bf16 %v4391_v22, %v4390_v34  ;;  %v5027_v34 = vld [vmem:[%s7080_s17 + $0x3] ss:$0 sm:$0xff] }
0x13fe   :  { %5020 = vmatmul.mubr.msk.f32.vlgmr.msra.gmra.mrb[48].mxu0 %vm952_vm9, %v3964_v11  ;;  %5634 = vmatpush3.bf16.msra.mxu1 %v5633_v13  ;;  %v4383_v11 = vld [vmem:[#allocation14 + $0x60] sm:$0xff] }
0x13ff   :  { %5608 = vmatpush1.bf16.msra.mxu0 %v5607_v26  ;;  %4338 = vmatprep.mubr.f32.mxu0 %v7122_v56 }
0x1400   :  { %5610 = vmatprep.subr.bf16.mxu0 %v5609_v31  ;;  %5635 = vmatprep.subr.bf16.mxu1 %v6012_v24  ;;  %v4384_v31 = vld [vmem:[#allocation14 + $0x68] sm:$0xff] }
0x1401   :  { %v5636_v45 = vpack.c.bf16 %v4384_v31, %v4383_v11  ;;  %v4666_v11 = vld [vmem:[%s7083_s20 + $0x8] sm:$0xff]  ;;  %v5029_v31 = vld [vmem:[%s7082_s19 + $0x6] sm:$0x3] }
0x1403   :  { %5612 = vmatpush1.bf16.msra.mxu0 %v5611_v32 }
0x1404   :  { %5614 = vmatprep.subr.bf16.mxu0 %v5613_v35  ;;  %v5639_v35 = vpack.c.bf16 %v4386_v30, %v4385_v46  ;;  %v4668_v46 = vld [vmem:[%s7083_s20 + $0x18] sm:$0xff] }
0x1407   :  { %5616 = vmatpush1.bf16.msra.mxu0 %v5615_v3 }
0x1408   :  { %5618 = vmatprep.subr.bf16.mxu0 %v5617_v20 }
0x140b   :  { %5620 = vmatpush1.bf16.msra.mxu0 %v5619_v28  ;;  %v4562_v28 = vld [vmem:[#allocation17 + $0xe8] sm:$0xff] }
0x140c   :  { %5622 = vmatprep.subr.bf16.mxu0 %v5621_v10  ;;  %v4564_v10 = vld [vmem:[#allocation17 + $0xf8] sm:$0xff] }
0x140d   :  { %v5645_v27 = vpack.c.bf16 %v4564_v10, %v4562_v28 }
0x140f   :  { %5624 = vmatpush1.bf16.msra.mxu0 %v5623_v4 }
0x1410   :  { %5626 = vmatprep.subr.bf16.mxu0 %v5625_v38 }
0x1413   :  { %5628 = vmatpush1.bf16.msra.mxu0 %v5627_v2 }
0x1414   :  { %5649 = vmatprep.subr.bf16.mxu0 %v6012_v24 }
0x1416   :  { %5023 = vmatmul.mubr.msk.f32.vlgmr.msra.gmra.mrb[50].mxu0 %vm1776_vm5, %v4245_v18 }
0x1417   :  { %5342 = vmatprep.mubr.msk.f32.mxu0 %vm6011_vm6, %v7122_v56 }
0x14d1   :  { %v6970_v53 = vpop.f32.mrb[48].mxu0 }
0x14d2   :  { %v6972_v39 = vpop.f32.mrb[49].mxu0 }
0x14e9   :  { %v4340_v43 = vpop.f32.mrb[50].mxu0 }
0x14ea   :  { %v4342_v55 = vpop.f32.mrb[51].mxu0  ;;  %v4363_v7 = vmul.f32 %v4340_v43, %v4340_v43 }
0x14eb   :  { %v4364_v63 = vmul.f32 %v4342_v55, %v4342_v55 }
0x14ed   :  { %4370 = vrot.lane.b32.xlu1 %v4364_v63, %s6016_s8  ;;  %4366 = vrot.lane.b32.xlu0 %v4364_v63, %s6015_s3 }
0x14f1   :  { %3756 = vrot.lane.b32.xlu1 %v6904_v59, %s7123_s1 }
0x14f5   :  { %4347 = vrot.lane.b32.xlu1 %v4340_v43, %s7123_s1 }
0x155f   :  { %v4367_v19 = vpop.permute.xlu0 %4366  ;;  %v4371_v54 = vpop.permute.xlu1 %4370 }
0x1560   :  { %v4369_v16 = vadd.f32 %v4367_v19, %v4363_v7  ;;  %v5019_v19 = vld [vmem:[%s7082_s19 + $0x4] sm:$0x3] }
0x1562   :  { %v4373_v62 = vadd.f32 %v4371_v54, %v4369_v16  ;;  %v3980_v54 = vrot.slane %v5019_v19, %v6477_v41 }
0x1563   :  { %v3757_v32 = vpop.permute.xlu1 %3756 }
0x1564   :  { %v4374_v1 = vadd.f32 1e-08, %v4373_v62 }
0x1566   :  { %5749 = vrsqrt.f32 %v4374_v1  ;;  %vm4377_vm1 = vcmp.eq.f32.partialorder %v4374_v1, inf  ;;  %v4380_v12 = vand.u32 2147483648, %v4374_v1  ;;  %vm4379_vm2 = vcmp.eq.f32.partialorder %v4374_v1, 0.0 }
0x1567   :  { %v4348_v60 = vpop.permute.xlu1 %4347 }
0x1570   :  { %v5750_v5 = vpop.eup %5749 }
0x1571   :  { %v4376_v6 = vmul.f32 %v5750_v5, %v4374_v1 }
0x1573   :  { %v4378_v15 = vsel %vm4377_vm1, %v4374_v1, %v4376_v6  ;;  %v4057_v1 = vadd.f32 %v6970_v53, %v3980_v54 }
0x1574   :  { %v4381_v26 = vsel %vm4379_vm2, %v4380_v12, %v4378_v15 }
0x1575   :  { %4393 = vrot.lane.b32.xlu0 %v4381_v26, %s7123_s1  ;;  %v4665_v26 = vld [vmem:[%s7083_s20] sm:$0xff] }
0x1576   :  { %v5650_v53 = vpack.c.bf16 %v4666_v11, %v4665_v26 }
0x1578   :  { %5651 = vmatpush3.bf16.msra.mxu0 %v5650_v53 }
0x1579   :  { %3758 = vrot.lane.b32.xlu0 %v6906_v40, %s7123_s1  ;;  %5652 = vmatprep.subr.bf16.mxu0 %v6012_v24 }
0x157d   :  { %4349 = vrot.lane.b32.xlu0 %v4342_v55, %s7123_s1 }
0x15e7   :  { %v4394_v17 = vpop.permute.xlu0 %4393 }
0x15e8   :  { %5321 = vmatmul.mubr.msk.f32.vlgmr.msra.gmra.mrb[46].mxu1 %vm952_vm9, %v4394_v17  ;;  %v4571_v17 = vrot.slane %v5029_v31, %v6477_v41 }
0x15e9   :  { %5637 = vmatpush3.bf16.msra.mxu1 %v5636_v45  ;;  %5331 = vmatprep.mubr.msk.f32.mxu1 %vm6011_vm6, %v7122_v56  ;;  %v4667_v45 = vld [vmem:[%s7083_s20 + $0x10] sm:$0xff] }
0x15ea   :  { %5638 = vmatprep.subr.bf16.mxu1 %v6012_v24  ;;  %v5653_v30 = vpack.c.bf16 %v4668_v46, %v4667_v45 }
0x15eb   :  { %v3759_v14 = vpop.permute.xlu0 %3758 }
0x15ec   :  { %v3760_v40 = vsel %vm952_vm9, %v3757_v32, %v3759_v14  ;;  %5654 = vmatpush3.bf16.msra.mxu0 %v5653_v30 }
0x15ed   :  { %v3762_v50 = vmul.f32 %v3760_v40, %v6904_v59  ;;  %5640 = vmatpush3.bf16.msra.mxu1 %v5639_v35  ;;  %v4560_v59 = vld [vmem:[#allocation17 + $0xd8] sm:$0xff] }
0x15ee   :  { %v5641_v44 = vpack.c.bf16 %v4560_v59, %v4558_v23 }
0x15ef   :  { %3764 = vrot.lane.b32.xlu1 %v3762_v50, %s6015_s3  ;;  %v4350_v3 = vpop.permute.xlu0 %4349 }
0x15f0   :  { %5332 = vmatmul.mubr.msk.f32.vlgmr.msra.gmra.mrb[48].mxu1 %vm952_vm9, %v6993_v29  ;;  %v4351_v20 = vsel %vm952_vm9, %v4348_v60, %v4350_v3  ;;  %5642 = vmatprep.subr.bf16.mxu1 %v5641_v44  ;;  %v3984_v60 = vrot.slane %v5019_v19, %v6468_v37 }
0x15f1   :  { %v4353_v49 = vmul.f32 %v4351_v20, %v4340_v43  ;;  %4645 = vmatprep.mubr.f32.mxu1 %v7122_v56  ;;  %5644 = vmatpush1.bf16.msra.mxu1 %v5643_v9  ;;  %v4575_v20 = vrot.slane %v5029_v31, %v6468_v37  ;;  %v4758_v37 = vld [vmem:[%s7085_s22 + $0x8] sm:$0xff] }
0x15f2   :  { %5646 = vmatprep.subr.bf16.mxu1 %v5645_v27 }
0x15f3   :  { %3768 = vrot.lane.b32.xlu1 %v3762_v50, %s6016_s8  ;;  %4355 = vrot.lane.b32.xlu0 %v4353_v49, %s6015_s3 }
0x15f5   :  { %5648 = vmatpush1.bf16.msra.mxu1 %v5647_v52 }
0x15f6   :  { %5655 = vmatprep.subr.bf16.mxu1 %v6012_v24 }
0x15f7   :  { %4359 = vrot.lane.b32.xlu0 %v4353_v49, %s6016_s8 }
0x1661   :  { %v3765_v4 = vpop.permute.xlu1 %3764 }
0x1662   :  { %v3767_v38 = vadd.f32 %v3765_v4, %v3762_v50 }
0x1665   :  { %v3769_v61 = vpop.permute.xlu1 %3768  ;;  %v4356_v48 = vpop.permute.xlu0 %4355 }
0x1666   :  { %v3771_v2 = vadd.f32 %v3769_v61, %v3767_v38  ;;  %v4358_v18 = vadd.f32 %v4356_v48, %v4353_v49  ;;  %v4059_v49 = vadd.f32 %v6972_v39, %v3984_v60  ;;  %v4931_v61 = vld [vmem:[#allocation3] ss:$0 sm:$0xff]  ;;  %v5034_v48 = vld [vmem:[#allocation2] ss:$0 sm:$0xff] }
0x1668   :  { %4062 = vrot.lane.b32.xlu1 %v3771_v2, %s6015_s3 }
0x1669   :  { %v4360_v43 = vpop.permute.xlu0 %4359 }
0x166a   :  { %v4362_v55 = vadd.f32 %v4360_v43, %v4358_v18 }
0x166c   :  { %4653 = vrot.lane.b32.xlu0 %v4362_v55, %s6015_s3 }
0x16bb   :  { %v4463_v63 = vpop.f32.mrb[46].mxu1 }
0x16bc   :  { %v5322_v47 = vpop.f32.mrb[47].mxu1 }
0x16c3   :  { %v4536_v42 = vpop.f32.mrb[48].mxu1 }
0x16c4   :  { %v4537_v21 = vadd.f32 %v4536_v42, %v4463_v63  ;;  %v5333_v22 = vpop.f32.mrb[49].mxu1 }
0x16c6   :  { %v4548_v13 = vadd.f32 %v5027_v34, %v4537_v21 }
0x16c8   :  { %v5028_v7 = vmul.f32 -1.442695, %v4548_v13 }
0x16ca   :  { %5751 = vpow2.f32 %v5028_v7 }
0x16d4   :  { %v5752_v16 = vpop.eup %5751 }
0x16d5   :  { %v4552_v62 = vadd.f32 1.0, %v5752_v16 }
0x16d7   :  { %5753 = vrcp.f32 %v4552_v62 }
0x16da   :  { %v4063_v5 = vpop.permute.xlu1 %4062 }
0x16db   :  { %v4065_v6 = vmul.f32 %v4063_v5, %v4057_v1 }
0x16dd   :  { %4067 = vrot.lane.b32.xlu1 %v4065_v6, %s7123_s1 }
0x16de   :  { %v4654_v40 = vpop.permute.xlu0 %4653 }
0x16e1   :  { %v5754_v12 = vpop.eup %5753 }
0x16e2   :  { %v4555_v15 = vmul.f32 %v5754_v12, %v4548_v13 }
0x16e4   :  { %5030 = vmatmul.mubr.msk.f32.vlgmr.msra.gmra.mrb[50].mxu1 %vm952_vm9, %v4555_v15 }
0x16e5   :  { %5349 = vmatprep.mubr.msk.f32.mxu1 %vm6011_vm6, %v7122_v56 }
0x174f   :  { %v4068_v24 = vpop.permute.xlu1 %4067 }
0x1750   :  { %v4070_v3 = vadd.f32 %v4068_v24, %v6941_v58  ;;  %v4757_v58 = vld [vmem:[%s7085_s22] sm:$0xff] }
0x1751   :  { %v5656_v39 = vpack.c.bf16 %v4758_v37, %v4757_v58 }
0x1752   :  { %v4071_v59 = vadd.f32 %v4070_v3, %v4059_v49 }
0x1753   :  { %5657 = vmatpush3.bf16.msra.mxu1 %v5656_v39 }
0x1754   :  { %v4072_v51 = vmul.f32 %v4071_v59, %v6753_v8  ;;  %5352 = vmatprep.subr.mxu1 %v7122_v56  ;;  %v5031_v8 = vld [vmem:[%s7084_s21] ss:$0 sm:$0xff] }
0x17b7   :  { %v4647_v32 = vpop.f32.mrb[50].mxu1 }
0x17b8   :  { %v4648_v35 = vadd.f32 %v4647_v32, %v4571_v17  ;;  %v4649_v14 = vpop.f32.mrb[51].mxu1 }
0x17b9   :  { %v4650_v41 = vadd.f32 %v4649_v14, %v4575_v20 }
0x17ba   :  { %v4656_v50 = vmul.f32 %v4654_v40, %v4648_v35 }
0x17bc   :  { %4658 = vrot.lane.b32.xlu0 %v4656_v50, %s7123_s1 }
0x182e   :  { %v4659_v23 = vpop.permute.xlu0 %4658 }
0x182f   :  { %v4661_v44 = vadd.f32 %v4659_v23, %v6993_v29 }
0x1831   :  { %v4662_v25 = vadd.f32 %v4661_v44, %v4650_v41 }
0x1833   :  { %v4663_v9 = vmul.f32 %v4662_v25, %v6757_v57 }
0x1835   :  { %v4664_v28 = vadd.f32 %v4663_v9, %v4072_v51 }
0x1837   :  { %5343 = vmatmul.mubr.msk.f32.vlgmr.msra.gmra.mrb[52].mxu0 %vm952_vm9, %v4664_v28  ;;  %vm261_vm9 = vcmp.eq.s32.totalorder %v6465_v36, %v4931_v61 }
0x1838   :  { %v4932_v55 = vsel %vm261_vm9, 1.0, %v7122_v56 }
0x190a   :  { %v4745_v57 = vpop.f32.mrb[52].mxu0 }
0x190b   :  { %v4746_v29 = vadd.f32 %v5031_v8, %v4745_v57  ;;  %v5344_v10 = vpop.f32.mrb[53].mxu0 }
0x190d   :  { %v5033_v27 = vmul.f32 -1.442695, %v4746_v29 }
0x190f   :  { %5755 = vpow2.f32 %v5033_v27 }
0x1919   :  { %v5756_v33 = vpop.eup %5755 }
0x191a   :  { %v4752_v0 = vadd.f32 1.0, %v5756_v33 }
0x191c   :  { %5757 = vrcp.f32 %v4752_v0 }
0x1926   :  { %v5758_v52 = vpop.eup %5757 }
0x1927   :  { %v4755_v4 = vmul.f32 %v5758_v52, %v4746_v29 }
0x1929   :  { %v4756_v38 = vmul.f32 1.6666666, %v4755_v4 }
0x192b   :  { %5350 = vmatmul.mubr.msk.f32.vlgmr.msra.gmra.mrb[52].mxu1 %vm1263_vm7, %v4756_v38 }
0x192c   :  { %5354 = vmatprep.mubr.msk.f32.mxu1 %vm6011_vm6, %v7122_v56 }
0x19fe   :  { %v4835_v2 = vpop.f32.mrb[52].mxu1 }
0x19ff   :  { %v4836_v18 = vadd.f32 %v5034_v48, %v4835_v2  ;;  %v5351_v43 = vpop.f32.mrb[53].mxu1 }
0x1a01   :  { %5353 = vmatpush3.msra.mxu1 %v4836_v18 }
0x1a02   :  { %5355 = vmatmul.mubr.msk.f32.vlgmr.msra.gmra.mrb[54].mxu1 %vm265_vm0, %v4932_v55 }
0x1ad5   :  { %v4908_v63 = vpop.f32.mrb[54].mxu1 }
0x1ad6   :  { %4913 = vst.msk [vmem:[%s7087_s24] sm:$0x3] %vm4912_vm3, %v4908_v63  ;;  %v5356_v47 = vpop.f32.mrb[55].mxu1 }
0x1ad7   :  { %4918 = vsyncpa [#allocation4], 1 }
0x1ad8   :  { %4919 = vsyncpa [#allocation6], 1 }
0x1ad9   :  { %4920 = vsyncpa [#allocation9], 1 }
0x1ada   :  { %4921 = vsyncpa [#allocation12], 1 }
0x1adb   :  { %4922 = vsyncpa [#allocation15], 1 }
0x1adc   :  { %4923 = vsyncpa [#allocation18], 1 }

</bundles_post_ra>
